<compile_context>
chip_gen: v7x
topology: tpu7x:2x2x1
jax: 0.10.0
libtpu: 0.0.40
codegen_flags: <defaults>
</compile_context>

<pallas_src>
import jax
import jax.numpy as jnp
from jax import lax
from jax.experimental import pallas as pl
from jax.experimental.pallas import tpu as pltpu

_LANES = 128


def _round_up(x, m):
    return (x + m - 1) // m * m


def _default_block_h(N, H, min_steps=4):
    """Largest divisor of H giving >= min_steps total grid steps."""
    need = -(-min_steps // N)  # ceil(min_steps / N)
    for bh in range(H, 0, -1):
        if H % bh == 0 and H // bh >= need:
            return bh
    return H


def _basic_block_kernel(xp_ref, w1_ref, w2_ref, b1_ref, b2_ref, o_ref, mid_ref):
    # xp_ref : (H+4, W+2, Cp)   bf16  spatially padded input, one image
    # w*_ref : (3, 3*Cp, Cp)    bf16  BN-scale-folded weights [kh, kw*Cp+ci, co]
    # b*_ref : (1, Cp)          f32   folded BatchNorm bias
    # o_ref  : (TH, W, Cp)      bf16  output rows of this grid step
    # mid_ref: (TH+2, W+2, Cp)  bf16  VMEM staging for conv1 output (+ halos)
    Hp4, Wp2, Cp = xp_ref.shape
    W = Wp2 - 2
    TH = o_ref.shape[0]
    THe = TH + 2                      # conv1 rows needed by conv2 (row halo)

    t = pl.program_id(1)
    h0 = pl.multiple_of(t * TH, TH)   # first output row of this tile

    # conv2 needs conv1 rows [h0-1, h0+TH+1), which need x rows
    # [h0-2, h0+TH+2)  ==  xp rows [h0, h0+TH+4)  (input pre-padded 2 rows /
    # 1 column).  Dynamic slice along the leading (untiled) axis is cheap.
    xs = xp_ref[pl.ds(h0, TH + 4), :, :]                 # (TH+4, W+2, Cp) bf16

    # Build the im2col slab ONCE: lane-concat the three kw-shifted column
    # windows over all TH+4 rows; each kh matmul below consumes a contiguous,
    # sublane-aligned row-shifted slice (static offset kh*W, W % 8 == 0).
    big1 = jnp.concatenate(
        [xs[:, kw:kw + W, :].reshape((TH + 4) * W, Cp) for kw in range(3)],
        axis=-1)                                         # ((TH+4)*W, 3*Cp)

    # Residual rows x[h0:h0+TH, :, :] == flattened rows [2W, (2+TH)W) of the
    # kw=1 lane segment (lane offset Cp, a multiple of 128).
    res = big1[2 * W:(2 + TH) * W, Cp:2 * Cp].astype(jnp.float32)

    # ---- conv1 (bn1 scale folded into weights) + bias + relu ---------------
    acc1 = jnp.dot(big1[0:THe * W, :], w1_ref[0],
                   preferred_element_type=jnp.float32)
    for kh in (1, 2):
        acc1 += jnp.dot(big1[kh * W:(kh + THe) * W, :], w1_ref[kh],
                        preferred_element_type=jnp.float32)
    y1 = jnp.maximum(acc1 + b1_ref[...], 0.0)            # (THe*W, Cp) f32

    # ---- stage conv1 output in VMEM with zero halos ------------------------
    # Zero only the two halo COLUMNS, write the interior, then zero the
    # out-of-image halo ROW only on the first / last row tile (conv2's
    # padding must be 0, not bn1(conv1(zero-pad)) which has a nonzero bias).
    mid_ref[:, 0:1, :] = jnp.zeros((THe, 1, Cp), mid_ref.dtype)
    mid_ref[:, W + 1:W + 2, :] = jnp.zeros((THe, 1, Cp), mid_ref.dtype)
    mid_ref[:, 1:1 + W, :] = y1.reshape(THe, W, Cp).astype(mid_ref.dtype)

    @pl.when(t == 0)
    def _():
        mid_ref[0:1, :, :] = jnp.zeros((1, Wp2, Cp), mid_ref.dtype)

    @pl.when(t == pl.num_programs(1) - 1)
    def _():
        mid_ref[THe - 1:THe, :, :] = jnp.zeros((1, Wp2, Cp), mid_ref.dtype)

    # ---- conv2 (bn2 scale folded) + bias + residual add + relu -------------
    z = mid_ref[...]                                     # (THe, W+2, Cp) bf16
    big2 = jnp.concatenate(
        [z[:, kw:kw + W, :].reshape(THe * W, Cp) for kw in range(3)],
        axis=-1)                                         # (THe*W, 3*Cp)
    acc2 = jnp.dot(big2[0:TH * W, :], w2_ref[0],
                   preferred_element_type=jnp.float32)
    for kh in (1, 2):
        acc2 += jnp.dot(big2[kh * W:(kh + TH) * W, :], w2_ref[kh],
                        preferred_element_type=jnp.float32)
    out = jnp.maximum(acc2 + b2_ref[...] + res, 0.0)
    o_ref[...] = out.reshape(TH, W, Cp).astype(o_ref.dtype)


def basic_block_forward_nhwc(x_nhwc, params, *, block_h=None,
                             vmem_limit_bytes=32 * 1024 * 1024):
    """Fused BasicBlock forward on NHWC input (stride=1, no downsample).

    x_nhwc: (N, H, W, C) with planes <= C <= Cp (channels beyond `planes`
    must be zero); returned activation is (N, H, W, Cp) bf16, lane-padded —
    feed it straight into the next block to avoid NCHW<->NHWC HBM traffic.
    """
    N, H, W, C = x_nhwc.shape
    Cp = params["w1"].shape[-1]
    assert C <= Cp
    assert W % 8 == 0, "W must be a multiple of 8 (sublane-aligned reshapes)"
    if block_h is None:
        block_h = _default_block_h(N, H)
    assert H % block_h == 0, "block_h must divide H"
    n_ht = H // block_h

    # Single pad: spatial halo (2 rows top/bottom, 1 col each side) + channel
    # padding to the lane width, in bf16.
    xp = jnp.pad(x_nhwc.astype(jnp.bfloat16),
                 ((0, 0), (2, 2), (1, 1), (0, Cp - C)))

    w_spec = pl.BlockSpec((3, 3 * Cp, Cp), lambda n, t: (0, 0, 0))
    v_spec = pl.BlockSpec((1, Cp), lambda n, t: (0, 0))

    # NOTE: 32 MiB scoped VMEM is safe on all of v5e/v6e/v7x; for very large
    # Cp on v5e/v6e this can be raised (they have 128 MiB physical) to allow
    # bigger row tiles instead of shrinking block_h.
    return pl.pallas_call(
        _basic_block_kernel,
        out_shape=jax.ShapeDtypeStruct((N, H, W, Cp), jnp.bfloat16),
        grid_spec=pltpu.PrefetchScalarGridSpec(
            num_scalar_prefetch=0,
            grid=(N, n_ht),
            in_specs=[
                # Whole padded image, indexed by batch only: DMA'd once per
                # image and revisited across the H-row tiles.
                pl.BlockSpec((None, H + 4, W + 2, Cp),
                             lambda n, t: (n, 0, 0, 0)),
                w_spec, w_spec,                       # conv1 / conv2 weights
                v_spec, v_spec,                       # bn1 / bn2 folded bias
            ],
            out_specs=pl.BlockSpec((None, block_h, W, Cp),
                                   lambda n, t: (n, t, 0, 0)),
            scratch_shapes=[
                pltpu.VMEM((block_h + 2, W + 2, Cp), jnp.bfloat16)],
        ),
        compiler_params=pltpu.CompilerParams(
            dimension_semantics=("parallel", "parallel"),
            vmem_limit_bytes=vmem_limit_bytes),
    )(xp, params["w1"], params["w2"], params["bias1"], params["bias2"])


def basic_block_forward(x_nchw, params, *, block_h=None):
    """Module-faithful NCHW f32 adapter around the NHWC kernel path."""
    N, Cin, H, W = x_nchw.shape
    planes = params["planes"]
    assert Cin == planes, "identity residual requires inplanes == planes"
    x = jnp.transpose(x_nchw, (0, 2, 3, 1))
    out = basic_block_forward_nhwc(x, params, block_h=block_h)
    return jnp.transpose(out[..., :planes], (0, 3, 1, 2)).astype(jnp.float32)


def make_params(key, inplanes, planes, eps=1e-5):
    assert inplanes == planes, "default BasicBlock (no downsample) path"
    Cp = _round_up(planes, _LANES)
    ks = jax.random.split(key, 10)
    w1_oihw = jax.random.normal(ks[0], (planes, inplanes, 3, 3), jnp.float32) * 0.1
    w2_oihw = jax.random.normal(ks[1], (planes, planes, 3, 3), jnp.float32) * 0.1
    g1 = jax.random.uniform(ks[2], (planes,), minval=0.5, maxval=1.5)
    b1 = jax.random.normal(ks[3], (planes,), jnp.float32) * 0.1
    m1 = jax.random.normal(ks[4], (planes,), jnp.float32) * 0.1
    v1 = jax.random.uniform(ks[5], (planes,), minval=0.5, maxval=1.5)
    g2 = jax.random.uniform(ks[6], (planes,), minval=0.5, maxval=1.5)
    b2 = jax.random.normal(ks[7], (planes,), jnp.float32) * 0.1
    m2 = jax.random.normal(ks[8], (planes,), jnp.float32) * 0.1
    v2 = jax.random.uniform(ks[9], (planes,), minval=0.5, maxval=1.5)

    scale1 = g1 / jnp.sqrt(v1 + eps)
    bias1 = b1 - m1 * scale1
    scale2 = g2 / jnp.sqrt(v2 + eps)
    bias2 = b2 - m2 * scale2

    def fold_w(w_oihw, scale, cin, cout):
        # OIHW -> (kh, kw, ci, co); fold the BN scale into the co axis (in
        # f32, before the bf16 cast); zero-pad channels to Cp; fold (kw, ci)
        # into the contraction axis: (3, 3*Cp, Cp) bf16 for the MXU.
        w = jnp.transpose(w_oihw, (2, 3, 1, 0)) * scale.reshape(1, 1, 1, -1)
        w = jnp.pad(w, ((0, 0), (0, 0), (0, Cp - cin), (0, Cp - cout)))
        return w.reshape(3, 3 * Cp, Cp).astype(jnp.bfloat16)

    def pad_vec(v):
        return jnp.pad(v, (0, Cp - planes)).reshape(1, Cp).astype(jnp.float32)

    params = dict(
        planes=planes,
        w1=fold_w(w1_oihw, scale1, inplanes, planes),
        w2=fold_w(w2_oihw, scale2, planes, planes),
        bias1=pad_vec(bias1), bias2=pad_vec(bias2),
    )
    ref = dict(w1_oihw=w1_oihw, w2_oihw=w2_oihw,
               scale1=scale1, bias1=bias1, scale2=scale2, bias2=bias2)
    return params, ref


def reference_forward(x_nchw, ref):
    """Plain-XLA reference (unfolded BN) with bf16 conv inputs / f32 accumulate."""
    def conv(x, w):
        return lax.conv_general_dilated(
            x.astype(jnp.bfloat16), w.astype(jnp.bfloat16),
            window_strides=(1, 1), padding=((1, 1), (1, 1)),
            dimension_numbers=("NCHW", "OIHW", "NCHW"),
            preferred_element_type=jnp.float32)

    def bn(y, s, b):
        return y * s.reshape(1, -1, 1, 1) + b.reshape(1, -1, 1, 1)

    x_bf = x_nchw.astype(jnp.bfloat16)
    out = jnp.maximum(
        bn(conv(x_bf, ref["w1_oihw"]), ref["scale1"], ref["bias1"]), 0.0)
    out = bn(conv(out.astype(jnp.bfloat16), ref["w2_oihw"]),
             ref["scale2"], ref["bias2"])
    out = out + x_bf.astype(jnp.float32)
    return jnp.maximum(out, 0.0)


if __name__ == "__main__":
    key = jax.random.PRNGKey(0)
    kx, kp = jax.random.split(key)

    N, C, H, W = 2, 4, 16, 16            # inplanes = planes = 4, stride = 1
    x = jax.random.normal(kx, (N, C, H, W), jnp.float32)
    params, ref = make_params(kp, inplanes=C, planes=C)

    # Default block_h -> 8 here, i.e. grid (2, 2): exercises both boundary and
    # interior row tiles and gives >= 4 grid steps for the pipeline / 2 TCs.
    out = jax.block_until_ready(basic_block_forward(x, params))
    expected = jax.block_until_ready(reference_forward(x, ref))

    assert out.shape == (N, C, H, W)
    # Tolerance covers bf16 output rounding plus the bf16 rounding point of
    # the folded (weight * bn_scale) parameters vs the unfolded reference.
    max_err = float(jnp.max(jnp.abs(out - expected)))
    assert jnp.allclose(out, expected, atol=2e-2, rtol=2e-2), max_err

    print("KERNEL_OK")
</pallas_src>

<mosaic_0001>
module attributes {stable_mosaic.version = 11 : i64} {
  func.func @_basic_block_kernel(%arg0: i32, %arg1: i32, %arg2: memref<1x20x18x128xbf16, #tpu.memory_space<vmem>>, %arg3: memref<3x384x128xbf16, #tpu.memory_space<vmem>>, %arg4: memref<3x384x128xbf16, #tpu.memory_space<vmem>>, %arg5: memref<1x128xf32, #tpu.memory_space<vmem>>, %arg6: memref<1x128xf32, #tpu.memory_space<vmem>>, %arg7: memref<1x8x16x128xbf16, #tpu.memory_space<vmem>>, %arg8: memref<10x18x128xbf16, #tpu.memory_space<vmem>>) attributes {dimension_semantics = [#tpu.dimension_semantics<parallel>, #tpu.dimension_semantics<parallel>], iteration_bounds = array<i64: 2, 2>, scalar_prefetch = 0 : i64, scratch_operands = 1 : i64, tpu.core_type = #tpu.core_type<tc>, window_params = [{transform_indices = @transform_0, window_bounds = array<i64: 1, 20, 18, 128>}, {pipeline_mode = #tpu.pipeline_mode<synchronous>, transform_indices = @transform_1, window_bounds = array<i64: 3, 384, 128>}, {pipeline_mode = #tpu.pipeline_mode<synchronous>, transform_indices = @transform_2, window_bounds = array<i64: 3, 384, 128>}, {pipeline_mode = #tpu.pipeline_mode<synchronous>, transform_indices = @transform_3, window_bounds = array<i64: 1, 128>}, {pipeline_mode = #tpu.pipeline_mode<synchronous>, transform_indices = @transform_4, window_bounds = array<i64: 1, 128>}, {transform_indices = @transform_5, window_bounds = array<i64: 1, 8, 16, 128>}]} {
    %c8_i32 = arith.constant 8 : i32
    %0 = arith.muli %arg1, %c8_i32 : i32
    %1 = tpu.assume_multiple %0, 8 : i32
    %c0 = arith.constant 0 : index
    %2 = arith.index_cast %1 : i32 to index
    %c0_0 = arith.constant 0 : index
    %c0_1 = arith.constant 0 : index
    %3 = vector.load %arg2[%c0, %2, %c0_0, %c0_1] : memref<1x20x18x128xbf16, #tpu.memory_space<vmem>>, vector<1x12x18x128xbf16>
    %4 = vector.shape_cast %3 : vector<1x12x18x128xbf16> to vector<12x18x128xbf16>
    %5 = vector.extract_strided_slice %4 {offsets = [0, 0, 0], sizes = [12, 16, 128], strides = [1, 1, 1]} : vector<12x18x128xbf16> to vector<12x16x128xbf16>
    %6 = vector.shape_cast %5 : vector<12x16x128xbf16> to vector<192x128xbf16>
    %7 = vector.extract_strided_slice %4 {offsets = [0, 1, 0], sizes = [12, 16, 128], strides = [1, 1, 1]} : vector<12x18x128xbf16> to vector<12x16x128xbf16>
    %8 = vector.shape_cast %7 : vector<12x16x128xbf16> to vector<192x128xbf16>
    %9 = vector.extract_strided_slice %4 {offsets = [0, 2, 0], sizes = [12, 16, 128], strides = [1, 1, 1]} : vector<12x18x128xbf16> to vector<12x16x128xbf16>
    %10 = vector.shape_cast %9 : vector<12x16x128xbf16> to vector<192x128xbf16>
    %11 = tpu.concatenate %6, %8, %10 in 1 : vector<192x128xbf16>, vector<192x128xbf16>, vector<192x128xbf16> -> vector<192x384xbf16>
    %12 = vector.extract_strided_slice %11 {offsets = [32, 128], sizes = [128, 128], strides = [1, 1]} : vector<192x384xbf16> to vector<128x128xbf16>
    %13 = arith.extf %12 : vector<128x128xbf16> to vector<128x128xf32>
    %14 = vector.extract_strided_slice %11 {offsets = [0, 0], sizes = [160, 384], strides = [1, 1]} : vector<192x384xbf16> to vector<160x384xbf16>
    %c0_2 = arith.constant 0 : index
    %c0_3 = arith.constant 0 : index
    %c0_4 = arith.constant 0 : index
    %15 = vector.load %arg3[%c0_2, %c0_3, %c0_4] : memref<3x384x128xbf16, #tpu.memory_space<vmem>>, vector<1x384x128xbf16>
    %16 = vector.shape_cast %15 : vector<1x384x128xbf16> to vector<384x128xbf16>
    %cst = arith.constant dense<0.000000e+00> : vector<160x128xf32>
    %17 = tpu.matmul %14, %16, %cst {dimension_numbers = #tpu.dot_dimension_numbers<[1], [0], [0], [1], [0, 0, 1, 1], [], []>} : vector<160x384xbf16>, vector<384x128xbf16>, vector<160x128xf32> -> vector<160x128xf32>
    %18 = vector.extract_strided_slice %11 {offsets = [16, 0], sizes = [160, 384], strides = [1, 1]} : vector<192x384xbf16> to vector<160x384xbf16>
    %c1 = arith.constant 1 : index
    %c0_5 = arith.constant 0 : index
    %c0_6 = arith.constant 0 : index
    %19 = vector.load %arg3[%c1, %c0_5, %c0_6] : memref<3x384x128xbf16, #tpu.memory_space<vmem>>, vector<1x384x128xbf16>
    %20 = vector.shape_cast %19 : vector<1x384x128xbf16> to vector<384x128xbf16>
    %cst_7 = arith.constant dense<0.000000e+00> : vector<160x128xf32>
    %21 = tpu.matmul %18, %20, %cst_7 {dimension_numbers = #tpu.dot_dimension_numbers<[1], [0], [0], [1], [0, 0, 1, 1], [], []>} : vector<160x384xbf16>, vector<384x128xbf16>, vector<160x128xf32> -> vector<160x128xf32>
    %22 = arith.addf %17, %21 : vector<160x128xf32>
    %23 = vector.extract_strided_slice %11 {offsets = [32, 0], sizes = [160, 384], strides = [1, 1]} : vector<192x384xbf16> to vector<160x384xbf16>
    %c2 = arith.constant 2 : index
    %c0_8 = arith.constant 0 : index
    %c0_9 = arith.constant 0 : index
    %24 = vector.load %arg3[%c2, %c0_8, %c0_9] : memref<3x384x128xbf16, #tpu.memory_space<vmem>>, vector<1x384x128xbf16>
    %25 = vector.shape_cast %24 : vector<1x384x128xbf16> to vector<384x128xbf16>
    %cst_10 = arith.constant dense<0.000000e+00> : vector<160x128xf32>
    %26 = tpu.matmul %23, %25, %cst_10 {dimension_numbers = #tpu.dot_dimension_numbers<[1], [0], [0], [1], [0, 0, 1, 1], [], []>} : vector<160x384xbf16>, vector<384x128xbf16>, vector<160x128xf32> -> vector<160x128xf32>
    %27 = arith.addf %22, %26 : vector<160x128xf32>
    %c0_11 = arith.constant 0 : index
    %c0_12 = arith.constant 0 : index
    %28 = vector.load %arg5[%c0_11, %c0_12] : memref<1x128xf32, #tpu.memory_space<vmem>>, vector<1x128xf32>
    %29 = vector.broadcast %28 : vector<1x128xf32> to vector<160x128xf32>
    %30 = arith.addf %27, %29 : vector<160x128xf32>
    %cst_13 = arith.constant 0.000000e+00 : f32
    %31 = vector.broadcast %cst_13 : f32 to vector<160x128xf32>
    %32 = arith.maximumf %30, %31 : vector<160x128xf32>
    %cst_14 = arith.constant 0.000000e+00 : bf16
    %33 = vector.broadcast %cst_14 : bf16 to vector<10x1x128xbf16>
    %c0_15 = arith.constant 0 : index
    %c0_16 = arith.constant 0 : index
    %c0_17 = arith.constant 0 : index
    %34 = vector.load %arg8[%c0_15, %c0_16, %c0_17] : memref<10x18x128xbf16, #tpu.memory_space<vmem>>, vector<10x1x128xbf16>
    tpu.vector_store %arg8[%c0_15, %c0_16, %c0_17], %33 {strides = array<i32>} : memref<10x18x128xbf16, #tpu.memory_space<vmem>>, vector<10x1x128xbf16>,
    %cst_18 = arith.constant 0.000000e+00 : bf16
    %35 = vector.broadcast %cst_18 : bf16 to vector<10x1x128xbf16>
    %c0_19 = arith.constant 0 : index
    %c17 = arith.constant 17 : index
    %c0_20 = arith.constant 0 : index
    %36 = vector.load %arg8[%c0_19, %c17, %c0_20] : memref<10x18x128xbf16, #tpu.memory_space<vmem>>, vector<10x1x128xbf16>
    tpu.vector_store %arg8[%c0_19, %c17, %c0_20], %35 {strides = array<i32>} : memref<10x18x128xbf16, #tpu.memory_space<vmem>>, vector<10x1x128xbf16>,
    %37 = vector.shape_cast %32 : vector<160x128xf32> to vector<10x16x128xf32>
    %38 = arith.truncf %37 : vector<10x16x128xf32> to vector<10x16x128xbf16>
    %c0_21 = arith.constant 0 : index
    %c1_22 = arith.constant 1 : index
    %c0_23 = arith.constant 0 : index
    %39 = vector.load %arg8[%c0_21, %c1_22, %c0_23] : memref<10x18x128xbf16, #tpu.memory_space<vmem>>, vector<10x16x128xbf16>
    tpu.vector_store %arg8[%c0_21, %c1_22, %c0_23], %38 {strides = array<i32>} : memref<10x18x128xbf16, #tpu.memory_space<vmem>>, vector<10x16x128xbf16>,
    %c0_i32 = arith.constant 0 : i32
    %40 = arith.cmpi eq, %arg1, %c0_i32 : i32
    %41 = arith.extui %40 : i1 to i32
    %c0_i32_24 = arith.constant 0 : i32
    %42 = arith.cmpi ne, %41, %c0_i32_24 : i32
    scf.if %42 {
      %cst_48 = arith.constant 0.000000e+00 : bf16
      %79 = vector.broadcast %cst_48 : bf16 to vector<1x18x128xbf16>
      %c0_49 = arith.constant 0 : index
      %c0_50 = arith.constant 0 : index
      %c0_51 = arith.constant 0 : index
      %80 = vector.load %arg8[%c0_49, %c0_50, %c0_51] : memref<10x18x128xbf16, #tpu.memory_space<vmem>>, vector<1x18x128xbf16>
      tpu.vector_store %arg8[%c0_49, %c0_50, %c0_51], %79 {strides = array<i32>} : memref<10x18x128xbf16, #tpu.memory_space<vmem>>, vector<1x18x128xbf16>,
    } else {
    }
    %c1_i32 = arith.constant 1 : i32
    %43 = arith.cmpi eq, %arg1, %c1_i32 : i32
    %44 = arith.extui %43 : i1 to i32
    %c0_i32_25 = arith.constant 0 : i32
    %45 = arith.cmpi ne, %44, %c0_i32_25 : i32
    scf.if %45 {
      %cst_48 = arith.constant 0.000000e+00 : bf16
      %79 = vector.broadcast %cst_48 : bf16 to vector<1x18x128xbf16>
      %c9 = arith.constant 9 : index
      %c0_49 = arith.constant 0 : index
      %c0_50 = arith.constant 0 : index
      %80 = vector.load %arg8[%c9, %c0_49, %c0_50] : memref<10x18x128xbf16, #tpu.memory_space<vmem>>, vector<1x18x128xbf16>
      tpu.vector_store %arg8[%c9, %c0_49, %c0_50], %79 {strides = array<i32>} : memref<10x18x128xbf16, #tpu.memory_space<vmem>>, vector<1x18x128xbf16>,
    } else {
    }
    %c0_26 = arith.constant 0 : index
    %c0_27 = arith.constant 0 : index
    %c0_28 = arith.constant 0 : index
    %46 = vector.load %arg8[%c0_26, %c0_27, %c0_28] : memref<10x18x128xbf16, #tpu.memory_space<vmem>>, vector<10x18x128xbf16>
    %47 = vector.extract_strided_slice %46 {offsets = [0, 0, 0], sizes = [10, 16, 128], strides = [1, 1, 1]} : vector<10x18x128xbf16> to vector<10x16x128xbf16>
    %48 = vector.shape_cast %47 : vector<10x16x128xbf16> to vector<160x128xbf16>
    %49 = vector.extract_strided_slice %46 {offsets = [0, 1, 0], sizes = [10, 16, 128], strides = [1, 1, 1]} : vector<10x18x128xbf16> to vector<10x16x128xbf16>
    %50 = vector.shape_cast %49 : vector<10x16x128xbf16> to vector<160x128xbf16>
    %51 = vector.extract_strided_slice %46 {offsets = [0, 2, 0], sizes = [10, 16, 128], strides = [1, 1, 1]} : vector<10x18x128xbf16> to vector<10x16x128xbf16>
    %52 = vector.shape_cast %51 : vector<10x16x128xbf16> to vector<160x128xbf16>
    %53 = tpu.concatenate %48, %50, %52 in 1 : vector<160x128xbf16>, vector<160x128xbf16>, vector<160x128xbf16> -> vector<160x384xbf16>
    %54 = vector.extract_strided_slice %53 {offsets = [0, 0], sizes = [128, 384], strides = [1, 1]} : vector<160x384xbf16> to vector<128x384xbf16>
    %c0_29 = arith.constant 0 : index
    %c0_30 = arith.constant 0 : index
    %c0_31 = arith.constant 0 : index
    %55 = vector.load %arg4[%c0_29, %c0_30, %c0_31] : memref<3x384x128xbf16, #tpu.memory_space<vmem>>, vector<1x384x128xbf16>
    %56 = vector.shape_cast %55 : vector<1x384x128xbf16> to vector<384x128xbf16>
    %cst_32 = arith.constant dense<0.000000e+00> : vector<128x128xf32>
    %57 = tpu.matmul %54, %56, %cst_32 {dimension_numbers = #tpu.dot_dimension_numbers<[1], [0], [0], [1], [0, 0, 1, 1], [], []>} : vector<128x384xbf16>, vector<384x128xbf16>, vector<128x128xf32> -> vector<128x128xf32>
    %58 = vector.extract_strided_slice %53 {offsets = [16, 0], sizes = [128, 384], strides = [1, 1]} : vector<160x384xbf16> to vector<128x384xbf16>
    %c1_33 = arith.constant 1 : index
    %c0_34 = arith.constant 0 : index
    %c0_35 = arith.constant 0 : index
    %59 = vector.load %arg4[%c1_33, %c0_34, %c0_35] : memref<3x384x128xbf16, #tpu.memory_space<vmem>>, vector<1x384x128xbf16>
    %60 = vector.shape_cast %59 : vector<1x384x128xbf16> to vector<384x128xbf16>
    %cst_36 = arith.constant dense<0.000000e+00> : vector<128x128xf32>
    %61 = tpu.matmul %58, %60, %cst_36 {dimension_numbers = #tpu.dot_dimension_numbers<[1], [0], [0], [1], [0, 0, 1, 1], [], []>} : vector<128x384xbf16>, vector<384x128xbf16>, vector<128x128xf32> -> vector<128x128xf32>
    %62 = arith.addf %57, %61 : vector<128x128xf32>
    %63 = vector.extract_strided_slice %53 {offsets = [32, 0], sizes = [128, 384], strides = [1, 1]} : vector<160x384xbf16> to vector<128x384xbf16>
    %c2_37 = arith.constant 2 : index
    %c0_38 = arith.constant 0 : index
    %c0_39 = arith.constant 0 : index
    %64 = vector.load %arg4[%c2_37, %c0_38, %c0_39] : memref<3x384x128xbf16, #tpu.memory_space<vmem>>, vector<1x384x128xbf16>
    %65 = vector.shape_cast %64 : vector<1x384x128xbf16> to vector<384x128xbf16>
    %cst_40 = arith.constant dense<0.000000e+00> : vector<128x128xf32>
    %66 = tpu.matmul %63, %65, %cst_40 {dimension_numbers = #tpu.dot_dimension_numbers<[1], [0], [0], [1], [0, 0, 1, 1], [], []>} : vector<128x384xbf16>, vector<384x128xbf16>, vector<128x128xf32> -> vector<128x128xf32>
    %67 = arith.addf %62, %66 : vector<128x128xf32>
    %c0_41 = arith.constant 0 : index
    %c0_42 = arith.constant 0 : index
    %68 = vector.load %arg6[%c0_41, %c0_42] : memref<1x128xf32, #tpu.memory_space<vmem>>, vector<1x128xf32>
    %69 = vector.broadcast %68 : vector<1x128xf32> to vector<128x128xf32>
    %70 = arith.addf %67, %69 : vector<128x128xf32>
    %71 = arith.addf %70, %13 : vector<128x128xf32>
    %cst_43 = arith.constant 0.000000e+00 : f32
    %72 = vector.broadcast %cst_43 : f32 to vector<128x128xf32>
    %73 = arith.maximumf %71, %72 : vector<128x128xf32>
    %74 = vector.shape_cast %73 : vector<128x128xf32> to vector<8x16x128xf32>
    %75 = arith.truncf %74 : vector<8x16x128xf32> to vector<8x16x128xbf16>
    %c0_44 = arith.constant 0 : index
    %c0_45 = arith.constant 0 : index
    %c0_46 = arith.constant 0 : index
    %c0_47 = arith.constant 0 : index
    %76 = vector.load %arg7[%c0_44, %c0_45, %c0_46, %c0_47] : memref<1x8x16x128xbf16, #tpu.memory_space<vmem>>, vector<1x8x16x128xbf16>
    %77 = vector.shape_cast %76 : vector<1x8x16x128xbf16> to vector<8x16x128xbf16>
    %78 = vector.shape_cast %75 : vector<8x16x128xbf16> to vector<1x8x16x128xbf16>
    tpu.vector_store %arg7[%c0_44, %c0_45, %c0_46, %c0_47], %78 {strides = array<i32>} : memref<1x8x16x128xbf16, #tpu.memory_space<vmem>>, vector<1x8x16x128xbf16>,
    return
  }
  func.func @transform_0(%arg0: i32, %arg1: i32) -> (i32, i32, i32, i32) {
    %c0_i32 = arith.constant 0 : i32
    %c0_i32_0 = arith.constant 0 : i32
    %c0_i32_1 = arith.constant 0 : i32
    %c0_i32_2 = arith.constant 0 : i32
    return %arg0, %c0_i32, %c0_i32_0, %c0_i32_1 : i32, i32, i32, i32
  }
  func.func @transform_1(%arg0: i32, %arg1: i32) -> (i32, i32, i32) {
    %c0_i32 = arith.constant 0 : i32
    %c0_i32_0 = arith.constant 0 : i32
    %c0_i32_1 = arith.constant 0 : i32
    %c0_i32_2 = arith.constant 0 : i32
    return %c0_i32, %c0_i32_0, %c0_i32_1 : i32, i32, i32
  }
  func.func @transform_2(%arg0: i32, %arg1: i32) -> (i32, i32, i32) {
    %c0_i32 = arith.constant 0 : i32
    %c0_i32_0 = arith.constant 0 : i32
    %c0_i32_1 = arith.constant 0 : i32
    %c0_i32_2 = arith.constant 0 : i32
    return %c0_i32, %c0_i32_0, %c0_i32_1 : i32, i32, i32
  }
  func.func @transform_3(%arg0: i32, %arg1: i32) -> (i32, i32) {
    %c0_i32 = arith.constant 0 : i32
    %c0_i32_0 = arith.constant 0 : i32
    %c0_i32_1 = arith.constant 0 : i32
    return %c0_i32, %c0_i32_0 : i32, i32
  }
  func.func @transform_4(%arg0: i32, %arg1: i32) -> (i32, i32) {
    %c0_i32 = arith.constant 0 : i32
    %c0_i32_0 = arith.constant 0 : i32
    %c0_i32_1 = arith.constant 0 : i32
    return %c0_i32, %c0_i32_0 : i32, i32
  }
  func.func @transform_5(%arg0: i32, %arg1: i32) -> (i32, i32, i32, i32) {
    %c0_i32 = arith.constant 0 : i32
    %c0_i32_0 = arith.constant 0 : i32
    %c0_i32_1 = arith.constant 0 : i32
    return %arg0, %arg1, %c0_i32, %c0_i32_0 : i32, i32, i32, i32
  }
}

</mosaic_0001>

<bundles_post_ra>
// kernel: tpu_custom_call.1
= control target key start
LH: loop header
LB: loop body
LE: loop exit
PB: predicated region body
PF: predicated region fallthrough
CT: control target
= control target key end

     0   :  { %s8014_s0 = inlined_call_operand.vmem [shape: bf16[2,20,18,128], index: 0, kind: input, shape index: {}]   ;;  %s8015_s1 = inlined_call_operand.vmem [shape: bf16[3,384,128], index: 1, kind: input, shape index: {}]   ;;  %s8016_s2 = inlined_call_operand.hbm [shape: bf16[3,384,128], index: 2, kind: input, shape index: {}]   ;;  %s8017_s3 = inlined_call_operand.vmem [shape: f32[1,128], index: 3, kind: input, shape index: {}]   ;;  %s8018_s4 = inlined_call_operand.vmem [shape: f32[1,128], index: 4, kind: input, shape index: {}]   ;;  %s8019_s5 = inlined_call_operand.hbm [shape: bf16[2,16,16,128], index: 5, kind: output, shape index: {}]  }
   0x1   :  { %8029 = sst [smem:[#allocation12_spill]] %s8016_s2 }
   0x2   :  { %10 = vsyncpa [#allocation4], 0 }
   0x3   :  { %11 = vsyncpa [#allocation5], 0 }
   0x4   :  { %13 = vsyncpa [#allocation5 + $0x1], 0  ;;  %s6312_s18 = smov 0   ;;  %s6314_s19 = smov 0  }
   0x5   :  { %s6316_s20 = smov 0   ;;  %s6318_s21 = smov 0  }
   0x6   :  { %s6320_s22 = smov 0   ;;  %s6322_s23 = smov 0  }
   0x7   :  { %s6324_s24 = smov 0   ;;  %s6326_s25 = smov 0  }
   0x8 LB: > { %s4513_s26 = sadd.s32 4294967295, %s6272_s25   ;;  %s4514_s27 = sadd.s32 4294967294, %s6272_s25   ;;  %s6272_s25 = sphi %s6326_s25, %s19_s25   ;;  %s6268_s24 = sphi %s6324_s24, %s8082_s24   ;;  %s6264_s23 = sphi %s6322_s23, %s8081_s23   ;;  %s6260_s22 = sphi %s6320_s22, %s8080_s22   ;;  %s6256_s21 = sphi %s6318_s21, %s8079_s21   ;;  %s6252_s20 = sphi %s6316_s20, %s8078_s20   ;;  %s6248_s19 = sphi %s6314_s19, %s8077_s19   ;;  %s6244_s18 = sphi %s6312_s18, %s8076_s18  }
   0x9   : > { %s28_s28 = sadd.s32 1, %s6264_s23  ;;  %s31_s29 = sadd.s32 1, %s6268_s24 }
   0xa   : > { %p29_p0 = scmp.ge.s32.totalorder %s28_s28, 2  ;;  %s150_s30 = sadd.s32 1, %s6252_s20 }
   0xb   : > { %p160_p1 = scmp.ne.s32.totalorder %s6252_s20, %s6248_s19  ;;  %p161_p2 = scmp.eq.s32.totalorder %s4513_s26, 3 }
   0xc   : > { %s8084_s28 = smov (%p29_p0, %s28_s28), 0  ;;  %s8086_s29 = smov (!%p29_p0, %s31_s29), %s6268_s24 }
   0xd   : > { %s146_s6 = ssub.s32 %s6264_s23, %s8084_s28  ;;  %p6364_p3 = por %p161_p2, %p160_p1 }
   0xe   : > { %p33_p4 = scmp.ge.s32.totalorder %s8086_s29, 2  ;;  %p166_p5 = scmp.ne.s32.totalorder %s6248_s19, %s6244_s18 }
   0xf   : > { %s8030_s7 = scalar_select %p6364_p3, 1, 0 }
  0x10   : > { %p167_p6 = scmp.eq.s32.totalorder %s4514_s27, 3  ;;  %p4515_p7 = scmp.ge.s32.totalorder %s6272_s25, 1 }
  0x11   : > { %s8088_s29 = smov (%p33_p4, %s8086_s29), 0  ;;  %p174_p9 = scmp.lt.s32.totalorder %s6272_s25, 5 }
  0x12   : > { %8031 = sst [smem:[#allocation9_spill]] %s8088_s29  ;;  %p6373_p8 = por %p167_p6, %p166_p5 }
  0x13   : > { %s145_s9 = ssub.s32 %s6268_s24, %s8088_s29  ;;  %p6380_p10 = pnand %p4515_p7, %p174_p9 }
  0x14   : > { %s8032_s8 = scalar_select %p6373_p8, 1, 0 }
  0x15   : > { %s147_s10 = sor.u32 %s146_s6, %s145_s9  ;;  %p6384_p12 = scmp.eq.s32.totalorder %s4513_s26, 0 }
  0x16   : > { %s8033_s11 = scalar_select %p6380_p10, 1, 0 }
  0x17   : > { %p148_p11 = scmp.eq.s32.totalorder %s147_s10, 0  ;;  %p5898_p13 = pneg %p6380_p10 }
  0x18   : > { %s8034_s12 = scalar_select %p6384_p12, 1, 0 }
  0x19   : > { %s6391_s13 = scalar_select %p148_p11, %s6252_s20, %s150_s30  }
  0x1a   : > { %s6274_s14 = smov [#allocation3]   ;;  %p6395_p0 = pnand %p6384_p12, %p5898_p13 }
  0x1b   : > { %s189_s15 = sshll.u32 %s6274_s14, 4  ;;  %s8036_s2 = sld [smem:[#allocation12_spill]]  ;;  %s190_s15 = int_to_ptr.vmem [resolvable:$true] %s189_s15 }
  0x1c   : > { %p6148_p2 = pneg %p6395_p0 }
  0x21   : > { %s6146_s26 = scalar_lea.hbm %s8036_s2, 9216 }
  0x22   : > { %p6147_p1 = scmp.ne.s32.totalorder %s8036_s2, %s6146_s26  ;;  %p6153_p6 = scmp.lt.u32.totalorder %s6146_s26, %s8036_s2 }
  0x24   : > { %p6149_p4 = pnand %p6148_p2, %p6147_p1 }
  0x26   : > { %p6150_p5 = pneg %p6149_p4 }
  0x28   : > { %p6155_p7 = pnand %p6153_p6, %p6150_p5 }
  0x2a   : > { %6158 = shalt.err (!%p6155_p7)
}
  0x2b   : > { %s6159_s14 = scalar_lea.vmem %s190_s15, 9216  ;;  %p6167_p8 = scmp.lt.s32.totalorder %s190_s15, %s190_s15 }
  0x2c   : > { %p6160_p9 = scmp.ne.s32.totalorder %s190_s15, %s6159_s14  ;;  %p6168_p3 = scmp.lt.s32.totalorder %s6159_s14, %s6159_s14 }
  0x2e   : > { %p6162_p11 = pnand %p6160_p9, %p6148_p2  ;;  %p6169_p12 = por %p6168_p3, %p6167_p8 }
  0x30   : > { %p6163_p13 = pneg %p6162_p11 }
  0x32   : > { %p6170_p10 = pnand %p6169_p12, %p6163_p13 }
  0x34   : > { %6173 = shalt.err (!%p6170_p10)
}
  0x35   : > { %s6275_s17 = smov 64   ;;  %s6276_s27 = smov 4  }
  0x36   : > { %5901 = dma.hbm_to_vmem [thread:$0]  (!%p6395_p0), %s8036_s2, 9216, %s190_s15, [#allocation4], %s6275_s17, %s6275_s17, %s6276_s27  }
  0x37   : > { %p8037_p1 = scmp.ne.s32.totalorder %s8033_s11, 0 }
  0x39   : > { %219 = sbr.rel (%p8037_p1) target bundleno = 962 (0x3c2), region = 40 }
  0x40   : > { %p8038_p4 = scmp.ne.s32.totalorder %s8034_s12, 0 }
  0x42   : > { %6235 = dma.done.wait (%p8038_p4), [#allocation4], 9216  }
  0x43   : > { %6237 = vsyncadd (%p8038_p4), [#allocation4], 4294958080  ;;  %s8024_s26 = sand.u32 1, %s6248_s19   ;;  %v5980_v0 = vld [vmem:[%s8015_s1 + $0x100] sm:$0xff]   ;;  %v5984_v4 = vld [vmem:[%s8015_s1 + $0x108] sm:$0xff]   ;;  %p247_p3 = scmp.lt.s32.totalorder %s6260_s22, 1 }
  0x44   : > { %s6424_s30 = sshll.u32 %s8024_s26, 6  ;;  %v5981_v1 = vld [vmem:[%s8015_s1 + $0xc0] sm:$0xff]   ;;  %4985 = vmatprep.subr.bf16.mxu0 %v5980_v0  ;;  %v5985_v5 = vld [vmem:[%s8015_s1 + $0xc8] sm:$0xff]   ;;  %v5988_v8 = vld [vmem:[%s8015_s1 + $0x110] sm:$0xff]   ;;  %s4900_s15 = smul.u32 96, %s6256_s21  ;;  %vm621_vm3 = vcmask 1042432  }
  0x45   : > { %v5982_v2 = vld [vmem:[%s8015_s1 + $0x40] sm:$0xff]   ;;  %4986 = vmatpush3.bf16.msra.mxu0 %v5981_v1  ;;  %v5986_v6 = vld [vmem:[%s8015_s1 + $0x48] sm:$0xff]   ;;  %v5989_v9 = vld [vmem:[%s8015_s1 + $0xd0] sm:$0xff]   ;;  %s248_s12 = scalar_select %p247_p3, %s6260_s22, 1  ;;  %vm294_vm0 = vsmask.f32 3328 }
  0x46   : > { %v5983_v3 = vld [vmem:[%s8015_s1] sm:$0xff]   ;;  %5079 = vmatprep.subr.bf16.mxu1 %v5982_v2  ;;  %4987 = vmatprep.subr.bf16.mxu0 %v5984_v4  ;;  %v5987_v7 = vld [vmem:[%s8015_s1 + $0x8] sm:$0xff]   ;;  %v5990_v10 = vld [vmem:[%s8015_s1 + $0x50] sm:$0xff]   ;;  %vm295_vm1 = vsmask.f32 7440  ;;  %vm622_vm4 = vcmask 1046532  }
  0x47   : > { %5080 = vmatpush3.bf16.msra.mxu1 %v5983_v3  ;;  %v5991_v11 = vld [vmem:[%s8015_s1 + $0x10] sm:$0xff]   ;;  %v5992_v12 = vld [vmem:[%s8015_s1 + $0x118] sm:$0xff]   ;;  %v5996_v16 = vld [vmem:[%s8015_s1 + $0x120] sm:$0xff]   ;;  %s5891_s17 = smul.u32 240, %s248_s12  ;;  %vm2191_vm6 = vcmask 1040384   ;;  %vm2518_vm11 = vcmask 1043456  }
  0x48   : > { %5081 = vmatprep.subr.bf16.mxu1 %v5986_v6  ;;  %v5993_v13 = vld [vmem:[%s8015_s1 + $0xd8] sm:$0xff]   ;;  %v5997_v17 = vld [vmem:[%s8015_s1 + $0xe0] sm:$0xff]   ;;  %v6000_v20 = vld [vmem:[%s8015_s1 + $0x128] sm:$0xff]   ;;  %vm2192_vm7 = vsmask.f32 256  ;;  %s7483_s11 = scalar_lea.vmem [#allocation6], %s6424_s30 }
  0x49   : > { %4988 = vmatpush3.bf16.msra.mxu0 %v5985_v5  ;;  %v5994_v14 = vld [vmem:[%s8015_s1 + $0x58] sm:$0xff]   ;;  %v5998_v18 = vld [vmem:[%s8015_s1 + $0x60] sm:$0xff]   ;;  %v6001_v21 = vld [vmem:[%s8015_s1 + $0xe8] sm:$0xff]   ;;  %s251_s26 = scalar_lea.vmem %s8014_s0, %s5891_s17  ;;  %vm2224_vm9 = vsmask.f32 7938  ;;  %p4762_p8 = scmp.ne.s32.totalorder %s6256_s21, 0 }
  0x4a   : > { %4989 = vmatprep.subr.bf16.mxu0 %v5988_v8  ;;  %v5995_v15 = vld [vmem:[%s8015_s1 + $0x18] sm:$0xff]   ;;  %v5999_v19 = vld [vmem:[%s8015_s1 + $0x20] sm:$0xff]   ;;  %v6002_v22 = vld [vmem:[%s8015_s1 + $0x68] sm:$0xff]   ;;  %s6519_s14 = scalar_lea.vmem %s251_s26, %s4900_s15  ;;  %vm2316_vm12 = vsmask.f32 4368 }
  0x4b   : > { %5082 = vmatpush3.bf16.msra.mxu1 %v5987_v7  ;;  %v6003_v23 = vld [vmem:[%s8015_s1 + $0x28] sm:$0xff]   ;;  %v6004_v24 = vld [vmem:[%s8015_s1 + $0x130] sm:$0xff]   ;;  %v6008_v28 = vld [vmem:[%s8015_s1 + $0x138] sm:$0xff]  }
  0x4c   : > { %5083 = vmatprep.subr.bf16.mxu1 %v5990_v10  ;;  %v6005_v25 = vld [vmem:[%s8015_s1 + $0xf0] sm:$0xff]   ;;  %v6009_v29 = vld [vmem:[%s8015_s1 + $0xf8] sm:$0xff]   ;;  %v6528_v31 = vld [vmem:[%s6519_s14 + $0xc] sm:$0xf] }
  0x4d   : > { %4990 = vmatpush3.bf16.msra.mxu0 %v5989_v9  ;;  %v6006_v26 = vld [vmem:[%s8015_s1 + $0x70] sm:$0xff]   ;;  %v6010_v30 = vld [vmem:[%s8015_s1 + $0x78] sm:$0xff]   ;;  %v322_v34 = vshrl.u32 %v6528_v31, 16  ;;  %v325_v35 = vshll.u32 %v6528_v31, 16  ;;  %v6013_v45 = vld [vmem:[%s8015_s1 + $0x140] sm:$0xff]  }
  0x4e   : > { %4991 = vmatprep.subr.bf16.mxu0 %v5992_v12  ;;  %v6007_v27 = vld [vmem:[%s8015_s1 + $0x30] sm:$0xff]   ;;  %v6011_v39 = vld [vmem:[%s8015_s1 + $0x38] sm:$0xff]   ;;  %v6548_v46 = vld [vmem:[%s6519_s14] sm:$0xf] }
  0x4f   : > { %5084 = vmatpush3.bf16.msra.mxu1 %v5991_v11  ;;  %v6531_v32 = vld [vmem:[%s6519_s14 + $0x10] sm:$0xf]  ;;  %v6534_v33 = vld [vmem:[%s6519_s14 + $0x14] sm:$0x1]  ;;  %v324_v40 = vrot.slane %v322_v34, 4  ;;  %v327_v41 = vrot.slane %v325_v35, 5  ;;  %vm6563_vm2 = vmor %vm294_vm0, %vm295_vm1 }
  0x50   : > { %5085 = vmatprep.subr.bf16.mxu1 %v5994_v14  ;;  %v331_v36 = vshll.u32 %v6531_v32, 16  ;;  %v335_v37 = vshrl.u32 %v6531_v32, 16  ;;  %v341_v38 = vshll.u32 %v6534_v33, 16  ;;  %v6551_v47 = vld [vmem:[%s6519_s14 + $0x4] sm:$0xf]  ;;  %v298_v51 = vshrl.u32 %v6548_v46, 16  ;;  %vm6860_vm5 = vmor %vm621_vm3, %vm622_vm4 }
  0x51   : > { %4992 = vmatpush3.bf16.msra.mxu0 %v5993_v13  ;;  %v328_v48 = vor.u32 %v327_v41, %v324_v40  ;;  %v6554_v50 = vld [vmem:[%s6519_s14 + $0x8] sm:$0x1]  ;;  %v301_v52 = vshll.u32 %v6548_v46, 16  ;;  %v6559_v53 = vld [vmem:[%s6519_s14 + $0x18] sm:$0xf]  ;;  %v307_v55 = vshll.u32 %v6551_v47, 16  ;;  %v6578_v0 = vcombine.low %v6528_v31, %v6531_v32  ;;  %vm7131_vm8 = vmand %vm2191_vm6, %vm2192_vm7 }
  0x52   : > { %4993 = vmatprep.subr.bf16.mxu0 %v5996_v16  ;;  %v333_v42 = vrot.slane %v331_v36, 5  ;;  %v337_v43 = vrot.slane %v335_v37, 4  ;;  %v343_v44 = vrot.slane %v341_v38, 5  ;;  %v311_v56 = vshrl.u32 %v6551_v47, 16  ;;  %v6571_v58 = vld [vmem:[%s6519_s14 + $0x1c] sm:$0xf]  ;;  %vm7138_vm10 = vmand %vm2191_vm6, %vm2224_vm9 }
  0x53   : > { %5086 = vmatpush3.bf16.msra.mxu1 %v5995_v15  ;;  %v317_v57 = vshll.u32 %v6554_v50, 16  ;;  %v329_v59 = vrot.slane %v328_v48, 4  ;;  %v300_v61 = vrot.slane %v298_v51, 4  ;;  %v303_v62 = vrot.slane %v301_v52, 5  ;;  %v6574_v63 = vld [vmem:[%s6519_s14 + $0x20] sm:$0x1]  ;;  %vm7341_vm13 = vmand %vm2518_vm11, %vm2224_vm9 }
  0x54   : > { %5087 = vmatprep.subr.bf16.mxu1 %v5998_v18  ;;  %v338_v49 = vor.u32 %v337_v43, %v333_v42  ;;  %v309_v1 = vrot.slane %v307_v55, 5  ;;  %v313_v2 = vrot.slane %v311_v56, 4  ;;  %v346_v7 = vshrl.u32 %v6559_v53, 16  ;;  %v6016_v8 = vld [vmem:[%s8015_s1 + $0x148] sm:$0xff]   ;;  %v6591_v13 = vld [vmem:[%s6519_s14 + $0x24] sm:$0xf]  ;;  %vm7347_vm14 = vmor %vm2192_vm7, %vm2316_vm12 }
  0x55   : > { %4994 = vmatpush3.bf16.msra.mxu0 %v5997_v17  ;;  %v319_v3 = vrot.slane %v317_v57, 5  ;;  %v334_v4 = vsel %vm6563_vm2, %v329_v59, %v333_v42  ;;  %v304_v6 = vor.u32 %v303_v62, %v300_v61  ;;  %v349_v11 = vshll.u32 %v6559_v53, 16  ;;  %v6594_v14 = vld [vmem:[%s6519_s14 + $0x28] sm:$0xf]  ;;  %v6018_v35 = vld [vmem:[%s8015_s1 + $0x150] sm:$0xff]   ;;  %v6024_v55 = vld [vmem:[%s8015_s1 + $0x80] sm:$0xff]  }
  0x56   : > { %4995 = vmatprep.subr.bf16.mxu0 %v6000_v20  ;;  %v339_v60 = vrot.slane %v338_v49, 4  ;;  %v314_v10 = vor.u32 %v313_v2, %v309_v1  ;;  %v355_v12 = vshll.u32 %v6571_v58, 16  ;;  %v348_v16 = vrot.slane %v346_v7, 4  ;;  %v6615_v36 = vld [vmem:[%s6519_s14 + $0x30] sm:$0xf]  ;;  %v6020_v62 = vld [vmem:[%s8015_s1 + $0x158] sm:$0xff]  }
  0x57   : > { %5088 = vmatpush3.bf16.msra.mxu1 %v5999_v19  ;;  %v305_v15 = vrot.slane %v304_v6, 4  ;;  %v359_v17 = vshrl.u32 %v6571_v58, 16  ;;  %v365_v18 = vshll.u32 %v6574_v63, 16  ;;  %v4537_v20 = vcombine.low %v6548_v46, %v6551_v47  ;;  %v6646_v6 = vld [vmem:[%s6519_s14 + $0x40] sm:$0xf] }
  0x58   : > { %5089 = vmatprep.subr.bf16.mxu1 %v6002_v22  ;;  %v344_v5 = vsel %vm6563_vm2, %v339_v60, %v343_v44  ;;  %v315_v19 = vrot.slane %v314_v10, 4  ;;  %v357_v22 = vrot.slane %v355_v12, 5  ;;  %v379_v34 = vshll.u32 %v6594_v14, 16  ;;  %v6633_v60 = vld [vmem:[%s6519_s14 + $0x38] sm:$0x1] }
  0x59   : > { %4996 = vmatpush3.bf16.msra.mxu0 %v6001_v21  ;;  %v4550_v9 = vcombine.low %v334_v4, %v344_v5  ;;  %v351_v21 = vrot.slane %v349_v11, 5  ;;  %v383_v40 = vshrl.u32 %v6594_v14, 16  ;;  %v6624_v49 = vcombine.low %v6559_v53, %v6571_v58  ;;  %v6643_v5 = vld [vmem:[%s6519_s14 + $0x3c] sm:$0xf] }
  0x5a   : > { %4997 = vmatprep.subr.bf16.mxu0 %v6004_v24  ;;  %v361_v24 = vrot.slane %v359_v17, 4  ;;  %v381_v43 = vrot.slane %v379_v34, 5  ;;  %v394_v52 = vshrl.u32 %v6615_v36, 16  ;;  %v397_v61 = vshll.u32 %v6615_v36, 16 }
  0x5b   : > { %5090 = vmatpush3.bf16.msra.mxu1 %v6003_v23  ;;  %1141 = vmatprep.mubr.bf16.mxu0 %v4550_v9  ;;  %v310_v23 = vsel %vm6563_vm2, %v305_v15, %v309_v1  ;;  %v385_v51 = vrot.slane %v383_v40, 4  ;;  %v421_v34 = vshll.u32 %v6643_v5, 16 }
  0x5c   : > { %5091 = vmatprep.subr.bf16.mxu1 %v6006_v26  ;;  %v6604_v26 = vld [vmem:[%s6519_s14 + $0x2c] sm:$0x1]  ;;  %v362_v38 = vor.u32 %v361_v24, %v357_v22  ;;  %v399_v10 = vrot.slane %v397_v61, 5 }
  0x5d   : > { %4998 = vmatpush3.bf16.msra.mxu0 %v6005_v25  ;;  %v367_v25 = vrot.slane %v365_v18, 5  ;;  %v389_v44 = vshll.u32 %v6604_v26, 16  ;;  %v386_v2 = vor.u32 %v385_v51, %v381_v43  ;;  %v423_v51 = vrot.slane %v421_v34, 5 }
  0x5e   : > { %4999 = vmatprep.subr.bf16.mxu0 %v6008_v28  ;;  %v320_v28 = vsel %vm6563_vm2, %v315_v19, %v319_v3  ;;  %v363_v48 = vrot.slane %v362_v38, 4  ;;  %v396_v3 = vrot.slane %v394_v52, 4  ;;  %v6029_v38 = vld [vmem:[%s8015_s1 + $0x90] sm:$0xff]   ;;  %v6031_v52 = vld [vmem:[%s8015_s1 + $0x98] sm:$0xff]  }
  0x5f   : > { %5092 = vmatpush3.bf16.msra.mxu1 %v6007_v27  ;;  %v370_v27 = vshrl.u32 %v6591_v13, 16  ;;  %v4549_v37 = vcombine.low %v310_v23, %v320_v28  ;;  %v391_v59 = vrot.slane %v389_v44, 5  ;;  %v387_v12 = vrot.slane %v386_v2, 4  ;;  %v6023_v28 = vld [vmem:[%s8015_s1 + $0x160] sm:$0xff]  }
  0x60   : > { %5093 = vmatprep.subr.bf16.mxu1 %v6010_v30  ;;  %v373_v30 = vshll.u32 %v6591_v13, 16  ;;  %v368_v1 = vsel %vm6563_vm2, %v363_v48, %v367_v25  ;;  %v418_v25 = vshrl.u32 %v6643_v5, 16  ;;  %v6691_v48 = vcombine.low %v6591_v13, %v6594_v14 }
  0x61   : > { %5000 = vmatpush3.bf16.msra.mxu0 %v6009_v29  ;;  %v352_v29 = vor.u32 %v351_v21, %v348_v16  ;;  %1511 = vmatprep.mubr.bf16.mxu1 %v4549_v37  ;;  %v6027_v16 = vld [vmem:[%s8015_s1 + $0x88] sm:$0xff]   ;;  %v6661_v21 = vld [vmem:[%s6519_s14 + $0x44] sm:$0x1] }
  0x62   : > { %5507 = vmatprep.subr.bf16.mxu0 %v6013_v45  ;;  %v375_v42 = vrot.slane %v373_v30, 5  ;;  %v6678_v37 = vld [vmem:[%s6519_s14 + $0x4c] sm:$0xf]  ;;  %v420_v40 = vrot.slane %v418_v25, 4  ;;  %8041 = vst [vmem:[#allocation10_spill] sm:$0xff] %v6691_v48 }
  0x63   : > { %5094 = vmatpush3.bf16.msra.mxu1 %v6011_v39  ;;  %v372_v39 = vrot.slane %v370_v27, 4  ;;  %v353_v41 = vrot.slane %v352_v29, 4  ;;  %v6668_v27 = vld [vmem:[%s6519_s14 + $0x48] sm:$0xf] }
  0x64   : > { %1142 = vmatmul.mubr.bf16.vlgmr.msra.gmra.mrb[0].mxu0 %v6578_v0  ;;  %5543 = vmatprep.subr.bf16.mxu1 %v6024_v55  ;;  %v442_v2 = vshrl.u32 %v6668_v27, 16 }
  0x65   : > { %5508 = vmatpush3.bf16.msra.mxu0 %v6013_v45  ;;  %v6620_v45 = vld [vmem:[%s6519_s14 + $0x34] sm:$0xf]  ;;  %v358_v56 = vsel %vm6563_vm2, %v353_v41, %v357_v22  ;;  %v376_v57 = vor.u32 %v375_v42, %v372_v39  ;;  %v392_v22 = vsel %vm6563_vm2, %v387_v12, %v391_v59  ;;  %v431_v41 = vshrl.u32 %v6646_v6, 16 }
  0x66   : > { %5509 = vmatprep.subr.bf16.mxu0 %v6016_v8  ;;  %1512 = vmatmul.mubr.bf16.vlgmr.msra.gmra.mrb[0].mxu1 %v4537_v20  ;;  %v403_v4 = vshll.u32 %v6620_v45, 16  ;;  %v6648_v7 = vcombine.low %v358_v56, %v368_v1  ;;  %v407_v11 = vshrl.u32 %v6620_v45, 16  ;;  %v400_v20 = vor.u32 %v399_v10, %v396_v3  ;;  %v6700_v1 = vld [vmem:[%s6519_s14 + $0x50] sm:$0x1]  ;;  %v6712_v12 = vld [vmem:[%s6519_s14 + $0x54] sm:$0xf] }
  0x67   : > { %1519 = vmatprep.mubr.bf16.mxu1 %v4550_v9  ;;  %v413_v9 = vshll.u32 %v6633_v60, 16  ;;  %5544 = vmatpush3.bf16.msra.mxu1 %v6024_v55  ;;  %v437_v42 = vshll.u32 %v6661_v21, 16  ;;  %v424_v59 = vor.u32 %v423_v51, %v420_v40  ;;  %v445_v3 = vshll.u32 %v6668_v27, 16 }
  0x68   : > { %v405_v15 = vrot.slane %v403_v4, 5  ;;  %1149 = vmatprep.mubr.bf16.mxu0 %v6648_v7  ;;  %v409_v23 = vrot.slane %v407_v11, 4  ;;  %v401_v30 = vrot.slane %v400_v20, 4  ;;  %5545 = vmatprep.subr.bf16.mxu1 %v6027_v16  ;;  %v6026_v4 = vld [vmem:[%s8015_s1 + $0x168] sm:$0xff]   ;;  %v451_v10 = vshll.u32 %v6678_v37, 16 }
  0x69   : > { %5510 = vmatpush3.bf16.msra.mxu0 %v6016_v8  ;;  %v377_v8 = vrot.slane %v376_v57, 4  ;;  %v415_v24 = vrot.slane %v413_v9, 5  ;;  %v433_v57 = vrot.slane %v431_v41, 4  ;;  %v439_v61 = vrot.slane %v437_v42, 5  ;;  %v6717_v20 = vld [vmem:[%s6519_s14 + $0x58] sm:$0xf] }
  0x6a   : > { %5511 = vmatprep.subr.bf16.mxu0 %v6018_v35  ;;  %v410_v39 = vor.u32 %v409_v23, %v405_v15  ;;  %v455_v11 = vshrl.u32 %v6678_v37, 16  ;;  %v425_v9 = vrot.slane %v424_v59, 4  ;;  %v6033_v23 = vld [vmem:[%s8015_s1 + $0xa0] sm:$0xff]   ;;  %v453_v25 = vrot.slane %v451_v10, 5 }
  0x6b   : > { %v382_v19 = vsel %vm6563_vm2, %v377_v8, %v381_v43  ;;  %5546 = vmatpush3.bf16.msra.mxu1 %v6027_v16  ;;  %v444_v16 = vrot.slane %v442_v2, 4  ;;  %v461_v34 = vshll.u32 %v6700_v1, 16  ;;  %v6734_v41 = vcombine.low %v6615_v36, %v6620_v45 }
  0x6c   : > { %1150 = vmatmul.mubr.bf16.gmra.mrb[4].mxu0 %v6624_v49  ;;  %v6673_v29 = vcombine.low %v382_v19, %v392_v22  ;;  %v411_v55 = vrot.slane %v410_v39, 4  ;;  %5547 = vmatprep.subr.bf16.mxu1 %v6029_v38  ;;  %v447_v19 = vrot.slane %v445_v3, 5  ;;  %v6720_v22 = vld [vmem:[%s6519_s14 + $0x5c] sm:$0x1]  ;;  %v466_v59 = vshrl.u32 %v6712_v12, 16  ;;  %v6035_v3 = vld [vmem:[%s8015_s1 + $0xa8] sm:$0xff]  }
  0x6d   : > { %5512 = vmatpush3.bf16.msra.mxu0 %v6018_v35  ;;  %v427_v35 = vshll.u32 %v6646_v6, 16  ;;  %v469_v2 = vshll.u32 %v6712_v12, 16  ;;  %v485_v10 = vshll.u32 %v6720_v22, 16 }
  0x6e   : > { %5513 = vmatprep.subr.bf16.mxu0 %v6020_v62  ;;  %1520 = vmatmul.mubr.bf16.gmra.mrb[4].mxu1 %v6578_v0  ;;  %v406_v0 = vsel %vm6563_vm2, %v401_v30, %v405_v15  ;;  %v416_v8 = vsel %vm6563_vm2, %v411_v55, %v415_v24  ;;  %v457_v30 = vrot.slane %v455_v11, 4  ;;  %v448_v40 = vor.u32 %v447_v19, %v444_v16  ;;  %v6739_v55 = vld [vmem:[%s6519_s14 + $0x60] sm:$0xf] }
  0x6f   : > { %1157 = vmatprep.mubr.bf16.mxu0 %v6673_v29  ;;  %1527 = vmatprep.mubr.bf16.mxu1 %v6648_v7  ;;  %v429_v56 = vrot.slane %v427_v35, 5  ;;  %v6714_v15 = vcombine.low %v406_v0, %v416_v8  ;;  %v463_v0 = vrot.slane %v461_v34, 5  ;;  %v468_v19 = vrot.slane %v466_v59, 4  ;;  %v6776_v59 = vld [vmem:[%s6519_s14 + $0x68] sm:$0x1] }
  0x70   : > { %5548 = vmatpush3.bf16.msra.mxu1 %v6029_v38  ;;  %v458_v51 = vor.u32 %v457_v30, %v453_v25  ;;  %v471_v34 = vrot.slane %v469_v2, 5  ;;  %v6794_v35 = vld [vmem:[%s6519_s14 + $0x74] sm:$0x1] }
  0x71   : > { %5514 = vmatpush3.bf16.msra.mxu0 %v6020_v62  ;;  %v434_v62 = vor.u32 %v433_v57, %v429_v56  ;;  %8042 = vst [vmem:[#allocation11_spill] sm:$0xff] %v6714_v15  ;;  %5549 = vmatprep.subr.bf16.mxu1 %v6031_v52  ;;  %v430_v39 = vsel %vm6563_vm2, %v425_v9, %v429_v56  ;;  %v6030_v57 = vld [vmem:[%s8015_s1 + $0x170] sm:$0xff]   ;;  %v449_v56 = vrot.slane %v448_v40, 4 }
  0x72   : > { %5515 = vmatprep.subr.bf16.mxu0 %v6023_v28  ;;  %v459_v8 = vrot.slane %v458_v51, 4  ;;  %v490_v51 = vshrl.u32 %v6739_v55, 16 }
  0x73   : > { %v435_v24 = vrot.slane %v434_v62, 4  ;;  %v479_v62 = vshrl.u32 %v6717_v20, 16  ;;  %v454_v16 = vsel %vm6563_vm2, %v449_v56, %v453_v25  ;;  %v6037_v25 = vld [vmem:[%s8015_s1 + $0xb0] sm:$0xff]  }
  0x74   : > { %1158 = vmatmul.mubr.bf16.gmra.mrb[8].mxu0 %v6691_v48  ;;  %5550 = vmatpush3.bf16.msra.mxu1 %v6031_v52  ;;  %v475_v52 = vshll.u32 %v6717_v20, 16  ;;  %v464_v30 = vsel %vm6563_vm2, %v459_v8, %v463_v0  ;;  %v472_v0 = vor.u32 %v471_v34, %v468_v19  ;;  %v6781_v8 = vld [vmem:[%s6519_s14 + $0x6c] sm:$0xf]  ;;  %v6788_v19 = vld [vmem:[%s6519_s14 + $0x70] sm:$0xf] }
  0x75   : > { %1165 = vmatprep.mubr.bf16.mxu0 %v6714_v15  ;;  %5516 = vmatpush3.bf16.msra.mxu0 %v6023_v28  ;;  %v440_v42 = vsel %vm6563_vm2, %v435_v24, %v439_v61  ;;  %v6750_v61 = vld [vmem:[%s6519_s14 + $0x64] sm:$0xf]  ;;  %v6034_v24 = vld [vmem:[%s8015_s1 + $0x178] sm:$0xff]   ;;  %v481_v40 = vrot.slane %v479_v62, 4  ;;  %v509_v62 = vshll.u32 %v6776_v59, 16 }
  0x76   : > { %5517 = vmatprep.subr.bf16.mxu0 %v6026_v4  ;;  %1528 = vmatmul.mubr.bf16.gmra.mrb[8].mxu1 %v6624_v49  ;;  %v6745_v28 = vcombine.low %v430_v39, %v440_v42  ;;  %v477_v39 = vrot.slane %v475_v52, 5  ;;  %v6771_v42 = vcombine.low %v454_v16, %v464_v30  ;;  %v499_v2 = vshll.u32 %v6750_v61, 16  ;;  %v6039_v30 = vld [vmem:[%s8015_s1 + $0x1c0] sm:$0xff]   ;;  %v6813_v52 = vld [vmem:[%s6519_s14 + $0x78] sm:$0xf] }
  0x77   : > { %5551 = vmatprep.subr.bf16.mxu1 %v6033_v23  ;;  %1535 = vmatprep.mubr.bf16.mxu1 %v6673_v29  ;;  %v503_v16 = vshrl.u32 %v6750_v61, 16  ;;  %v473_v34 = vrot.slane %v472_v0, 4  ;;  %v514_v0 = vshrl.u32 %v6781_v8, 16  ;;  %v511_v44 = vrot.slane %v509_v62, 5 }
  0x78   : > { %5552 = vmatpush3.bf16.msra.mxu1 %v6033_v23  ;;  %v482_v56 = vor.u32 %v481_v40, %v477_v39  ;;  %v493_v23 = vshll.u32 %v6739_v55, 16  ;;  %v501_v9 = vrot.slane %v499_v2, 5 }
  0x79   : > { %5518 = vmatpush3.bf16.msra.mxu0 %v6026_v4  ;;  %v487_v4 = vrot.slane %v485_v10, 5  ;;  %5553 = vmatprep.subr.bf16.mxu1 %v6035_v3  ;;  %v492_v10 = vrot.slane %v490_v51, 4  ;;  %v505_v51 = vrot.slane %v503_v16, 4  ;;  %v517_v16 = vshll.u32 %v6781_v8, 16 }
  0x7a   : > { %5519 = vmatprep.subr.bf16.mxu0 %v6030_v57  ;;  %v483_v40 = vrot.slane %v482_v56, 4  ;;  %v495_v38 = vrot.slane %v493_v23, 5  ;;  %v6038_v56 = vld [vmem:[%s8015_s1 + $0xb8] sm:$0xff]   ;;  %v516_v17 = vrot.slane %v514_v0, 4 }
  0x7b   : > { %v506_v18 = vor.u32 %v505_v51, %v501_v9 }
  0x7c   : > { %1166 = vmatmul.mubr.bf16.gmra.mrb[12].mxu0 %v6734_v41  ;;  %5554 = vmatpush3.bf16.msra.mxu1 %v6035_v3  ;;  %v478_v3 = vsel %vm6563_vm2, %v473_v34, %v477_v39  ;;  %v488_v23 = vsel %vm6563_vm2, %v483_v40, %v487_v4  ;;  %v496_v2 = vor.u32 %v495_v38, %v492_v10  ;;  %v527_v39 = vshrl.u32 %v6788_v19, 16  ;;  %v6820_v34 = vld [vmem:[%s6519_s14 + $0x7c] sm:$0xf] }
  0x7d   : > { %1173 = vmatprep.mubr.bf16.mxu0 %v6745_v28  ;;  %5520 = vmatpush3.bf16.msra.mxu0 %v6030_v57  ;;  %v6799_v57 = vcombine.low %v6643_v5, %v6646_v6  ;;  %v6815_v11 = vcombine.low %v478_v3, %v488_v23  ;;  %v507_v10 = vrot.slane %v506_v18, 4  ;;  %v533_v40 = vshll.u32 %v6794_v35, 16 }
  0x7e   : > { %5521 = vmatprep.subr.bf16.mxu0 %v6034_v24  ;;  %1536 = vmatmul.mubr.bf16.gmra.mrb[12].mxu1 %v6691_v48  ;;  %v497_v43 = vrot.slane %v496_v2, 4  ;;  %v519_v48 = vrot.slane %v517_v16, 5  ;;  %v529_v0 = vrot.slane %v527_v39, 4  ;;  %v538_v3 = vshrl.u32 %v6813_v52, 16  ;;  %v6850_v39 = vld [vmem:[%s8015_s1 + $0x200] sm:$0xff]  }
  0x7f   : > { %5555 = vmatprep.subr.bf16.mxu1 %v6037_v25  ;;  %1543 = vmatprep.mubr.bf16.mxu1 %v6714_v15  ;;  %v523_v15 = vshll.u32 %v6788_v19, 16  ;;  %v541_v16 = vshll.u32 %v6813_v52, 16 }
  0x80   : > { %5556 = vmatpush3.bf16.msra.mxu1 %v6037_v25  ;;  %v520_v62 = vor.u32 %v519_v48, %v516_v17  ;;  %v512_v25 = vsel %vm6563_vm2, %v507_v10, %v511_v44  ;;  %v6838_v17 = vcombine.low %v6668_v27, %v6678_v37  ;;  %v551_v44 = vshrl.u32 %v6820_v34, 16 }
  0x81   : > { %5522 = vmatpush3.bf16.msra.mxu0 %v6034_v24  ;;  %5557 = vmatprep.subr.bf16.mxu1 %v6038_v56  ;;  %v502_v24 = vsel %vm6563_vm2, %v497_v43, %v501_v9  ;;  %v525_v51 = vrot.slane %v523_v15, 5  ;;  %v547_v43 = vshll.u32 %v6820_v34, 16  ;;  %v6852_v10 = vrot.slane %v538_v3, 4 }
  0x82   : > { %5173 = vmatprep.subr.bf16.mxu0 %v6039_v30  ;;  %v535_v30 = vrot.slane %v533_v40, 5  ;;  %v6832_v18 = vcombine.low %v502_v24, %v512_v25  ;;  %v521_v23 = vrot.slane %v520_v62, 4  ;;  %v6854_v40 = vrot.slane %v541_v16, 5 }
  0x83   : > { %v530_v2 = vor.u32 %v529_v0, %v525_v51  ;;  %v6856_v24 = vrot.slane %v547_v43, 5  ;;  %v6867_v0 = vld [vmem:[%s6519_s14 + $0x80] sm:$0x1]  ;;  %v4526_v25 = vrot.slane %v6528_v31, 9  ;;  %v633_v3 = vrot.slane %v6531_v32, 5 }
  0x84   : > { %1174 = vmatmul.mubr.bf16.gmra.mrb[16].mxu0 %v6799_v57  ;;  %5558 = vmatpush3.bf16.msra.mxu1 %v6038_v56  ;;  %v526_v9 = vsel %vm6563_vm2, %v521_v23, %v525_v51  ;;  %v636_v16 = vrot.slane %v6534_v33, 5  ;;  %v629_v31 = vrot.slane %v6554_v50, 5  ;;  %v6884_v32 = vcombine.low %v6712_v12, %v6717_v20 }
  0x85   : > { %1181 = vmatprep.mubr.bf16.mxu0 %v6771_v42  ;;  %v531_v56 = vrot.slane %v530_v2, 4  ;;  %5579 = vmatprep.subr.bf16.mxu1 %v6850_v39  ;;  %v553_v2 = vrot.slane %v551_v44, 4  ;;  %v634_v43 = vsel %vm6860_vm5, %v4526_v25, %v633_v3  ;;  %v635_v15 = vrot.slane %v633_v3, 4 }
  0x86   : > { %1544 = vmatmul.mubr.bf16.gmra.mrb[16].mxu1 %v6734_v41  ;;  %v544_v50 = vor.u32 %v6854_v40, %v6852_v10  ;;  %v557_v25 = vshll.u32 %v6867_v0, 16  ;;  %v4525_v44 = vrot.slane %v6548_v46, 9  ;;  %v647_v10 = vrot.slane %v6594_v14, 5 }
  0x87   : > { %1551 = vmatprep.mubr.bf16.mxu1 %v6745_v28  ;;  %v536_v51 = vsel %vm6563_vm2, %v531_v56, %v535_v30  ;;  %v4527_v30 = vrot.slane %v6559_v53, 9  ;;  %v640_v56 = vrot.slane %v6571_v58, 5  ;;  %v643_v58 = vrot.slane %v6574_v63, 5 }
  0x88   : > { %v6872_v23 = vcombine.low %v526_v9, %v536_v51  ;;  %v637_v9 = vsel %vm6860_vm5, %v635_v15, %v636_v16  ;;  %v554_v15 = vor.u32 %v553_v2, %v6856_v24  ;;  %v626_v63 = vrot.slane %v6551_v47, 5 }
  0x89   : > { %v641_v53 = vsel %vm6860_vm5, %v4527_v30, %v640_v56  ;;  %v642_v51 = vrot.slane %v640_v56, 4  ;;  %v6897_v3 = vcombine.low %v634_v43, %v637_v9  ;;  %v4528_v30 = vrot.slane %v6591_v13, 9 }
  0x8a   : > { %v650_v40 = vrot.slane %v6604_v26, 5  ;;  %v4529_v43 = vrot.slane %v6615_v36, 9  ;;  %v627_v46 = vsel %vm6860_vm5, %v4525_v44, %v626_v63  ;;  %v628_v9 = vrot.slane %v626_v63, 4 }
  0x8b   : > { %v644_v16 = vsel %vm6860_vm5, %v642_v51, %v643_v58  ;;  %v654_v2 = vrot.slane %v6620_v45, 5  ;;  %v657_v51 = vrot.slane %v6633_v60, 5  ;;  %v648_v47 = vsel %vm6860_vm5, %v4528_v30, %v647_v10 }
  0x8c   : > { %1182 = vmatmul.mubr.bf16.gmra.mrb[20].mxu0 %v6838_v17  ;;  %v6906_v56 = vcombine.low %v641_v53, %v644_v16  ;;  %v649_v13 = vrot.slane %v647_v10, 4  ;;  %v4530_v53 = vrot.slane %v6643_v5, 9  ;;  %v661_v14 = vrot.slane %v6646_v6, 5 }
  0x8d   : > { %1189 = vmatprep.mubr.bf16.mxu0 %v6815_v11  ;;  %v630_v26 = vsel %vm6860_vm5, %v628_v9, %v629_v31  ;;  %v655_v36 = vsel %vm6860_vm5, %v4529_v43, %v654_v2  ;;  %v656_v44 = vrot.slane %v654_v2, 4  ;;  %v664_v45 = vrot.slane %v6661_v21, 5 }
  0x8e   : > { %1552 = vmatmul.mubr.bf16.gmra.mrb[20].mxu1 %v6799_v57  ;;  %v4561_v60 = vcombine.low %v627_v46, %v630_v26  ;;  %v651_v58 = vsel %vm6860_vm5, %v649_v13, %v650_v40  ;;  %v662_v5 = vsel %vm6860_vm5, %v4530_v53, %v661_v14  ;;  %v663_v6 = vrot.slane %v661_v14, 4  ;;  %v6041_v14 = vld [vmem:[%s8015_s1 + $0x1c8] sm:$0xff]  }
  0x8f   : > { %1559 = vmatprep.mubr.bf16.mxu1 %v6771_v42  ;;  %v6930_v16 = vcombine.low %v648_v47, %v651_v58  ;;  %v658_v31 = vsel %vm6860_vm5, %v656_v44, %v657_v51  ;;  %v4531_v63 = vrot.slane %v6668_v27, 9  ;;  %v668_v30 = vrot.slane %v6678_v37, 5  ;;  %v6042_v26 = vld [vmem:[%s8015_s1 + $0x188] sm:$0xff]   ;;  %v6043_v44 = vld [vmem:[%s8015_s1 + $0x1d0] sm:$0xff]   ;;  %v6047_v58 = vld [vmem:[%s8015_s1 + $0x1d8] sm:$0xff]  }
  0x90   : > { %v6937_v21 = vcombine.low %v655_v36, %v658_v31  ;;  %v665_v10 = vsel %vm6860_vm5, %v663_v6, %v664_v45  ;;  %v671_v40 = vrot.slane %v6700_v1, 5  ;;  %v6944_v43 = vcombine.low %v6739_v55, %v6750_v61  ;;  %v6046_v36 = vld [vmem:[%s8015_s1 + $0x208] sm:$0xff]   ;;  %v6048_v6 = vld [vmem:[%s8015_s1 + $0x198] sm:$0xff]  }
  0x91   : > { %v6947_v46 = vcombine.low %v662_v5, %v665_v10  ;;  %v669_v27 = vsel %vm6860_vm5, %v4531_v63, %v668_v30  ;;  %v670_v37 = vrot.slane %v668_v30, 4  ;;  %v545_v9 = vrot.slane %v544_v50, 4  ;;  %v6052_v31 = vld [vmem:[%s8015_s1 + $0x218] sm:$0xff]  }
  0x92   : > { %v555_v2 = vrot.slane %v554_v15, 4  ;;  %v559_v51 = vrot.slane %v557_v25, 5  ;;  %v6965_v50 = vcombine.low %v6781_v8, %v6788_v19  ;;  %v6040_v15 = vld [vmem:[%s8015_s1 + $0x180] sm:$0xff]   ;;  %v675_v45 = vrot.slane %v6717_v20, 5  ;;  %v6049_v20 = vld [vmem:[%s8015_s1 + $0x210] sm:$0xff]  }
  0x93   : > { %v672_v47 = vsel %vm6860_vm5, %v670_v37, %v671_v40  ;;  %v550_v1 = vsel %vm6563_vm2, %v545_v9, %v6856_v24  ;;  %v6975_v24 = vcombine.low %v6813_v52, %v6820_v34  ;;  %v682_v63 = vrot.slane %v6750_v61, 5  ;;  %v6051_v61 = vld [vmem:[%s8015_s1 + $0x1a0] sm:$0xff]  }
  0x94   : > { %1190 = vmatmul.mubr.bf16.gmra.mrb[24].mxu0 %v6884_v32  ;;  %v6953_v13 = vcombine.low %v669_v27, %v672_v47  ;;  %v560_v53 = vsel %vm6563_vm2, %v555_v2, %v559_v51  ;;  %v677_v5 = vrot.slane %v675_v45, 4  ;;  %v689_v10 = vrot.slane %v6788_v19, 5  ;;  %v6053_v19 = vld [vmem:[%s8015_s1 + $0x1e8] sm:$0xff]   ;;  %v6055_v2 = vld [vmem:[%s8015_s1 + $0x220] sm:$0xff]  }
  0x95   : > { %1197 = vmatprep.mubr.bf16.mxu0 %v6832_v18  ;;  %v6968_v25 = vcombine.low %v550_v1, %v560_v53  ;;  %v4533_v27 = vrot.slane %v6739_v55, 9  ;;  %v684_v37 = vrot.slane %v682_v63, 4  ;;  %v685_v9 = vrot.slane %v6776_v59, 5  ;;  %v6054_v53 = vld [vmem:[%s8015_s1 + $0x1a8] sm:$0xff]  }
  0x96   : > { %1560 = vmatmul.mubr.bf16.gmra.mrb[24].mxu1 %v6838_v17  ;;  %v4534_v51 = vrot.slane %v6781_v8, 9  ;;  %v691_v47 = vrot.slane %v689_v10, 4  ;;  %v692_v1 = vrot.slane %v6794_v35, 5  ;;  %v6057_v35 = vld [vmem:[%s8015_s1 + $0x228] sm:$0xff]   ;;  %v696_v8 = vrot.slane %v6820_v34, 5 }
  0x97   : > { %1567 = vmatprep.mubr.bf16.mxu1 %v6815_v11  ;;  %v683_v55 = vsel %vm6860_vm5, %v4533_v27, %v682_v63  ;;  %v686_v59 = vsel %vm6860_vm5, %v684_v37, %v685_v9  ;;  %v8046_v63 = vld [vmem:[#allocation11_spill] sm:$0xff] }
  0x9c   : > { %1198 = vmatmul.mubr.bf16.gmra.mrb[28].mxu0 %v6944_v43 }
  0x9d   : > { %1205 = vmatprep.mubr.bf16.mxu0 %v6872_v23 }
  0x9e   : > { %1568 = vmatmul.mubr.bf16.gmra.mrb[28].mxu1 %v6884_v32 }
  0x9f   : > { %1575 = vmatprep.mubr.bf16.mxu1 %v6832_v18 }
  0xa4   : > { %1206 = vmatmul.mubr.bf16.gmra.mrb[32].mxu0 %v6965_v50 }
  0xa5   : > { %1213 = vmatprep.mubr.bf16.mxu0 %v6968_v25 }
  0xa6   : > { %1576 = vmatmul.mubr.bf16.gmra.mrb[32].mxu1 %v6944_v43 }
  0xa7   : > { %1583 = vmatprep.mubr.bf16.mxu1 %v6872_v23 }
  0xac   : > { %1214 = vmatmul.mubr.bf16.gmra.mrb[36].mxu0 %v6975_v24 }
  0xad   : > { %5523 = vmatprep.mubr.bf16.mxu0 %v6897_v3 }
  0xae   : > { %1584 = vmatmul.mubr.bf16.gmra.mrb[36].mxu1 %v6965_v50 }
  0xaf   : > { %5559 = vmatprep.mubr.bf16.mxu1 %v4561_v60  ;;  %v6045_v60 = vld [vmem:[%s8015_s1 + $0x190] sm:$0xff]  }
  0xb4   : > { %5524 = vmatmul.mubr.bf16.vlgmr.msra.gmra.mrb[40].mxu0 %v6906_v56 }
  0xb5   : > { %5174 = vmatpush3.bf16.msra.mxu0 %v6040_v15  ;;  %5527 = vmatprep.mubr.bf16.mxu0 %v6930_v16  ;;  %v6056_v15 = vld [vmem:[%s8015_s1 + $0x1f0] sm:$0xff]  }
  0xb6   : > { %5175 = vmatprep.subr.bf16.mxu0 %v6041_v14  ;;  %5560 = vmatmul.mubr.bf16.vlgmr.msra.gmra.mrb[40].mxu1 %v6897_v3  ;;  %v4532_v3 = vrot.slane %v6712_v12, 9  ;;  %v6050_v12 = vld [vmem:[%s8015_s1 + $0x1e0] sm:$0xff]   ;;  %v690_v14 = vsel %vm6860_vm5, %v4534_v51, %v689_v10 }
  0xb7   : > { %5563 = vmatprep.mubr.bf16.mxu1 %v6906_v56  ;;  %5580 = vmatpush3.bf16.msra.mxu1 %v6850_v39  ;;  %v678_v39 = vrot.slane %v6720_v22, 5 }
  0xb8   : > { %5581 = vmatprep.subr.bf16.mxu1 %v6046_v36  ;;  %v676_v22 = vsel %vm6860_vm5, %v4532_v3, %v675_v45  ;;  %v4535_v45 = vrot.slane %v6813_v52, 9  ;;  %v6060_v3 = vld [vmem:[%s8015_s1 + $0x1f8] sm:$0xff]  }
  0xb9   : > { %5176 = vmatpush3.bf16.msra.mxu0 %v6042_v26  ;;  %v679_v30 = vsel %vm6860_vm5, %v677_v5, %v678_v39  ;;  %v693_v26 = vsel %vm6860_vm5, %v691_v47, %v692_v1  ;;  %v6062_v39 = vld [vmem:[%s8015_s1 + $0x238] sm:$0xff]  }
  0xba   : > { %5177 = vmatprep.subr.bf16.mxu0 %v6043_v44  ;;  %v7035_v40 = vcombine.low %v676_v22, %v679_v30  ;;  %v4570_v34 = vcombine.low %v690_v14, %v693_v26  ;;  %v6058_v44 = vld [vmem:[%s8015_s1 + $0x1b0] sm:$0xff]   ;;  %v697_v5 = vsel %vm6860_vm5, %v4535_v45, %v696_v8 }
  0xbb   : > { %5582 = vmatpush3.bf16.msra.mxu1 %v6046_v36  ;;  %v4569_v36 = vcombine.low %v683_v55, %v686_v59 }
  0xbc   : > { %5528 = vmatmul.mubr.bf16.gmra.mrb[44].mxu0 %v6937_v21  ;;  %5583 = vmatprep.subr.bf16.mxu1 %v6049_v20 }
  0xbd   : > { %5178 = vmatpush3.bf16.msra.mxu0 %v6045_v60  ;;  %5531 = vmatprep.mubr.bf16.mxu0 %v6947_v46  ;;  %v698_v60 = vrot.slane %v696_v8, 4 }
  0xbe   : > { %5179 = vmatprep.subr.bf16.mxu0 %v6047_v58  ;;  %5564 = vmatmul.mubr.bf16.gmra.mrb[44].mxu1 %v6930_v16  ;;  %v699_v58 = vrot.slane %v6867_v0, 5  ;;  %v6061_v0 = vld [vmem:[%s8015_s1 + $0x1b8] sm:$0xff]  }
  0xbf   : > { %5567 = vmatprep.mubr.bf16.mxu1 %v6937_v21  ;;  %5584 = vmatpush3.bf16.msra.mxu1 %v6049_v20  ;;  %v6059_v20 = vld [vmem:[%s8015_s1 + $0x230] sm:$0xff]  }
  0xc0   : > { %5585 = vmatprep.subr.bf16.mxu1 %v6052_v31  ;;  %v700_v52 = vsel %vm6860_vm5, %v698_v60, %v699_v58 }
  0xc1   : > { %5180 = vmatpush3.bf16.msra.mxu0 %v6048_v6  ;;  %v4571_v6 = vcombine.low %v697_v5, %v700_v52 }
  0xc2   : > { %5181 = vmatprep.subr.bf16.mxu0 %v6050_v12  ;;  %v293_v12 = vld [vmem:[%s6519_s14 + $0x8c] sm:$0x1] }
  0xc3   : > { %5586 = vmatpush3.bf16.msra.mxu1 %v6052_v31  ;;  %v8045_v31 = vld [vmem:[#allocation10_spill] sm:$0xff]  ;;  %v706_v30 = vrot.slane %v293_v12, 5  ;;  %v581_v51 = vshll.u32 %v293_v12, 16  ;;  %v2197_v12 = vld [vmem:[#allocation2 + $0xc] sm:$0x1] }
  0xc4   : > { %5532 = vmatmul.mubr.bf16.gmra.mrb[48].mxu0 %v6953_v13  ;;  %5587 = vmatprep.subr.bf16.mxu1 %v6055_v2 }
  0xc5   : > { %5182 = vmatpush3.bf16.msra.mxu0 %v6051_v61  ;;  %5535 = vmatprep.mubr.bf16.mxu0 %v7035_v40 }
  0xc6   : > { %5183 = vmatprep.subr.bf16.mxu0 %v6053_v19  ;;  %5568 = vmatmul.mubr.bf16.gmra.mrb[48].mxu1 %v6947_v46 }
  0xc7   : > { %5571 = vmatprep.mubr.bf16.mxu1 %v6953_v13  ;;  %5588 = vmatpush3.bf16.msra.mxu1 %v6055_v2 }
  0xc8   : > { %5589 = vmatprep.subr.bf16.mxu1 %v6057_v35 }
  0xc9   : > { %5184 = vmatpush3.bf16.msra.mxu0 %v6054_v53 }
  0xca   : > { %5185 = vmatprep.subr.bf16.mxu0 %v6056_v15 }
  0xcb   : > { %5590 = vmatpush3.bf16.msra.mxu1 %v6057_v35 }
  0xcc   : > { %5536 = vmatmul.mubr.bf16.gmra.mrb[52].mxu0 %v4569_v36  ;;  %5591 = vmatprep.subr.bf16.mxu1 %v6059_v20 }
  0xcd   : > { %5539 = vmatprep.mubr.bf16.mxu0 %v4570_v34  ;;  %5186 = vmatpush3.bf16.msra.mxu0 %v6058_v44 }
  0xce   : > { %5187 = vmatprep.subr.bf16.mxu0 %v6060_v3  ;;  %5572 = vmatmul.mubr.bf16.gmra.mrb[52].mxu1 %v7035_v40  ;;  %v2226_v3 = vld [vmem:[#allocation2 + $0x8] sm:$0x1] }
  0xcf   : > { %5575 = vmatprep.mubr.bf16.mxu1 %v4569_v36  ;;  %5592 = vmatpush3.bf16.msra.mxu1 %v6059_v20  ;;  %v2227_v52 = vsel %vm7138_vm10, 0, %v2226_v3 }
  0xd0   : > { %5593 = vmatprep.subr.bf16.mxu1 %v6062_v39  ;;  %2228 = vst [vmem:[#allocation2 + $0x8] sm:$0x1] %v2227_v52 }
  0xd1   : > { %5188 = vmatpush3.bf16.msra.mxu0 %v6061_v0 }
  0xd3   : > { %5594 = vmatpush3.bf16.msra.mxu1 %v6062_v39 }
  0xd4   : > { %5540 = vmatmul.mubr.bf16.gmra.mrb[56].mxu0 %v4571_v6 }
  0xd5   : > { %1930 = vmatprep.mubr.bf16.mxu0 %v6648_v7 }
  0xd6   : > { %5576 = vmatmul.mubr.bf16.gmra.mrb[56].mxu1 %v4570_v34 }
  0xd7   : > { %5595 = vmatprep.mubr.bf16.mxu1 %v6906_v56  ;;  %v292_v56 = vld [vmem:[%s6519_s14 + $0x88] sm:$0xf] }
  0xd8   : > { %v571_v61 = vshll.u32 %v292_v56, 16 }
  0xda   : > { %v573_v9 = vrot.slane %v571_v61, 5 }
  0xdc   : > { %1931 = vmatmul.mubr.bf16.vlgmr.msra.gmra.mrb[60].mxu0 %v6624_v49  ;;  %v703_v49 = vrot.slane %v292_v56, 5 }
  0xdd   : > { %1938 = vmatprep.mubr.bf16.mxu0 %v6673_v29 }
  0xde   : > { %5596 = vmatmul.mubr.bf16.vlgmr.msra.gmra.mrb[40].mxu1 %v6930_v16  ;;  %v291_v16 = vld [vmem:[%s6519_s14 + $0x84] sm:$0xf]  ;;  %v705_v22 = vrot.slane %v703_v49, 4 }
  0xdf   : > { %5599 = vmatprep.mubr.bf16.mxu1 %v6937_v21  ;;  %v4536_v21 = vrot.slane %v291_v16, 9  ;;  %v565_v10 = vshll.u32 %v291_v16, 16 }
  0xe1   : > { %v567_v37 = vrot.slane %v565_v10, 5 }
  0xe4   : > { %1939 = vmatmul.mubr.bf16.gmra.mrb[64].mxu0 %v8045_v31 }
  0xe5   : > { %1946 = vmatprep.mubr.bf16.mxu0 %v8046_v63 }
  0xe6   : > { %5600 = vmatmul.mubr.bf16.gmra.mrb[44].mxu1 %v6947_v46  ;;  %v707_v46 = vsel %vm6860_vm5, %v705_v22, %v706_v30  ;;  %v2198_v30 = vsel %vm7131_vm8, 0, %v2197_v12 }
  0xe7   : > { %5603 = vmatprep.mubr.bf16.mxu1 %v6953_v13  ;;  %2199 = vst [vmem:[#allocation2 + $0xc] sm:$0x1] %v2198_v30 }
  0xec   : > { %1947 = vmatmul.mubr.bf16.gmra.mrb[68].mxu0 %v6734_v41  ;;  %v704_v41 = vsel %vm6860_vm5, %v4536_v21, %v703_v49 }
  0xed   : > { %1954 = vmatprep.mubr.bf16.mxu0 %v6745_v28  ;;  %v4572_v13 = vcombine.low %v704_v41, %v707_v46  ;;  %v2229_v46 = vld [vmem:[#allocation2 + $0x14] sm:$0x1] }
  0xee   : > { %5604 = vmatmul.mubr.bf16.gmra.mrb[48].mxu1 %v7035_v40  ;;  %v575_v40 = vshrl.u32 %v292_v56, 16 }
  0xef   : > { %5607 = vmatprep.mubr.bf16.mxu1 %v4569_v36 }
  0xf0   : > { %v577_v19 = vrot.slane %v575_v40, 4 }
  0xf2   : > { %v578_v2 = vor.u32 %v577_v19, %v573_v9 }
  0xf4   : > { %1955 = vmatmul.mubr.bf16.gmra.mrb[72].mxu0 %v6799_v57  ;;  %v562_v57 = vshrl.u32 %v291_v16, 16  ;;  %v579_v1 = vrot.slane %v578_v2, 4  ;;  %v2200_v2 = vld [vmem:[#allocation2 + $0x18] sm:$0x1] }
  0xf5   : > { %1962 = vmatprep.mubr.bf16.mxu0 %v6771_v42 }
  0xf6   : > { %5608 = vmatmul.mubr.bf16.gmra.mrb[52].mxu1 %v4570_v34  ;;  %v564_v27 = vrot.slane %v562_v57, 4  ;;  %v2230_v57 = vsel %vm7138_vm10, 0, %v2229_v46 }
  0xf7   : > { %5611 = vmatprep.mubr.bf16.mxu1 %v4571_v6  ;;  %2231 = vst [vmem:[#allocation2 + $0x14] sm:$0x1] %v2230_v57  ;;  %v2206_v57 = vld [vmem:[#allocation2 + $0x30] sm:$0x1] }
  0xfc   : > { %1963 = vmatmul.mubr.bf16.gmra.mrb[76].mxu0 %v6838_v17  ;;  %v568_v17 = vor.u32 %v567_v37, %v564_v27 }
  0xfd   : > { %1970 = vmatprep.mubr.bf16.mxu0 %v6815_v11 }
  0xfe   : > { %5612 = vmatmul.mubr.bf16.gmra.mrb[56].mxu1 %v4572_v13  ;;  %v569_v47 = vrot.slane %v568_v17, 4 }
 0x100   : > { %v574_v55 = vsel %vm6563_vm2, %v569_v47, %v573_v9 }
 0x104   : > { %1971 = vmatmul.mubr.bf16.gmra.mrb[80].mxu0 %v6884_v32  ;;  %v583_v32 = vrot.slane %v581_v51, 5 }
 0x105   : > { %1978 = vmatprep.mubr.bf16.mxu0 %v6832_v18 }
 0x106   : > { %v584_v59 = vsel %vm6563_vm2, %v579_v1, %v583_v32  ;;  %v2201_v1 = vsel %vm7131_vm8, 0, %v2200_v2 }
 0x107   : > { %v4560_v53 = vcombine.low %v574_v55, %v584_v59  ;;  %2202 = vst [vmem:[#allocation2 + $0x18] sm:$0x1] %v2201_v1  ;;  %v2232_v55 = vld [vmem:[#allocation2 + $0x20] sm:$0x1] }
 0x10c   : > { %1979 = vmatmul.mubr.bf16.gmra.mrb[84].mxu0 %v6944_v43  ;;  %v4548_v43 = vcombine.low %v291_v16, %v292_v56 }
 0x10d   : > { %1986 = vmatprep.mubr.bf16.mxu0 %v6872_v23 }
 0x114   : > { %1987 = vmatmul.mubr.bf16.gmra.mrb[88].mxu0 %v6965_v50 }
 0x115   : > { %1994 = vmatprep.mubr.bf16.mxu0 %v6968_v25  ;;  %v2194_v25 = vld [vmem:[#allocation2] sm:$0x1] }
 0x116   : > { %v2195_v44 = vsel %vm7131_vm8, 0, %v2194_v25 }
 0x117   : > { %2196 = vst [vmem:[#allocation2] sm:$0x1] %v2195_v44  ;;  %v2203_v44 = vld [vmem:[#allocation2 + $0x24] sm:$0x1] }
 0x118   : > { %v2204_v3 = vsel %vm7131_vm8, 0, %v2203_v44 }
 0x119   : > { %2205 = vst [vmem:[#allocation2 + $0x24] sm:$0x1] %v2204_v3  ;;  %v2241_v3 = vld [vmem:[#allocation2 + $0x44] sm:$0x1] }
 0x11c   : > { %1995 = vmatmul.mubr.bf16.gmra.mrb[92].mxu0 %v6975_v24 }
 0x11d   : > { %2002 = vmatprep.mubr.bf16.mxu0 %v4560_v53  ;;  %v2233_v53 = vsel %vm7138_vm10, 0, %v2232_v55 }
 0x11e   : > { %2234 = vst [vmem:[#allocation2 + $0x20] sm:$0x1] %v2233_v53 }
 0x124   : > { %2003 = vmatmul.mubr.bf16.gmra.mrb[96].mxu0 %v4548_v43 }
 0x137   : > { %v5001_v35 = vpop.f32.mrb[0].mxu0 }
 0x138   : > { %v5002_v8 = vpop.f32.mrb[1].mxu0 }
 0x139   : > { %v7126_v15 = vadd.f32 %v5002_v8, %v5001_v35  ;;  %v5004_v14 = vpop.f32.mrb[2].mxu0  ;;  %v5095_v36 = vpop.f32.mrb[0].mxu1 }
 0x13a   : > { %v5005_v50 = vpop.f32.mrb[3].mxu0  ;;  %v5096_v24 = vpop.f32.mrb[1].mxu1 }
 0x13b   : > { %v7128_v26 = vadd.f32 %v5005_v50, %v5004_v14  ;;  %v7142_v60 = vadd.f32 %v5096_v24, %v5095_v36  ;;  %v5098_v58 = vpop.f32.mrb[2].mxu1 }
 0x13c   : > { %v5099_v20 = vpop.f32.mrb[3].mxu1 }
 0x13d   : > { %v7144_v5 = vadd.f32 %v5099_v20, %v5098_v58 }
 0x13f   : > { %v5007_v0 = vpop.f32.mrb[4].mxu0 }
 0x140   : > { %v5008_v39 = vpop.f32.mrb[5].mxu0 }
 0x141   : > { %v7148_v6 = vadd.f32 %v5008_v39, %v5007_v0  ;;  %v5010_v31 = vpop.f32.mrb[6].mxu0  ;;  %v5101_v56 = vpop.f32.mrb[4].mxu1  ;;  %v2235_v0 = vld [vmem:[#allocation2 + $0x2c] sm:$0x1] }
 0x142   : > { %v5011_v63 = vpop.f32.mrb[7].mxu0  ;;  %v5102_v16 = vpop.f32.mrb[5].mxu1 }
 0x143   : > { %v7150_v49 = vadd.f32 %v5011_v63, %v5010_v31  ;;  %v7152_v21 = vadd.f32 %v5102_v16, %v5101_v56  ;;  %v5104_v22 = vpop.f32.mrb[6].mxu1  ;;  %v2236_v31 = vsel %vm7138_vm10, 0, %v2235_v0  ;;  %v2242_v0 = vsel %vm7138_vm10, 0, %v2241_v3 }
 0x144   : > { %v5105_v41 = vpop.f32.mrb[7].mxu1  ;;  %2237 = vst [vmem:[#allocation2 + $0x2c] sm:$0x1] %v2236_v31  ;;  %2243 = vst [vmem:[#allocation2 + $0x44] sm:$0x1] %v2242_v0 }
 0x145   : > { %v7156_v13 = vadd.f32 %v5105_v41, %v5104_v22  ;;  %v2215_v0 = vld [vmem:[#allocation2 + $0x54] sm:$0x1] }
 0x147   : > { %v5013_v10 = vpop.f32.mrb[8].mxu0 }
 0x148   : > { %v5014_v61 = vpop.f32.mrb[9].mxu0 }
 0x149   : > { %v7160_v40 = vadd.f32 %v5014_v61, %v5013_v10  ;;  %v5016_v27 = vpop.f32.mrb[10].mxu0  ;;  %v5107_v9 = vpop.f32.mrb[8].mxu1 }
 0x14a   : > { %v5017_v37 = vpop.f32.mrb[11].mxu0  ;;  %v5108_v17 = vpop.f32.mrb[9].mxu1 }
 0x14b   : > { %v7162_v19 = vadd.f32 %v5017_v37, %v5016_v27  ;;  %v7164_v51 = vadd.f32 %v5108_v17, %v5107_v9  ;;  %v5110_v47 = vpop.f32.mrb[10].mxu1  ;;  %v2207_v27 = vsel %vm7131_vm8, 0, %v2206_v57  ;;  %v2238_v9 = vld [vmem:[#allocation2 + $0x38] sm:$0x1] }
 0x14c   : > { %v5111_v32 = vpop.f32.mrb[11].mxu1  ;;  %2208 = vst [vmem:[#allocation2 + $0x30] sm:$0x1] %v2207_v27  ;;  %v2239_v2 = vsel %vm7138_vm10, 0, %v2238_v9 }
 0x14d   : > { %v7168_v59 = vadd.f32 %v5111_v32, %v5110_v47  ;;  %2240 = vst [vmem:[#allocation2 + $0x38] sm:$0x1] %v2239_v2 }
 0x14f   : > { %v5019_v43 = vpop.f32.mrb[12].mxu0 }
 0x150   : > { %v5020_v35 = vpop.f32.mrb[13].mxu0 }
 0x151   : > { %v7172_v8 = vadd.f32 %v5020_v35, %v5019_v43  ;;  %v5022_v14 = vpop.f32.mrb[14].mxu0  ;;  %v5113_v25 = vpop.f32.mrb[12].mxu1 }
 0x152   : > { %v5023_v50 = vpop.f32.mrb[15].mxu0  ;;  %v5114_v24 = vpop.f32.mrb[13].mxu1 }
 0x153   : > { %v7174_v36 = vadd.f32 %v5023_v50, %v5022_v14  ;;  %v7176_v58 = vadd.f32 %v5114_v24, %v5113_v25  ;;  %v5116_v20 = vpop.f32.mrb[14].mxu1  ;;  %v2209_v50 = vld [vmem:[#allocation2 + $0x3c] sm:$0x1] }
 0x154   : > { %v5117_v52 = vpop.f32.mrb[15].mxu1  ;;  %v2210_v44 = vsel %vm7131_vm8, 0, %v2209_v50 }
 0x155   : > { %v7180_v39 = vadd.f32 %v5117_v52, %v5116_v20  ;;  %2211 = vst [vmem:[#allocation2 + $0x3c] sm:$0x1] %v2210_v44 }
 0x157   : > { %v5025_v63 = vpop.f32.mrb[16].mxu0 }
 0x158   : > { %v5026_v56 = vpop.f32.mrb[17].mxu0 }
 0x159   : > { %v7184_v16 = vadd.f32 %v5026_v56, %v5025_v63  ;;  %v5028_v12 = vpop.f32.mrb[18].mxu0  ;;  %v5119_v30 = vpop.f32.mrb[16].mxu1 }
 0x15a   : > { %v5029_v22 = vpop.f32.mrb[19].mxu0  ;;  %v5120_v46 = vpop.f32.mrb[17].mxu1 }
 0x15b   : > { %v7186_v41 = vadd.f32 %v5029_v22, %v5028_v12  ;;  %v7188_v10 = vadd.f32 %v5120_v46, %v5119_v30  ;;  %v5122_v61 = vpop.f32.mrb[18].mxu1 }
 0x15c   : > { %v5123_v37 = vpop.f32.mrb[19].mxu1 }
 0x15d   : > { %v7192_v17 = vadd.f32 %v5123_v37, %v5122_v61  ;;  %v2212_v61 = vld [vmem:[#allocation2 + $0x48] sm:$0x1] }
 0x15e   : > { %v2213_v9 = vsel %vm7131_vm8, 0, %v2212_v61 }
 0x15f   : > { %v5031_v47 = vpop.f32.mrb[20].mxu0  ;;  %2214 = vst [vmem:[#allocation2 + $0x48] sm:$0x1] %v2213_v9 }
 0x160   : > { %v5032_v1 = vpop.f32.mrb[21].mxu0 }
 0x161   : > { %v7196_v32 = vadd.f32 %v5032_v1, %v5031_v47  ;;  %v5034_v55 = vpop.f32.mrb[22].mxu0  ;;  %v5125_v43 = vpop.f32.mrb[20].mxu1  ;;  %v2244_v47 = vld [vmem:[#allocation2 + $0x50] sm:$0x1] }
 0x162   : > { %v5035_v53 = vpop.f32.mrb[23].mxu0  ;;  %v5126_v14 = vpop.f32.mrb[21].mxu1 }
 0x163   : > { %v7198_v35 = vadd.f32 %v5035_v53, %v5034_v55  ;;  %v7200_v25 = vadd.f32 %v5126_v14, %v5125_v43  ;;  %v5128_v24 = vpop.f32.mrb[22].mxu1  ;;  %v2245_v55 = vsel %vm7138_vm10, 0, %v2244_v47 }
 0x164   : > { %v5129_v20 = vpop.f32.mrb[23].mxu1  ;;  %2246 = vst [vmem:[#allocation2 + $0x50] sm:$0x1] %v2245_v55 }
 0x165   : > { %v7204_v52 = vadd.f32 %v5129_v20, %v5128_v24 }
 0x167   : > { %v5037_v31 = vpop.f32.mrb[24].mxu0 }
 0x168   : > { %v5038_v63 = vpop.f32.mrb[25].mxu0 }
 0x169   : > { %v7208_v56 = vadd.f32 %v5038_v63, %v5037_v31  ;;  %v5040_v12 = vpop.f32.mrb[26].mxu0  ;;  %v5131_v30 = vpop.f32.mrb[24].mxu1 }
 0x16a   : > { %v5041_v22 = vpop.f32.mrb[27].mxu0  ;;  %v5132_v57 = vpop.f32.mrb[25].mxu1 }
 0x16b   : > { %v7210_v46 = vadd.f32 %v5041_v22, %v5040_v12  ;;  %v7212_v27 = vadd.f32 %v5132_v57, %v5131_v30  ;;  %v5134_v37 = vpop.f32.mrb[26].mxu1  ;;  %v2216_v12 = vsel %vm7131_vm8, 0, %v2215_v0  ;;  %v2247_v30 = vld [vmem:[#allocation2 + $0x5c] sm:$0x1] }
 0x16c   : > { %v5135_v2 = vpop.f32.mrb[27].mxu1  ;;  %2217 = vst [vmem:[#allocation2 + $0x54] sm:$0x1] %v2216_v12  ;;  %v2248_v61 = vsel %vm7138_vm10, 0, %v2247_v30  ;;  %v2250_v12 = vld [vmem:[#allocation2 + $0x68] sm:$0x1] }
 0x16d   : > { %v7216_v1 = vadd.f32 %v5135_v2, %v5134_v37  ;;  %2249 = vst [vmem:[#allocation2 + $0x5c] sm:$0x1] %v2248_v61  ;;  %v2251_v30 = vsel %vm7138_vm10, 0, %v2250_v12  ;;  %v2253_v12 = vld [vmem:[#allocation2 + $0x74] sm:$0x1] }
 0x16e   : > { %2252 = vst [vmem:[#allocation2 + $0x68] sm:$0x1] %v2251_v30  ;;  %v2254_v30 = vsel %vm7138_vm10, 0, %v2253_v12 }
 0x16f   : > { %v5043_v53 = vpop.f32.mrb[28].mxu0  ;;  %2255 = vst [vmem:[#allocation2 + $0x74] sm:$0x1] %v2254_v30 }
 0x170   : > { %v5044_v43 = vpop.f32.mrb[29].mxu0 }
 0x171   : > { %v7220_v14 = vadd.f32 %v5044_v43, %v5043_v53  ;;  %v5046_v50 = vpop.f32.mrb[30].mxu0  ;;  %v5137_v44 = vpop.f32.mrb[28].mxu1 }
 0x172   : > { %v5047_v24 = vpop.f32.mrb[31].mxu0  ;;  %v5138_v3 = vpop.f32.mrb[29].mxu1 }
 0x173   : > { %v7222_v20 = vadd.f32 %v5047_v24, %v5046_v50  ;;  %v7224_v31 = vadd.f32 %v5138_v3, %v5137_v44  ;;  %v5140_v63 = vpop.f32.mrb[30].mxu1  ;;  %v2218_v24 = vld [vmem:[#allocation2 + $0x60] sm:$0x1] }
 0x174   : > { %v5141_v22 = vpop.f32.mrb[31].mxu1  ;;  %v2219_v0 = vsel %vm7131_vm8, 0, %v2218_v24  ;;  %v2221_v24 = vld [vmem:[#allocation2 + $0x6c] sm:$0x1] }
 0x175   : > { %v7228_v57 = vadd.f32 %v5141_v22, %v5140_v63  ;;  %2220 = vst [vmem:[#allocation2 + $0x60] sm:$0x1] %v2219_v0 }
 0x177   : > { %v5049_v37 = vpop.f32.mrb[32].mxu0 }
 0x178   : > { %v5050_v9 = vpop.f32.mrb[33].mxu0 }
 0x179   : > { %v7232_v2 = vadd.f32 %v5050_v9, %v5049_v37  ;;  %v5052_v47 = vpop.f32.mrb[34].mxu0  ;;  %v5143_v53 = vpop.f32.mrb[32].mxu1 }
 0x17a   : > { %v5053_v55 = vpop.f32.mrb[35].mxu0  ;;  %v5144_v50 = vpop.f32.mrb[33].mxu1 }
 0x17b   : > { %v7234_v43 = vadd.f32 %v5053_v55, %v5052_v47  ;;  %v7236_v44 = vadd.f32 %v5144_v50, %v5143_v53  ;;  %v5146_v3 = vpop.f32.mrb[34].mxu1 }
 0x17c   : > { %v5147_v63 = vpop.f32.mrb[35].mxu1 }
 0x17d   : > { %v7240_v22 = vadd.f32 %v5147_v63, %v5146_v3  ;;  %v2222_v3 = vsel %vm7131_vm8, 0, %v2221_v24 }
 0x17e   : > { %2223 = vst [vmem:[#allocation2 + $0x6c] sm:$0x1] %v2222_v3 }
 0x17f   : > { %v5055_v61 = vpop.f32.mrb[36].mxu0 }
 0x180   : > { %v5056_v37 = vpop.f32.mrb[37].mxu0 }
 0x181   : > { %v7244_v9 = vadd.f32 %v5056_v37, %v5055_v61  ;;  %v5058_v47 = vpop.f32.mrb[38].mxu0  ;;  %v5149_v53 = vpop.f32.mrb[36].mxu1 }
 0x182   : > { %v5059_v55 = vpop.f32.mrb[39].mxu0  ;;  %v5150_v48 = vpop.f32.mrb[37].mxu1 }
 0x183   : > { %v7246_v50 = vadd.f32 %v5059_v55, %v5058_v47  ;;  %v5151_v33 = vadd.f32 %v5150_v48, %v5149_v53  ;;  %v5152_v0 = vpop.f32.mrb[38].mxu1 }
 0x184   : > { %v5153_v63 = vpop.f32.mrb[39].mxu1 }
 0x185   : > { %v5154_v4 = vadd.f32 %v5153_v63, %v5152_v0 }
 0x187   : > { %v5525_v61 = vpop.f32.mrb[40].mxu0 }
 0x188   : > { %v1265_v37 = vadd.f32 %v5525_v61, %v7148_v6  ;;  %v1256_v47 = vpop.f32.mrb[41].mxu0 }
 0x189   : > { %v1257_v55 = vadd.f32 %v7126_v15, %v1256_v47  ;;  %v5526_v38 = vpop.f32.mrb[42].mxu0 }
 0x18a   : > { %v7255_v48 = vadd.f32 %v7152_v21, %v1265_v37  ;;  %v1268_v53 = vadd.f32 %v5526_v38, %v7150_v49  ;;  %v1259_v24 = vpop.f32.mrb[43].mxu0 }
 0x18b   : > { %v1514_v3 = vadd.f32 %v7142_v60, %v1257_v55  ;;  %v1260_v0 = vadd.f32 %v7128_v26, %v1259_v24 }
 0x18c   : > { %v7261_v45 = vadd.f32 %v7156_v13, %v1268_v53 }
 0x18d   : > { %v1517_v63 = vadd.f32 %v7144_v5, %v1260_v0 }
 0x18f   : > { %v5529_v6 = vpop.f32.mrb[44].mxu0 }
 0x190   : > { %v1281_v12 = vadd.f32 %v5529_v6, %v7172_v8  ;;  %v1272_v15 = vpop.f32.mrb[45].mxu0 }
 0x191   : > { %v1273_v30 = vadd.f32 %v7160_v40, %v1272_v15  ;;  %v5530_v21 = vpop.f32.mrb[46].mxu0 }
 0x192   : > { %v7267_v61 = vadd.f32 %v7176_v58, %v1281_v12  ;;  %v1284_v38 = vadd.f32 %v5530_v21, %v7174_v36  ;;  %v1275_v60 = vpop.f32.mrb[47].mxu0 }
 0x193   : > { %v7271_v26 = vadd.f32 %v7164_v51, %v1273_v30  ;;  %v1276_v49 = vadd.f32 %v7162_v19, %v1275_v60 }
 0x194   : > { %v7275_v5 = vadd.f32 %v7180_v39, %v1284_v38 }
 0x195   : > { %v7278_v13 = vadd.f32 %v7168_v59, %v1276_v49 }
 0x197   : > { %v5533_v8 = vpop.f32.mrb[48].mxu0 }
 0x198   : > { %v1297_v40 = vadd.f32 %v5533_v8, %v7196_v32  ;;  %v1288_v37 = vpop.f32.mrb[49].mxu0 }
 0x199   : > { %v1289_v58 = vadd.f32 %v7184_v16, %v1288_v37  ;;  %v5534_v47 = vpop.f32.mrb[50].mxu0 }
 0x19a   : > { %v7283_v36 = vadd.f32 %v7200_v25, %v1297_v40  ;;  %v1300_v51 = vadd.f32 %v5534_v47, %v7198_v35  ;;  %v1291_v55 = vpop.f32.mrb[51].mxu0 }
 0x19b   : > { %v7287_v19 = vadd.f32 %v7188_v10, %v1289_v58  ;;  %v1292_v39 = vadd.f32 %v7186_v41, %v1291_v55 }
 0x19c   : > { %v7291_v59 = vadd.f32 %v7204_v52, %v1300_v51 }
 0x19d   : > { %v7294_v32 = vadd.f32 %v7192_v17, %v1292_v39 }
 0x19f   : > { %v5537_v53 = vpop.f32.mrb[52].mxu0 }
 0x1a0   : > { %v1313_v16 = vadd.f32 %v5537_v53, %v7220_v14  ;;  %v1304_v24 = vpop.f32.mrb[53].mxu0 }
 0x1a1   : > { %v1305_v25 = vadd.f32 %v7208_v56, %v1304_v24  ;;  %v5538_v0 = vpop.f32.mrb[54].mxu0 }
 0x1a2   : > { %v7299_v35 = vadd.f32 %v7224_v31, %v1313_v16  ;;  %v1316_v10 = vadd.f32 %v5538_v0, %v7222_v20  ;;  %v1307_v6 = vpop.f32.mrb[55].mxu0 }
 0x1a3   : > { %v7303_v41 = vadd.f32 %v7212_v27, %v1305_v25  ;;  %v1308_v52 = vadd.f32 %v7210_v46, %v1307_v6 }
 0x1a4   : > { %v7307_v17 = vadd.f32 %v7228_v57, %v1316_v10 }
 0x1a5   : > { %v7310_v14 = vadd.f32 %v7216_v1, %v1308_v52 }
 0x1a7   : > { %v5541_v12 = vpop.f32.mrb[56].mxu0 }
 0x1a8   : > { %v1329_v56 = vadd.f32 %v5541_v12, %v7244_v9  ;;  %v1320_v15 = vpop.f32.mrb[57].mxu0 }
 0x1a9   : > { %v1321_v31 = vadd.f32 %v7232_v2, %v1320_v15  ;;  %v5542_v30 = vpop.f32.mrb[58].mxu0 }
 0x1aa   : > { %v7314_v20 = vadd.f32 %v5151_v33, %v1329_v56  ;;  %v1332_v27 = vadd.f32 %v5542_v30, %v7246_v50  ;;  %v1323_v21 = vpop.f32.mrb[59].mxu0 }
 0x1ab   : > { %v7318_v46 = vadd.f32 %v7236_v44, %v1321_v31  ;;  %v1324_v57 = vadd.f32 %v7234_v43, %v1323_v21  ;;  %v7329_v44 = vld [vmem:[%s8017_s3] ss:$0 sm:$0xff] }
 0x1ac   : > { %v7321_v38 = vadd.f32 %v5154_v4, %v1332_v27 }
 0x1ad   : > { %v7324_v1 = vadd.f32 %v7240_v22, %v1324_v57 }
 0x1af   : > { %v5189_v9 = vpop.f32.mrb[60].mxu0 }
 0x1b0   : > { %v5190_v60 = vpop.f32.mrb[61].mxu0 }
 0x1b1   : > { %v5191_v49 = vadd.f32 %v5190_v60, %v5189_v9  ;;  %v5192_v2 = vpop.f32.mrb[62].mxu0  ;;  %v5597_v8 = vpop.f32.mrb[40].mxu1 }
 0x1b2   : > { %v5193_v33 = vpop.f32.mrb[63].mxu0  ;;  %v2045_v37 = vpop.f32.mrb[41].mxu1 }
 0x1b3   : > { %v5194_v40 = vadd.f32 %v5193_v33, %v5192_v2  ;;  %v5717_v50 = vadd.f32 %v5191_v49, %v1514_v3  ;;  %v5598_v43 = vpop.f32.mrb[42].mxu1  ;;  %v2520_v33 = vld [vmem:[#allocation2] sm:$0xf] }
 0x1b4   : > { %v2048_v58 = vpop.f32.mrb[43].mxu1 }
 0x1b5   : > { %v5718_v4 = vadd.f32 %v5717_v50, %v2045_v37  ;;  %v5725_v47 = vadd.f32 %v5194_v40, %v1517_v63 }
 0x1b7   : > { %v2151_v22 = vadd.f32 %v5718_v4, %v7329_v44  ;;  %v5726_v51 = vadd.f32 %v5725_v47, %v2048_v58  ;;  %v5195_v55 = vpop.f32.mrb[64].mxu0 }
 0x1b8   : > { %v5196_v39 = vpop.f32.mrb[65].mxu0 }
 0x1b9   : > { %v2171_v53 = vmax.f32 %v2151_v22, 0.0  ;;  %v2152_v16 = vadd.f32 %v5726_v51, %v7329_v44  ;;  %v5197_v24 = vadd.f32 %v5196_v39, %v5195_v55  ;;  %v5198_v25 = vpop.f32.mrb[66].mxu0  ;;  %v7333_v3 = vpop.f32.mrb[44].mxu1  ;;  %v2524_v51 = vld [vmem:[#allocation2 + $0x8] sm:$0x1] }
 0x1ba   : > { %v5199_v0 = vpop.f32.mrb[67].mxu0  ;;  %v2061_v56 = vpop.f32.mrb[45].mxu1 }
 0x1bb   : > { %v4901_v10 = vpack.c.bf16 %v2171_v53, %v2171_v53  ;;  %v2172_v6 = vmax.f32 %v2152_v16, 0.0  ;;  %v5713_v52 = vadd.f32 %v5197_v24, %v7255_v48  ;;  %v5200_v12 = vadd.f32 %v5199_v0, %v5198_v25  ;;  %v7336_v63 = vpop.f32.mrb[46].mxu1 }
 0x1bc   : > { %v2064_v27 = vpop.f32.mrb[47].mxu1  ;;  %v6277_v48 = vmov (!%p4762_p8), 0  }
 0x1bd   : > { %v2319_v15 = vshrl.u32 %v4901_v10, 16  ;;  %v4902_v31 = vpack.c.bf16 %v2172_v6, %v2172_v6  ;;  %v5714_v30 = vadd.f32 %v5713_v52, %v5597_v8  ;;  %v5721_v21 = vadd.f32 %v5200_v12, %v7261_v45 }
 0x1be   : > { %v2322_v9 = vshll.u32 %v4901_v10, 16 }
 0x1bf   : > { %v2321_v57 = vrot.slane %v2319_v15, 7  ;;  %v2327_v60 = vshrl.u32 %v4902_v31, 16  ;;  %v2153_v49 = vadd.f32 %v5714_v30, %v7329_v44  ;;  %v5201_v2 = vpop.f32.mrb[68].mxu0  ;;  %v5722_v40 = vadd.f32 %v5721_v21, %v5598_v43 }
 0x1c0   : > { %v5202_v37 = vpop.f32.mrb[69].mxu0  ;;  %v2330_v4 = vshll.u32 %v4902_v31, 16 }
 0x1c1   : > { %v2324_v50 = vor.u32 %v2322_v9, %v2321_v57  ;;  %v2329_v8 = vrot.slane %v2327_v60, 7  ;;  %v2173_v58 = vmax.f32 %v2153_v49, 0.0  ;;  %v5204_v47 = vpop.f32.mrb[70].mxu0  ;;  %v2325_v45 = vrot.slane %v2321_v57, 4  ;;  %v7352_v53 = vpop.f32.mrb[48].mxu1 }
 0x1c2   : > { %v2154_v55 = vadd.f32 %v5722_v40, %v7329_v44  ;;  %v5203_v39 = vadd.f32 %v5202_v37, %v5201_v2  ;;  %v5205_v43 = vpop.f32.mrb[71].mxu0  ;;  %v7356_v10 = vpop.f32.mrb[49].mxu1  ;;  %v2527_v40 = vld [vmem:[#allocation2 + $0xc] sm:$0xf] }
 0x1c3   : > { %v2521_v16 = vsel %vm7341_vm13, %v2324_v50, %v2520_v33  ;;  %v2332_v24 = vor.u32 %v2330_v4, %v2329_v8  ;;  %v2334_v25 = vrot.slane %v2329_v8, 4  ;;  %v4903_v0 = vpack.c.bf16 %v2173_v58, %v2173_v58  ;;  %v7359_v15 = vpop.f32.mrb[50].mxu1 }
 0x1c4   : > { %2522 = vst [vmem:[#allocation2] sm:$0xf] %v2521_v16  ;;  %v2174_v6 = vmax.f32 %v2154_v55, 0.0  ;;  %v5733_v52 = vadd.f32 %v5203_v39, %v7271_v26  ;;  %v5206_v12 = vadd.f32 %v5205_v43, %v5204_v47  ;;  %v7365_v57 = vpop.f32.mrb[51].mxu1 }
 0x1c5   : > { %v2333_v31 = vsel %vm7347_vm14, %v2325_v45, %v2332_v24  ;;  %v2525_v30 = vsel %vm7131_vm8, %v2334_v25, %v2524_v51  ;;  %v2336_v21 = vshrl.u32 %v4903_v0, 16  ;;  %v2339_v26 = vshll.u32 %v4903_v0, 16  ;;  %v2531_v25 = vld [vmem:[#allocation2 + $0x14] sm:$0x1]  ;;  %2594 = vst [vmem:[#allocation2] sm:$0xf] (!%p4762_p8), %v6277_v48 }
 0x1c6   : > { %2523 = vst [vmem:[#allocation2 + $0x4] sm:$0xf] %v2333_v31  ;;  %2526 = vst [vmem:[#allocation2 + $0x8] sm:$0x1] %v2525_v30  ;;  %v4904_v9 = vpack.c.bf16 %v2174_v6, %v2174_v6  ;;  %v5734_v60 = vadd.f32 %v5733_v52, %v2061_v56  ;;  %v5741_v49 = vadd.f32 %v5206_v12, %v7278_v13 }
 0x1c7   : > { %v2338_v2 = vrot.slane %v2336_v21, 7  ;;  %v5207_v33 = vpop.f32.mrb[72].mxu0  ;;  %2595 = vst [vmem:[#allocation2 + $0x4] sm:$0xf] (!%p4762_p8), %v6277_v48  ;;  %2596 = vst [vmem:[#allocation2 + $0x8] sm:$0x1] (!%p4762_p8), %v6277_v48 }
 0x1c8   : > { %v2344_v37 = vshrl.u32 %v4904_v9, 16  ;;  %v2155_v50 = vadd.f32 %v5734_v60, %v7329_v44  ;;  %v5742_v8 = vadd.f32 %v5741_v49, %v2064_v27  ;;  %v5208_v4 = vpop.f32.mrb[73].mxu0  ;;  %v2347_v55 = vshll.u32 %v4904_v9, 16 }
 0x1c9   : > { %v2341_v58 = vor.u32 %v2339_v26, %v2338_v2  ;;  %v5209_v47 = vadd.f32 %v5208_v4, %v5207_v33  ;;  %v5210_v45 = vpop.f32.mrb[74].mxu0  ;;  %v7370_v56 = vpop.f32.mrb[52].mxu1  ;;  %v2342_v16 = vrot.slane %v2338_v2, 4  ;;  %v2534_v4 = vld [vmem:[#allocation2 + $0x18] sm:$0xf] }
 0x1ca   : > { %v2346_v51 = vrot.slane %v2344_v37, 7  ;;  %v2175_v39 = vmax.f32 %v2155_v50, 0.0  ;;  %v2156_v43 = vadd.f32 %v5742_v8, %v7329_v44  ;;  %v5211_v13 = vpop.f32.mrb[75].mxu0  ;;  %v7375_v6 = vpop.f32.mrb[53].mxu1 }
 0x1cb   : > { %v2528_v24 = vsel %vm7341_vm13, %v2341_v58, %v2527_v40  ;;  %v5729_v0 = vadd.f32 %v5209_v47, %v7267_v61  ;;  %v5212_v27 = vadd.f32 %v5211_v13, %v5210_v45  ;;  %v7377_v21 = vpop.f32.mrb[54].mxu1 }
 0x1cc   : > { %2529 = vst [vmem:[#allocation2 + $0xc] sm:$0xf] %v2528_v24  ;;  %v2349_v52 = vor.u32 %v2347_v55, %v2346_v51  ;;  %v2351_v12 = vrot.slane %v2346_v51, 4  ;;  %v4905_v31 = vpack.c.bf16 %v2175_v39, %v2175_v39  ;;  %v2176_v30 = vmax.f32 %v2156_v43, 0.0  ;;  %v7381_v49 = vpop.f32.mrb[55].mxu1 }
 0x1cd   : > { %v5730_v9 = vadd.f32 %v5729_v0, %v7333_v3  ;;  %v5737_v60 = vadd.f32 %v5212_v27, %v7275_v5 }
 0x1ce   : > { %v2350_v2 = vsel %vm7347_vm14, %v2342_v16, %v2349_v52  ;;  %v2532_v61 = vsel %vm7131_vm8, %v2351_v12, %v2531_v25  ;;  %v2353_v26 = vshrl.u32 %v4905_v31, 16  ;;  %v4906_v33 = vpack.c.bf16 %v2176_v30, %v2176_v30  ;;  %v2538_v12 = vld [vmem:[#allocation2 + $0x20] sm:$0x1] }
 0x1cf   : > { %2530 = vst [vmem:[#allocation2 + $0x10] sm:$0xf] %v2350_v2  ;;  %2533 = vst [vmem:[#allocation2 + $0x14] sm:$0x1] %v2532_v61  ;;  %v2157_v40 = vadd.f32 %v5730_v9, %v7329_v44  ;;  %v5738_v37 = vadd.f32 %v5737_v60, %v7336_v63  ;;  %v5213_v50 = vpop.f32.mrb[76].mxu0  ;;  %v2356_v8 = vshll.u32 %v4905_v31, 16 }
 0x1d0   : > { %v2355_v3 = vrot.slane %v2353_v26, 7  ;;  %v5214_v5 = vpop.f32.mrb[77].mxu0  ;;  %v2361_v58 = vshrl.u32 %v4906_v33, 16  ;;  %v2364_v39 = vshll.u32 %v4906_v33, 16 }
 0x1d1   : > { %v2177_v47 = vmax.f32 %v2157_v40, 0.0  ;;  %v2158_v45 = vadd.f32 %v5738_v37, %v7329_v44  ;;  %v5216_v51 = vpop.f32.mrb[78].mxu0  ;;  %v5215_v43 = vadd.f32 %v5214_v5, %v5213_v50  ;;  %v7390_v13 = vpop.f32.mrb[56].mxu1 }
 0x1d2   : > { %v2358_v55 = vor.u32 %v2356_v8, %v2355_v3  ;;  %v5217_v16 = vpop.f32.mrb[79].mxu0  ;;  %v2363_v24 = vrot.slane %v2361_v58, 7  ;;  %v7392_v27 = vpop.f32.mrb[57].mxu1  ;;  %v2359_v9 = vrot.slane %v2355_v3, 4 }
 0x1d3   : > { %v4907_v25 = vpack.c.bf16 %v2177_v47, %v2177_v47  ;;  %v2178_v0 = vmax.f32 %v2158_v45, 0.0  ;;  %v5218_v63 = vadd.f32 %v5217_v16, %v5216_v51  ;;  %v5749_v31 = vadd.f32 %v5215_v43, %v7287_v19  ;;  %v7397_v30 = vpop.f32.mrb[58].mxu1 }
 0x1d4   : > { %v2535_v52 = vsel %vm7341_vm13, %v2358_v55, %v2534_v4  ;;  %v2366_v60 = vor.u32 %v2364_v39, %v2363_v24  ;;  %v2368_v2 = vrot.slane %v2363_v24, 4  ;;  %v7399_v26 = vpop.f32.mrb[59].mxu1  ;;  %v2541_v4 = vld [vmem:[#allocation2 + $0x24] sm:$0xf] }
 0x1d5   : > { %2536 = vst [vmem:[#allocation2 + $0x18] sm:$0xf] %v2535_v52  ;;  %v2370_v61 = vshrl.u32 %v4907_v25, 16  ;;  %v4908_v33 = vpack.c.bf16 %v2178_v0, %v2178_v0  ;;  %v5750_v40 = vadd.f32 %v5749_v31, %v7356_v10  ;;  %v5757_v37 = vadd.f32 %v5218_v63, %v7294_v32  ;;  %v2545_v52 = vld [vmem:[#allocation2 + $0x2c] sm:$0x1] }
 0x1d6   : > { %v2367_v50 = vsel %vm7347_vm14, %v2359_v9, %v2366_v60  ;;  %v2539_v19 = vsel %vm7131_vm8, %v2368_v2, %v2538_v12  ;;  %v2373_v5 = vshll.u32 %v4907_v25, 16 }
 0x1d7   : > { %v2372_v8 = vrot.slane %v2370_v61, 7  ;;  %v5219_v3 = vpop.f32.mrb[80].mxu0  ;;  %2537 = vst [vmem:[#allocation2 + $0x1c] sm:$0xf] %v2367_v50  ;;  %2540 = vst [vmem:[#allocation2 + $0x20] sm:$0x1] %v2539_v19  ;;  %v2159_v47 = vadd.f32 %v5750_v40, %v7329_v44  ;;  %v5758_v45 = vadd.f32 %v5757_v37, %v7365_v57 }
 0x1d8   : > { %v2378_v58 = vshrl.u32 %v4908_v33, 16  ;;  %v5220_v10 = vpop.f32.mrb[81].mxu0  ;;  %v2381_v43 = vshll.u32 %v4908_v33, 16 }
 0x1d9   : > { %v2375_v51 = vor.u32 %v2373_v5, %v2372_v8  ;;  %v5221_v32 = vadd.f32 %v5220_v10, %v5219_v3  ;;  %v5222_v55 = vpop.f32.mrb[82].mxu0  ;;  %v2179_v16 = vmax.f32 %v2159_v47, 0.0  ;;  %v2160_v24 = vadd.f32 %v5758_v45, %v7329_v44 }
 0x1da   : > { %v2380_v39 = vrot.slane %v2378_v58, 7  ;;  %v5223_v0 = vpop.f32.mrb[83].mxu0  ;;  %v2376_v25 = vrot.slane %v2372_v8, 4  ;;  %v2548_v58 = vld [vmem:[#allocation2 + $0x30] sm:$0xf] }
 0x1db   : > { %v2542_v63 = vsel %vm7341_vm13, %v2375_v51, %v2541_v4  ;;  %v5745_v12 = vadd.f32 %v5221_v32, %v7283_v36  ;;  %v5224_v31 = vadd.f32 %v5223_v0, %v5222_v55  ;;  %v4909_v60 = vpack.c.bf16 %v2179_v16, %v2179_v16 }
 0x1dc   : > { %2543 = vst [vmem:[#allocation2 + $0x24] sm:$0xf] %v2542_v63  ;;  %v2383_v57 = vor.u32 %v2381_v43, %v2380_v39  ;;  %v2385_v9 = vrot.slane %v2380_v39, 4  ;;  %v2180_v2 = vmax.f32 %v2160_v24, 0.0 }
 0x1dd   : > { %v5746_v61 = vadd.f32 %v5745_v12, %v7352_v53  ;;  %v5753_v33 = vadd.f32 %v5224_v31, %v7291_v59  ;;  %v2387_v50 = vshrl.u32 %v4909_v60, 16  ;;  %v2390_v4 = vshll.u32 %v4909_v60, 16 }
 0x1de   : > { %v2384_v40 = vsel %vm7347_vm14, %v2376_v25, %v2383_v57  ;;  %v2546_v37 = vsel %vm7131_vm8, %v2385_v9, %v2545_v52  ;;  %v4910_v36 = vpack.c.bf16 %v2180_v2, %v2180_v2  ;;  %v2552_v25 = vld [vmem:[#allocation2 + $0x38] sm:$0x1] }
 0x1df   : > { %2544 = vst [vmem:[#allocation2 + $0x28] sm:$0xf] %v2384_v40  ;;  %2547 = vst [vmem:[#allocation2 + $0x2c] sm:$0x1] %v2546_v37  ;;  %v2161_v19 = vadd.f32 %v5746_v61, %v7329_v44  ;;  %v5754_v8 = vadd.f32 %v5753_v33, %v7359_v15  ;;  %v5225_v5 = vpop.f32.mrb[84].mxu0  ;;  %v2389_v3 = vrot.slane %v2387_v50, 7 }
 0x1e0   : > { %v5226_v53 = vpop.f32.mrb[85].mxu0  ;;  %v2395_v59 = vshrl.u32 %v4910_v36, 16  ;;  %v2398_v32 = vshll.u32 %v4910_v36, 16 }
 0x1e1   : > { %v2181_v47 = vmax.f32 %v2161_v19, 0.0  ;;  %v2162_v45 = vadd.f32 %v5754_v8, %v7329_v44  ;;  %v5228_v10 = vpop.f32.mrb[86].mxu0  ;;  %v2392_v51 = vor.u32 %v2390_v4, %v2389_v3  ;;  %v5227_v55 = vadd.f32 %v5226_v53, %v5225_v5 }
 0x1e2   : > { %v5229_v39 = vpop.f32.mrb[87].mxu0  ;;  %v2397_v43 = vrot.slane %v2395_v59, 7  ;;  %v2393_v52 = vrot.slane %v2389_v3, 4 }
 0x1e3   : > { %v4911_v16 = vpack.c.bf16 %v2181_v47, %v2181_v47  ;;  %v2182_v24 = vmax.f32 %v2162_v45, 0.0  ;;  %v5230_v0 = vadd.f32 %v5229_v39, %v5228_v10  ;;  %v2549_v15 = vsel %vm7341_vm13, %v2392_v51, %v2548_v58  ;;  %v2559_v51 = vld [vmem:[#allocation2 + $0x44] sm:$0x1] }
 0x1e4   : > { %v5765_v63 = vadd.f32 %v5227_v55, %v7303_v41  ;;  %2550 = vst [vmem:[#allocation2 + $0x30] sm:$0xf] %v2549_v15  ;;  %v2400_v12 = vor.u32 %v2398_v32, %v2397_v43  ;;  %v2402_v31 = vrot.slane %v2397_v43, 4  ;;  %v2555_v41 = vld [vmem:[#allocation2 + $0x3c] sm:$0xf] }
 0x1e5   : > { %v2404_v57 = vshrl.u32 %v4911_v16, 16  ;;  %v4912_v9 = vpack.c.bf16 %v2182_v24, %v2182_v24  ;;  %v5773_v2 = vadd.f32 %v5230_v0, %v7310_v14  ;;  %v2407_v37 = vshll.u32 %v4911_v16, 16 }
 0x1e6   : > { %v5766_v60 = vadd.f32 %v5765_v63, %v7375_v6  ;;  %v2401_v61 = vsel %vm7347_vm14, %v2393_v52, %v2400_v12  ;;  %v2553_v33 = vsel %vm7131_vm8, %v2402_v31, %v2552_v25 }
 0x1e7   : > { %v2406_v40 = vrot.slane %v2404_v57, 7  ;;  %v5231_v50 = vpop.f32.mrb[88].mxu0  ;;  %2551 = vst [vmem:[#allocation2 + $0x34] sm:$0xf] %v2401_v61  ;;  %2554 = vst [vmem:[#allocation2 + $0x38] sm:$0x1] %v2553_v33  ;;  %v5774_v8 = vadd.f32 %v5773_v2, %v7381_v49 }
 0x1e8   : > { %v2412_v36 = vshrl.u32 %v4912_v9, 16  ;;  %v2163_v19 = vadd.f32 %v5766_v60, %v7329_v44  ;;  %v5232_v6 = vpop.f32.mrb[89].mxu0  ;;  %v2415_v53 = vshll.u32 %v4912_v9, 16  ;;  %v2562_v60 = vld [vmem:[#allocation2 + $0x48] sm:$0xf] }
 0x1e9   : > { %v2409_v5 = vor.u32 %v2407_v37, %v2406_v40  ;;  %v5233_v14 = vadd.f32 %v5232_v6, %v5231_v50  ;;  %v5234_v3 = vpop.f32.mrb[90].mxu0  ;;  %v2164_v59 = vadd.f32 %v5774_v8, %v7329_v44  ;;  %v2410_v45 = vrot.slane %v2406_v40, 4 }
 0x1ea   : > { %v2414_v4 = vrot.slane %v2412_v36, 7  ;;  %v2183_v58 = vmax.f32 %v2163_v19, 0.0  ;;  %v5235_v47 = vpop.f32.mrb[91].mxu0 }
 0x1eb   : > { %v2556_v10 = vsel %vm7341_vm13, %v2409_v5, %v2555_v41  ;;  %v5761_v32 = vadd.f32 %v5233_v14, %v7299_v35  ;;  %v5236_v55 = vadd.f32 %v5235_v47, %v5234_v3  ;;  %v2184_v16 = vmax.f32 %v2164_v59, 0.0  ;;  %v2566_v5 = vld [vmem:[#allocation2 + $0x50] sm:$0x1] }
 0x1ec   : > { %2557 = vst [vmem:[#allocation2 + $0x3c] sm:$0xf] %v2556_v10  ;;  %v2417_v49 = vor.u32 %v2415_v53, %v2414_v4  ;;  %v2419_v39 = vrot.slane %v2414_v4, 4  ;;  %v4913_v43 = vpack.c.bf16 %v2183_v58, %v2183_v58 }
 0x1ed   : > { %v5762_v24 = vadd.f32 %v5761_v32, %v7370_v56  ;;  %v5769_v0 = vadd.f32 %v5236_v55, %v7307_v17  ;;  %v4914_v35 = vpack.c.bf16 %v2184_v16, %v2184_v16 }
 0x1ee   : > { %v2418_v15 = vsel %vm7347_vm14, %v2410_v45, %v2417_v49  ;;  %v2560_v25 = vsel %vm7131_vm8, %v2419_v39, %v2559_v51  ;;  %v2421_v63 = vshrl.u32 %v4913_v43, 16  ;;  %v2424_v9 = vshll.u32 %v4913_v43, 16 }
 0x1ef   : > { %2558 = vst [vmem:[#allocation2 + $0x40] sm:$0xf] %v2418_v15  ;;  %2561 = vst [vmem:[#allocation2 + $0x44] sm:$0x1] %v2560_v25  ;;  %v2165_v52 = vadd.f32 %v5762_v24, %v7329_v44  ;;  %v5770_v12 = vadd.f32 %v5769_v0, %v7377_v21  ;;  %v5237_v31 = vpop.f32.mrb[92].mxu0  ;;  %v2429_v17 = vshrl.u32 %v4914_v35, 16 }
 0x1f0   : > { %v2423_v57 = vrot.slane %v2421_v63, 7  ;;  %v5238_v56 = vpop.f32.mrb[93].mxu0  ;;  %v2432_v37 = vshll.u32 %v4914_v35, 16 }
 0x1f1   : > { %v2185_v2 = vmax.f32 %v2165_v52, 0.0  ;;  %v2166_v61 = vadd.f32 %v5770_v12, %v7329_v44  ;;  %v5240_v33 = vpop.f32.mrb[94].mxu0  ;;  %v5239_v50 = vadd.f32 %v5238_v56, %v5237_v31  ;;  %v2431_v36 = vrot.slane %v2429_v17, 7 }
 0x1f2   : > { %v2426_v40 = vor.u32 %v2424_v9, %v2423_v57  ;;  %v5241_v41 = vpop.f32.mrb[95].mxu0  ;;  %v2427_v3 = vrot.slane %v2423_v57, 4  ;;  %v2573_v57 = vld [vmem:[#allocation2 + $0x5c] sm:$0x1] }
 0x1f3   : > { %v4915_v19 = vpack.c.bf16 %v2185_v2, %v2185_v2  ;;  %v2186_v8 = vmax.f32 %v2166_v61, 0.0  ;;  %v5242_v6 = vadd.f32 %v5241_v41, %v5240_v33  ;;  %v5781_v14 = vadd.f32 %v5239_v50, %v7318_v46  ;;  %v2569_v46 = vld [vmem:[#allocation2 + $0x54] sm:$0xf] }
 0x1f4   : > { %v2563_v21 = vsel %vm7341_vm13, %v2426_v40, %v2562_v60  ;;  %v2434_v4 = vor.u32 %v2432_v37, %v2431_v36  ;;  %v2436_v53 = vrot.slane %v2431_v36, 4 }
 0x1f5   : > { %2564 = vst [vmem:[#allocation2 + $0x48] sm:$0xf] %v2563_v21  ;;  %v2438_v58 = vshrl.u32 %v4915_v19, 16  ;;  %v4916_v59 = vpack.c.bf16 %v2186_v8, %v2186_v8  ;;  %v5782_v47 = vadd.f32 %v5781_v14, %v7392_v27  ;;  %v5789_v45 = vadd.f32 %v5242_v6, %v7324_v1  ;;  %v2576_v6 = vld [vmem:[#allocation2 + $0x60] sm:$0xf] }
 0x1f6   : > { %v2435_v10 = vsel %vm7347_vm14, %v2427_v3, %v2434_v4  ;;  %v2567_v51 = vsel %vm7131_vm8, %v2436_v53, %v2566_v5  ;;  %v2441_v55 = vshll.u32 %v4915_v19, 16 }
 0x1f7   : > { %v2440_v32 = vrot.slane %v2438_v58, 7  ;;  %v5243_v49 = vpop.f32.mrb[96].mxu0  ;;  %2565 = vst [vmem:[#allocation2 + $0x4c] sm:$0xf] %v2435_v10  ;;  %2568 = vst [vmem:[#allocation2 + $0x50] sm:$0x1] %v2567_v51  ;;  %v2167_v43 = vadd.f32 %v5782_v47, %v7329_v44  ;;  %v5790_v16 = vadd.f32 %v5789_v45, %v7399_v26 }
 0x1f8   : > { %v2446_v39 = vshrl.u32 %v4916_v59, 16  ;;  %v5244_v27 = vpop.f32.mrb[97].mxu0  ;;  %v2449_v25 = vshll.u32 %v4916_v59, 16  ;;  %v2580_v59 = vld [vmem:[#allocation2 + $0x68] sm:$0x1] }
 0x1f9   : > { %v2443_v24 = vor.u32 %v2441_v55, %v2440_v32  ;;  %v5245_v1 = vadd.f32 %v5244_v27, %v5243_v49  ;;  %v5246_v0 = vpop.f32.mrb[98].mxu0  ;;  %v2187_v63 = vmax.f32 %v2167_v43, 0.0  ;;  %v2168_v35 = vadd.f32 %v5790_v16, %v7329_v44 }
 0x1fa   : > { %v2448_v15 = vrot.slane %v2446_v39, 7  ;;  %v5247_v52 = vpop.f32.mrb[99].mxu0  ;;  %v2444_v12 = vrot.slane %v2440_v32, 4 }
 0x1fb   : > { %v2570_v31 = vsel %vm7341_vm13, %v2443_v24, %v2569_v46  ;;  %v5777_v9 = vadd.f32 %v5245_v1, %v7314_v20  ;;  %v5248_v56 = vadd.f32 %v5247_v52, %v5246_v0  ;;  %v4917_v17 = vpack.c.bf16 %v2187_v63, %v2187_v63  ;;  %v2583_v46 = vld [vmem:[#allocation2 + $0x6c] sm:$0xf]  ;;  %v2587_v1 = vld [vmem:[#allocation2 + $0x74] sm:$0x1] }
 0x1fc   : > { %2571 = vst [vmem:[#allocation2 + $0x54] sm:$0xf] %v2570_v31  ;;  %v2451_v26 = vor.u32 %v2449_v25, %v2448_v15  ;;  %v2453_v60 = vrot.slane %v2448_v15, 4  ;;  %v2188_v2 = vmax.f32 %v2168_v35, 0.0 }
 0x1fd   : > { %v5778_v61 = vadd.f32 %v5777_v9, %v7390_v13  ;;  %v5785_v33 = vadd.f32 %v5248_v56, %v7321_v38  ;;  %v2455_v50 = vshrl.u32 %v4917_v17, 16  ;;  %v2458_v8 = vshll.u32 %v4917_v17, 16 }
 0x1fe   : > { %v2452_v40 = vsel %vm7347_vm14, %v2444_v12, %v2451_v26  ;;  %v2574_v37 = vsel %vm7131_vm8, %v2453_v60, %v2573_v57  ;;  %v4918_v20 = vpack.c.bf16 %v2188_v2, %v2188_v2 }
 0x1ff   : > { %2572 = vst [vmem:[#allocation2 + $0x58] sm:$0xf] %v2452_v40  ;;  %2575 = vst [vmem:[#allocation2 + $0x5c] sm:$0x1] %v2574_v37  ;;  %v2169_v41 = vadd.f32 %v5778_v61, %v7329_v44  ;;  %v5786_v36 = vadd.f32 %v5785_v33, %v7397_v30  ;;  %v2457_v19 = vrot.slane %v2455_v50, 7 }
 0x200   : > { %v2463_v13 = vshrl.u32 %v4918_v20, 16  ;;  %v2466_v3 = vshll.u32 %v4918_v20, 16 }
 0x201   : > { %v2189_v21 = vmax.f32 %v2169_v41, 0.0  ;;  %v2170_v38 = vadd.f32 %v5786_v36, %v7329_v44  ;;  %v2460_v5 = vor.u32 %v2458_v8, %v2457_v19  ;;  %v2461_v47 = vrot.slane %v2457_v19, 4 }
 0x202   : > { %v2465_v14 = vrot.slane %v2463_v13, 7 }
 0x203   : > { %v4919_v4 = vpack.c.bf16 %v2189_v21, %v2189_v21  ;;  %v2190_v53 = vmax.f32 %v2170_v38, 0.0  ;;  %v2577_v58 = vsel %vm7341_vm13, %v2460_v5, %v2576_v6 }
 0x204   : > { %2578 = vst [vmem:[#allocation2 + $0x60] sm:$0xf] %v2577_v58  ;;  %v2468_v45 = vor.u32 %v2466_v3, %v2465_v14  ;;  %v2470_v30 = vrot.slane %v2465_v14, 4 }
 0x205   : > { %v2472_v10 = vshrl.u32 %v4919_v4, 16  ;;  %v4920_v51 = vpack.c.bf16 %v2190_v53, %v2190_v53  ;;  %v2475_v49 = vshll.u32 %v4919_v4, 16 }
 0x206   : > { %v2469_v32 = vsel %vm7347_vm14, %v2461_v47, %v2468_v45  ;;  %v2581_v44 = vsel %vm7131_vm8, %v2470_v30, %v2580_v59 }
 0x207   : > { %v2474_v55 = vrot.slane %v2472_v10, 7  ;;  %2579 = vst [vmem:[#allocation2 + $0x64] sm:$0xf] %v2469_v32  ;;  %2582 = vst [vmem:[#allocation2 + $0x68] sm:$0x1] %v2581_v44  ;;  %v2480_v39 = vshrl.u32 %v4920_v51, 16 }
 0x208   : > { %v2483_v27 = vshll.u32 %v4920_v51, 16  ;;  %2593 = sbr.rel (%p4762_p8) target bundleno = 527 (0x20f), region = 48 }
 0x209   : > { %v2477_v43 = vor.u32 %v2475_v49, %v2474_v55  ;;  %v2482_v16 = vrot.slane %v2480_v39, 7  ;;  %v2478_v0 = vrot.slane %v2474_v55, 4 }
 0x20b   : > { %v2584_v24 = vsel %vm7341_vm13, %v2477_v43, %v2583_v46  ;;  %v2485_v15 = vor.u32 %v2483_v27, %v2482_v16  ;;  %v2487_v25 = vrot.slane %v2482_v16, 4 }
 0x20c   : > { %2585 = vst [vmem:[#allocation2 + $0x6c] sm:$0xf] %v2584_v24 }
 0x20d   : > { %v2486_v63 = vsel %vm7347_vm14, %v2478_v0, %v2485_v15  ;;  %v2588_v35 = vsel %vm7131_vm8, %v2487_v25, %v2587_v1 }
 0x20e   : > { %2586 = vst [vmem:[#allocation2 + $0x70] sm:$0xf] %v2486_v63  ;;  %2589 = vst [vmem:[#allocation2 + $0x74] sm:$0x1] %v2588_v35 }
 0x20f PF: > { %p4763_p10 = scmp.ne.s32.totalorder %s6256_s21, 1 }
 0x210   : > { %v6278_v22 = vmov (!%p4763_p10), 0  }
 0x211   : > { %2600 = sbr.rel (%p4763_p10) target bundleno = 536 (0x218), region = 52  ;;  %2602 = vst [vmem:[#allocation2 + $0x6c] sm:$0xf] (!%p4763_p10), %v6278_v22  ;;  %2603 = vst [vmem:[#allocation2 + $0x70] sm:$0xf] (!%p4763_p10), %v6278_v22 }
 0x212   : > { %2604 = vst [vmem:[#allocation2 + $0x74] sm:$0x1] (!%p4763_p10), %v6278_v22 }
 0x218 PF: > { %v6064_v34 = vld [vmem:[#allocation3 + $0x100] sm:$0xff]   ;;  %v6067_v31 = vld [vmem:[#allocation3 + $0x108] sm:$0xff]   ;;  %v6070_v56 = vld [vmem:[#allocation3 + $0x110] sm:$0xff]   ;;  %s4937_s12 = sshll.u32 %s6256_s21, 4  ;;  %s4896_s26 = sshll.u32 %s6260_s22, 5 }
 0x219   : > { %v6065_v52 = vld [vmem:[#allocation3 + $0x140] sm:$0xff]   ;;  %5267 = vmatprep.subr.bf16.mxu0 %v6064_v34  ;;  %v6068_v57 = vld [vmem:[#allocation3 + $0x148] sm:$0xff]   ;;  %v6071_v26 = vld [vmem:[#allocation3 + $0x150] sm:$0xff]   ;;  %s4420_s21 = sadd.s32 %s4937_s12, %s4896_s26  ;;  %s4423_s27 = sshll.u32 %s7483_s11, 4  ;;  %s7956_s27 = int_to_ptr.vmem [resolvable:$true] %s4423_s27 }
 0x21a   : > { %v6066_v12 = vld [vmem:[#allocation3 + $0xc0] sm:$0xff]   ;;  %5615 = vmatprep.subr.bf16.mxu1 %v6065_v52  ;;  %v6069_v9 = vld [vmem:[#allocation3 + $0xc8] sm:$0xff]   ;;  %v6072_v60 = vld [vmem:[#allocation3 + $0xd0] sm:$0xff]   ;;  %s4897_s22 = sshll.u32 %s4420_s21, 6  ;;  %s8072_s10 = sand.u32 1, %s6248_s19  }
 0x21b   : > { %5268 = vmatpush3.bf16.msra.mxu0 %v6066_v12  ;;  %5616 = vmatpush3.bf16.msra.mxu1 %v6065_v52  ;;  %v6073_v17 = vld [vmem:[#allocation3 + $0x118] sm:$0xff]   ;;  %v6076_v33 = vld [vmem:[#allocation3 + $0x120] sm:$0xff]   ;;  %v6079_v50 = vld [vmem:[#allocation3 + $0x128] sm:$0xff]   ;;  %s7954_s16 = scalar_lea.hbm %s8019_s5, %s4897_s22  ;;  %s7962_s2 = scalar_lea.sflag [#allocation5], %s8072_s10 }
 0x21c   : > { %5269 = vmatprep.subr.bf16.mxu0 %v6067_v31  ;;  %5617 = vmatprep.subr.bf16.mxu1 %v6068_v57  ;;  %v6074_v2 = vld [vmem:[#allocation3 + $0x158] sm:$0xff]   ;;  %v6077_v40 = vld [vmem:[#allocation3 + $0x160] sm:$0xff]   ;;  %v6080_v20 = vld [vmem:[#allocation3 + $0x168] sm:$0xff]   ;;  %s6174_s29 = scalar_lea.vmem %s7956_s27, 1024  ;;  %p8073_p0 = scmp.ne.s32.totalorder %s8030_s7, 0 }
 0x21d   : > { %v6075_v61 = vld [vmem:[#allocation3 + $0xd8] sm:$0xff]   ;;  %v6078_v37 = vld [vmem:[#allocation3 + $0xe0] sm:$0xff]   ;;  %v6081_v41 = vld [vmem:[#allocation3 + $0xe8] sm:$0xff]   ;;  %p6175_p12 = scmp.ne.s32.totalorder %s7956_s27, %s6174_s29  ;;  %s6279_s14 = smov [#allocation6]  }
 0x21e   : > { %v6082_v36 = vld [vmem:[#allocation3 + $0x130] sm:$0xff]   ;;  %v6085_v6 = vld [vmem:[#allocation3 + $0x138] sm:$0xff]   ;;  %v7487_v58 = vld [vmem:[#allocation2 + $0x18] sm:$0xf]  ;;  %s6178_s17 = sshll.u32 %s6279_s14, 4  ;;  %s6179_s17 = int_to_ptr.vmem [resolvable:$false] %s6178_s17 }
 0x21f   : > { %5270 = vmatpush3.bf16.msra.mxu0 %v6069_v9  ;;  %5618 = vmatpush3.bf16.msra.mxu1 %v6068_v57  ;;  %v6083_v19 = vld [vmem:[#allocation3 + $0x170] sm:$0xff]   ;;  %v6086_v13 = vld [vmem:[#allocation3 + $0x178] sm:$0xff]   ;;  %v2612_v51 = vld [vmem:[#allocation2 + $0x1c] sm:$0xf]  ;;  %v4766_v0 = vrot.slane %v7487_v58, 9  ;;  %v2684_v48 = vshrl.u32 %v7487_v58, 16  ;;  %p6176_p2 = pnand %p6175_p12, %p8073_p0  ;;  %p6181_p6 = scmp.lt.s32.totalorder %s7956_s27, %s6179_s17 }
 0x220   : > { %5271 = vmatprep.subr.bf16.mxu0 %v6070_v56  ;;  %5619 = vmatprep.subr.bf16.mxu1 %v6071_v26  ;;  %v6084_v8 = vld [vmem:[#allocation3 + $0xf0] sm:$0xff]   ;;  %v2609_v38 = vld [vmem:[#allocation2 + $0x10] sm:$0xf]  ;;  %v2610_v5 = vld [vmem:[#allocation2 + $0x14] sm:$0x1]  ;;  %v2921_v15 = vrot.slane %v2612_v51, 5 }
 0x221   : > { %v2608_v21 = vld [vmem:[#allocation2 + $0xc] sm:$0xf]  ;;  %v2669_v4 = vshll.u32 %v2609_v38, 16  ;;  %v2673_v53 = vshrl.u32 %v2609_v38, 16  ;;  %v6087_v59 = vld [vmem:[#allocation3 + $0xf8] sm:$0xff]   ;;  %v2679_v47 = vshll.u32 %v2610_v5, 16  ;;  %p6177_p5 = pneg %p6176_p2 }
 0x222   : > { %v2660_v14 = vshrl.u32 %v2608_v21, 16  ;;  %v2663_v3 = vshll.u32 %v2608_v21, 16  ;;  %v4765_v45 = vrot.slane %v2608_v21, 9  ;;  %v2914_v30 = vrot.slane %v2609_v38, 5  ;;  %v2613_v46 = vld [vmem:[#allocation2 + $0x20] sm:$0x1] }
 0x223   : > { %5272 = vmatpush3.bf16.msra.mxu0 %v6072_v60  ;;  %5620 = vmatpush3.bf16.msra.mxu1 %v6071_v26  ;;  %v2917_v10 = vrot.slane %v2610_v5, 5  ;;  %v2671_v55 = vrot.slane %v2669_v4, 5  ;;  %v2675_v49 = vrot.slane %v2673_v53, 4  ;;  %v2681_v39 = vrot.slane %v2679_v47, 5  ;;  %v6089_v25 = vld [vmem:[#allocation3 + $0x80] sm:$0xff]   ;;  %s6180_s30 = scalar_lea.vmem %s6179_s17, 2048 }
 0x224   : > { %5273 = vmatprep.subr.bf16.mxu0 %v6073_v17  ;;  %5621 = vmatprep.subr.bf16.mxu1 %v6074_v2  ;;  %v2662_v32 = vrot.slane %v2660_v14, 4  ;;  %v2665_v44 = vrot.slane %v2663_v3, 5  ;;  %v2915_v43 = vsel %vm6860_vm5, %v4765_v45, %v2914_v30  ;;  %v2916_v16 = vrot.slane %v2914_v30, 4  ;;  %v7502_v57 = vld [vmem:[#allocation2 + $0x24] sm:$0xf]  ;;  %p6182_p7 = scmp.lt.s32.totalorder %s6180_s30, %s6174_s29 }
 0x225   : > { %v7491_v27 = vcombine.low %v2608_v21, %v2609_v38  ;;  %v2676_v1 = vor.u32 %v2675_v49, %v2671_v55  ;;  %v2924_v35 = vrot.slane %v2613_v46, 5  ;;  %v2687_v22 = vshll.u32 %v7487_v58, 16  ;;  %v7504_v9 = vld [vmem:[#allocation2 + $0x28] sm:$0xf]  ;;  %v6090_v21 = vld [vmem:[#allocation3 + $0x88] sm:$0xff]  }
 0x226   : > { %v2666_v24 = vor.u32 %v2665_v44, %v2662_v32  ;;  %v2918_v63 = vsel %vm6860_vm5, %v2916_v16, %v2917_v10  ;;  %v2922_v31 = vsel %vm6860_vm5, %v4766_v0, %v2921_v15  ;;  %v2923_v56 = vrot.slane %v2921_v15, 4  ;;  %v6092_v32 = vld [vmem:[#allocation3 + $0x90] sm:$0xff]   ;;  %v7542_v49 = vld [vmem:[#allocation2 + $0x3c] sm:$0xf]  ;;  %p6183_p9 = por %p6182_p7, %p6181_p6 }
 0x227   : > { %5274 = vmatpush3.bf16.msra.mxu0 %v6075_v61  ;;  %5622 = vmatpush3.bf16.msra.mxu1 %v6074_v2  ;;  %v2677_v52 = vrot.slane %v2676_v1, 4  ;;  %v7498_v12 = vcombine.low %v2915_v43, %v2918_v63  ;;  %v2686_v26 = vrot.slane %v2684_v48, 4  ;;  %v2689_v60 = vrot.slane %v2687_v22, 5  ;;  %v7506_v2 = vld [vmem:[#allocation2 + $0x2c] sm:$0x1]  ;;  %v6099_v0 = vld [vmem:[#allocation3 + $0x40] sm:$0xff]  }
 0x228   : > { %5275 = vmatprep.subr.bf16.mxu0 %v6076_v33  ;;  %5623 = vmatprep.subr.bf16.mxu1 %v6077_v40  ;;  %v2667_v34 = vrot.slane %v2666_v24, 4  ;;  %v2693_v17 = vshll.u32 %v2612_v51, 16  ;;  %v4767_v14 = vrot.slane %v7502_v57, 9  ;;  %v2928_v4 = vrot.slane %v7504_v9, 5  ;;  %v7549_v1 = vld [vmem:[#allocation2 + $0x44] sm:$0x1]  ;;  %p6184_p11 = pnand %p6183_p9, %p6177_p5 }
 0x229   : > { %v2682_v33 = vsel %vm6563_vm2, %v2677_v52, %v2681_v39  ;;  %5631 = vmatprep.mubr.bf16.mxu1 %v7498_v12  ;;  %v2931_v53 = vrot.slane %v7506_v2, 5  ;;  %v2711_v24 = vshll.u32 %v7502_v57, 16  ;;  %v2717_v63 = vshll.u32 %v7504_v9, 16  ;;  %v7555_v48 = vld [vmem:[#allocation2 + $0x48] sm:$0xf]  ;;  %v6100_v22 = vld [vmem:[#allocation3] sm:$0xff]  }
 0x22a   : > { %v2672_v61 = vsel %vm6563_vm2, %v2667_v34, %v2671_v55  ;;  %v2708_v55 = vshrl.u32 %v7502_v57, 16 }
 0x22b   : > { %5276 = vmatpush3.bf16.msra.mxu0 %v6078_v37  ;;  %5624 = vmatpush3.bf16.msra.mxu1 %v6077_v40  ;;  %v2697_v40 = vshrl.u32 %v2612_v51, 16  ;;  %v2703_v37 = vshll.u32 %v2613_v46, 16  ;;  %v7544_v46 = vld [vmem:[#allocation2 + $0x40] sm:$0xf] }
 0x22c   : > { %5277 = vmatprep.subr.bf16.mxu0 %v6079_v50  ;;  %5625 = vmatprep.subr.bf16.mxu1 %v6080_v20  ;;  %v7513_v50 = vld [vmem:[#allocation2 + $0x30] sm:$0xf] }
 0x22d   : > { %v2699_v38 = vrot.slane %v2697_v40, 4  ;;  %v2705_v5 = vrot.slane %v2703_v37, 5  ;;  %v4768_v45 = vrot.slane %v7513_v50, 9  ;;  %v6093_v37 = vld [vmem:[#allocation3 + $0x98] sm:$0xff]  }
 0x22f   : > { %5278 = vmatpush3.bf16.msra.mxu0 %v6081_v41  ;;  %5626 = vmatpush3.bf16.msra.mxu1 %v6080_v20  ;;  %v7515_v20 = vld [vmem:[#allocation2 + $0x34] sm:$0xf]  ;;  %v7517_v41 = vcombine.low %v2672_v61, %v2682_v33  ;;  %v2719_v33 = vrot.slane %v2717_v63, 5  ;;  %v7609_v63 = vld [vmem:[#allocation2 + $0x64] sm:$0xf] }
 0x230   : > { %5279 = vmatprep.subr.bf16.mxu0 %v6082_v36  ;;  %5627 = vmatprep.subr.bf16.mxu1 %v6083_v19  ;;  %v2925_v36 = vsel %vm6860_vm5, %v2923_v56, %v2924_v35  ;;  %v2935_v30 = vrot.slane %v7515_v20, 5  ;;  %v2721_v35 = vshrl.u32 %v7504_v9, 16  ;;  %v2713_v56 = vrot.slane %v2711_v24, 5 }
 0x231   : > { %3368 = vmatprep.mubr.bf16.mxu0 %v7517_v41 }
 0x232   : > { %v2936_v43 = vsel %vm6860_vm5, %v4768_v45, %v2935_v30  ;;  %v2937_v16 = vrot.slane %v2935_v30, 4  ;;  %v2723_v40 = vrot.slane %v2721_v35, 4  ;;  %v6095_v45 = vld [vmem:[#allocation3 + $0xa0] sm:$0xff]   ;;  %v7586_v30 = vld [vmem:[#allocation2 + $0x54] sm:$0xf]  ;;  %v6105_v35 = vld [vmem:[#allocation3 + $0x48] sm:$0xff]  }
 0x233   : > { %5280 = vmatpush3.bf16.msra.mxu0 %v6084_v8  ;;  %5628 = vmatpush3.bf16.msra.mxu1 %v6083_v19  ;;  %v2690_v19 = vor.u32 %v2689_v60, %v2686_v26  ;;  %v2695_v8 = vrot.slane %v2693_v17, 5  ;;  %v7563_v26 = vld [vmem:[#allocation2 + $0x4c] sm:$0xf]  ;;  %v7565_v60 = vld [vmem:[#allocation2 + $0x50] sm:$0x1] }
 0x234   : > { %5281 = vmatprep.subr.bf16.mxu0 %v6085_v6  ;;  %5629 = vmatprep.subr.bf16.mxu1 %v6086_v13  ;;  %v7521_v6 = vld [vmem:[#allocation2 + $0x38] sm:$0x1] }
 0x235   : > { %v2691_v3 = vrot.slane %v2690_v19, 4  ;;  %v2700_v47 = vor.u32 %v2699_v38, %v2695_v8  ;;  %v2938_v10 = vrot.slane %v7521_v6, 5  ;;  %v2727_v19 = vshll.u32 %v7506_v2, 16 }
 0x236   : > { %v2942_v38 = vrot.slane %v7544_v46, 5 }
 0x237   : > { %5282 = vmatpush3.bf16.msra.mxu0 %v6087_v59  ;;  %5630 = vmatpush3.bf16.msra.mxu1 %v6086_v13  ;;  %v7523_v13 = vcombine.low %v2922_v31, %v2925_v36  ;;  %v7530_v59 = vcombine.low %v7487_v58, %v2612_v51  ;;  %v2696_v44 = vsel %vm6563_vm2, %v2691_v3, %v2695_v8  ;;  %v2930_v51 = vrot.slane %v2928_v4, 4 }
 0x238   : > { %5647 = vmatprep.subr.bf16.mxu1 %v6089_v25  ;;  %v2929_v58 = vsel %vm6860_vm5, %v4767_v14, %v2928_v4  ;;  %v2701_v39 = vrot.slane %v2700_v47, 4  ;;  %v2939_v31 = vsel %vm6860_vm5, %v2937_v16, %v2938_v10  ;;  %5347 = vmatprep.subr.bf16.mxu0 %v6099_v0  ;;  %v4769_v8 = vrot.slane %v7542_v49, 9  ;;  %v7601_v16 = vld [vmem:[#allocation2 + $0x60] sm:$0xf] }
 0x239   : > { %v2932_v15 = vsel %vm6860_vm5, %v2930_v51, %v2931_v53  ;;  %v7569_v61 = vcombine.low %v2936_v43, %v2939_v31  ;;  %v7579_v14 = vcombine.low %v7502_v57, %v7504_v9  ;;  %v4770_v3 = vrot.slane %v7555_v48, 9  ;;  %v7599_v43 = vld [vmem:[#allocation2 + $0x5c] sm:$0x1] }
 0x23a   : > { %3369 = vmatmul.mubr.bf16.vlgmr.msra.gmra.mrb[100].mxu0 %v7491_v27  ;;  %5632 = vmatmul.mubr.bf16.vlgmr.msra.gmra.mrb[60].mxu1 %v7523_v13  ;;  %v2706_v34 = vsel %vm6563_vm2, %v2701_v39, %v2705_v5  ;;  %v7559_v52 = vcombine.low %v2929_v58, %v2932_v15  ;;  %v2945_v5 = vrot.slane %v7549_v1, 5  ;;  %v2729_v4 = vrot.slane %v2727_v19, 5  ;;  %v7591_v58 = vld [vmem:[#allocation2 + $0x58] sm:$0xf] }
 0x23b   : > { %5648 = vmatpush3.bf16.msra.mxu1 %v6089_v25  ;;  %v2710_v25 = vrot.slane %v2708_v55, 4  ;;  %v7567_v17 = vcombine.low %v2696_v44, %v2706_v34  ;;  %5348 = vmatpush3.bf16.msra.mxu0 %v6100_v22  ;;  %v2943_v53 = vsel %vm6860_vm5, %v4769_v8, %v2942_v38  ;;  %v2944_v47 = vrot.slane %v2942_v38, 4  ;;  %v6096_v34 = vld [vmem:[#allocation3 + $0xa8] sm:$0xff]  }
 0x23c   : > { %5649 = vmatprep.subr.bf16.mxu1 %v6090_v21  ;;  %5635 = vmatprep.mubr.bf16.mxu1 %v7559_v52  ;;  %v2949_v57 = vrot.slane %v7563_v26, 5  ;;  %v2952_v9 = vrot.slane %v7565_v60, 5  ;;  %v2732_v44 = vshrl.u32 %v7513_v50, 16  ;;  %v2735_v39 = vshll.u32 %v7513_v50, 16 }
 0x23d   : > { %v2714_v36 = vor.u32 %v2713_v56, %v2710_v25  ;;  %3376 = vmatprep.mubr.bf16.mxu0 %v7567_v17  ;;  %v2946_v55 = vsel %vm6860_vm5, %v2944_v47, %v2945_v5  ;;  %v2745_v19 = vshrl.u32 %v7515_v20, 16  ;;  %v2751_v8 = vshll.u32 %v7521_v6, 16  ;;  %5349 = vmatprep.subr.bf16.mxu0 %v6105_v35  ;;  %v7645_v35 = vld [vmem:[#allocation2] sm:$0xf] }
 0x23e   : > { %v7605_v0 = vcombine.low %v2943_v53, %v2946_v55  ;;  %v2950_v15 = vsel %vm6860_vm5, %v4770_v3, %v2949_v57  ;;  %v2951_v25 = vrot.slane %v2949_v57, 4  ;;  %v2734_v31 = vrot.slane %v2732_v44, 4 }
 0x23f   : > { %5650 = vmatpush3.bf16.msra.mxu1 %v6090_v21  ;;  %v2724_v21 = vor.u32 %v2723_v40, %v2719_v33  ;;  %v2715_v2 = vrot.slane %v2714_v36, 4  ;;  %v2737_v56 = vrot.slane %v2735_v39, 5  ;;  %v7613_v40 = vld [vmem:[#allocation2 + $0x68] sm:$0x1]  ;;  %v4771_v38 = vrot.slane %v7586_v30, 9 }
 0x240   : > { %5651 = vmatprep.subr.bf16.mxu1 %v6092_v32  ;;  %v2953_v36 = vsel %vm6860_vm5, %v2951_v25, %v2952_v9  ;;  %v2753_v53 = vrot.slane %v2751_v8, 5  ;;  %v7628_v47 = vcombine.low %v7513_v50, %v7515_v20  ;;  %v4772_v6 = vrot.slane %v7601_v16, 9 }
 0x241   : > { %v2725_v10 = vrot.slane %v2724_v21, 4  ;;  %v2720_v51 = vsel %vm6563_vm2, %v2715_v2, %v2719_v33  ;;  %v6106_v21 = vld [vmem:[#allocation3 + $0x8] sm:$0xff]   ;;  %v7622_v5 = vcombine.low %v2950_v15, %v2953_v36  ;;  %v2738_v3 = vor.u32 %v2737_v56, %v2734_v31  ;;  %v6112_v56 = vld [vmem:[#allocation3 + $0x10] sm:$0xff]  }
 0x242   : > { %3377 = vmatmul.mubr.bf16.gmra.mrb[104].mxu0 %v7530_v59  ;;  %5636 = vmatmul.mubr.bf16.gmra.mrb[64].mxu1 %v7569_v61  ;;  %v2959_v2 = vrot.slane %v7599_v43, 5  ;;  %v2963_v44 = vrot.slane %v7609_v63, 5  ;;  %v2966_v50 = vrot.slane %v7613_v40, 5  ;;  %v2756_v39 = vshrl.u32 %v7542_v49, 16  ;;  %v7647_v31 = vld [vmem:[#allocation2 + $0x4] sm:$0xf] }
 0x243   : > { %5652 = vmatpush3.bf16.msra.mxu1 %v6092_v32  ;;  %v2741_v32 = vshll.u32 %v7515_v20, 16  ;;  %v2730_v24 = vsel %vm6563_vm2, %v2725_v10, %v2729_v4  ;;  %5639 = vmatprep.mubr.bf16.mxu1 %v7605_v0  ;;  %v2747_v4 = vrot.slane %v2745_v19, 4  ;;  %v2739_v10 = vrot.slane %v2738_v3, 4  ;;  %v6098_v20 = vld [vmem:[#allocation3 + $0xb0] sm:$0xff]  }
 0x244   : > { %5653 = vmatprep.subr.bf16.mxu1 %v6093_v37  ;;  %v7611_v22 = vcombine.low %v2720_v51, %v2730_v24  ;;  %v6110_v51 = vld [vmem:[#allocation3 + $0x50] sm:$0xff]   ;;  %5350 = vmatpush3.bf16.msra.mxu0 %v6106_v21  ;;  %v2964_v25 = vsel %vm6860_vm5, %v4772_v6, %v2963_v44  ;;  %v2758_v8 = vrot.slane %v2756_v39, 4  ;;  %v2765_v3 = vshll.u32 %v7544_v46, 16 }
 0x245   : > { %v2743_v33 = vrot.slane %v2741_v32, 5  ;;  %v2759_v32 = vshll.u32 %v7542_v49, 16  ;;  %5351 = vmatprep.subr.bf16.mxu0 %v6110_v51  ;;  %v7651_v21 = vld [vmem:[#allocation2 + $0x8] sm:$0x1]  ;;  %v6101_v51 = vld [vmem:[#allocation3 + $0xb8] sm:$0xff]  }
 0x246   : > { %3384 = vmatprep.mubr.bf16.mxu0 %v7611_v22 }
 0x247   : > { %5654 = vmatpush3.bf16.msra.mxu1 %v6093_v37  ;;  %v2956_v37 = vrot.slane %v7591_v58, 5  ;;  %v2748_v55 = vor.u32 %v2747_v4, %v2743_v33  ;;  %v2744_v24 = vsel %vm6563_vm2, %v2739_v10, %v2743_v33  ;;  %v6114_v4 = vld [vmem:[#allocation3 + $0x58] sm:$0xff]  }
 0x248   : > { %5655 = vmatprep.subr.bf16.mxu1 %v6095_v45  ;;  %5352 = vmatpush3.bf16.msra.mxu0 %v6112_v56  ;;  %v2780_v56 = vshrl.u32 %v7555_v48, 16 }
 0x249   : > { %v2957_v57 = vsel %vm6860_vm5, %v4771_v38, %v2956_v37  ;;  %v2958_v9 = vrot.slane %v2956_v37, 4  ;;  %v2749_v36 = vrot.slane %v2748_v55, 4  ;;  %v2761_v38 = vrot.slane %v2759_v32, 5  ;;  %5353 = vmatprep.subr.bf16.mxu0 %v6114_v4  ;;  %v6119_v4 = vld [vmem:[#allocation3 + $0x60] sm:$0xff]  }
 0x24a   : > { %3385 = vmatmul.mubr.bf16.gmra.mrb[108].mxu0 %v7579_v14  ;;  %5640 = vmatmul.mubr.bf16.gmra.mrb[68].mxu1 %v7622_v5  ;;  %v2769_v37 = vshrl.u32 %v7544_v46, 16  ;;  %v2767_v55 = vrot.slane %v2765_v3, 5  ;;  %v2907_v32 = vrot.slane %v7647_v31, 5  ;;  %v6104_v3 = vld [vmem:[#allocation3 + $0x180] sm:$0xff]  }
 0x24b   : > { %5656 = vmatpush3.bf16.msra.mxu1 %v6095_v45  ;;  %v2960_v15 = vsel %vm6860_vm5, %v2958_v9, %v2959_v2  ;;  %v2965_v45 = vrot.slane %v2963_v44, 4  ;;  %v2775_v2 = vshll.u32 %v7549_v1, 16  ;;  %v2754_v6 = vsel %vm6563_vm2, %v2749_v36, %v2753_v53  ;;  %v6116_v1 = vld [vmem:[#allocation3 + $0x18] sm:$0xff]  }
 0x24c   : > { %5657 = vmatprep.subr.bf16.mxu1 %v6096_v34  ;;  %v7649_v19 = vcombine.low %v2957_v57, %v2960_v15  ;;  %v2762_v57 = vor.u32 %v2761_v38, %v2758_v8  ;;  %v4764_v9 = vrot.slane %v7645_v35, 9  ;;  %v7664_v44 = vcombine.low %v2744_v24, %v2754_v6  ;;  %v6103_v24 = vld [vmem:[#allocation3 + $0x1c0] sm:$0xff]   ;;  %5354 = vmatpush3.bf16.msra.mxu0 %v6116_v1 }
 0x24d   : > { %v2967_v33 = vsel %vm6860_vm5, %v2965_v45, %v2966_v50  ;;  %v2771_v50 = vrot.slane %v2769_v37, 4  ;;  %v2910_v53 = vrot.slane %v7651_v21, 5  ;;  %v2909_v45 = vrot.slane %v2907_v32, 4  ;;  %5355 = vmatprep.subr.bf16.mxu0 %v6119_v4 }
 0x24e   : > { %5643 = vmatprep.mubr.bf16.mxu1 %v7649_v19  ;;  %v7661_v10 = vcombine.low %v2964_v25, %v2967_v33  ;;  %v2763_v39 = vrot.slane %v2762_v57, 4  ;;  %3392 = vmatprep.mubr.bf16.mxu0 %v7664_v44  ;;  %v2908_v25 = vsel %vm6860_vm5, %v4764_v9, %v2907_v32  ;;  %v2783_v38 = vshll.u32 %v7555_v48, 16  ;;  %v6107_v9 = vld [vmem:[#allocation3 + $0x1c8] sm:$0xff]  }
 0x24f   : > { %5658 = vmatpush3.bf16.msra.mxu1 %v6096_v34  ;;  %v2777_v34 = vrot.slane %v2775_v2, 5  ;;  %v2772_v15 = vor.u32 %v2771_v50, %v2767_v55  ;;  %v2911_v33 = vsel %vm6860_vm5, %v2909_v45, %v2910_v53  ;;  %v2782_v37 = vrot.slane %v2780_v56, 4  ;;  %v6111_v56 = vld [vmem:[#allocation3 + $0x1d0] sm:$0xff]  }
 0x250   : > { %5659 = vmatprep.subr.bf16.mxu1 %v6098_v20  ;;  %v2768_v36 = vsel %vm6563_vm2, %v2763_v39, %v2767_v55  ;;  %v2793_v2 = vshrl.u32 %v7563_v26, 16  ;;  %v4794_v57 = vcombine.low %v2908_v25, %v2911_v33  ;;  %v2785_v55 = vrot.slane %v2783_v38, 5  ;;  %v6108_v25 = vld [vmem:[#allocation3 + $0x188] sm:$0xff]   ;;  %v6113_v33 = vld [vmem:[#allocation3 + $0x190] sm:$0xff]  }
 0x251   : > { %v2773_v8 = vrot.slane %v2772_v15, 4  ;;  %v2799_v50 = vshll.u32 %v7565_v60, 16  ;;  %v7688_v39 = vcombine.low %v7542_v49, %v7544_v46  ;;  %v2807_v46 = vshll.u32 %v7586_v30, 16 }
 0x252   : > { %5644 = vmatmul.mubr.bf16.gmra.mrb[72].mxu1 %v7661_v10  ;;  %3393 = vmatmul.mubr.bf16.gmra.mrb[112].mxu0 %v7628_v47  ;;  %v2795_v53 = vrot.slane %v2793_v2, 4  ;;  %v2786_v15 = vor.u32 %v2785_v55, %v2782_v37  ;;  %v2817_v38 = vshrl.u32 %v7591_v58, 16 }
 0x253   : > { %5660 = vmatpush3.bf16.msra.mxu1 %v6098_v20  ;;  %v2789_v20 = vshll.u32 %v7563_v26, 16  ;;  %v2778_v6 = vsel %vm6563_vm2, %v2773_v8, %v2777_v34  ;;  %5663 = vmatprep.mubr.bf16.mxu1 %v4794_v57  ;;  %v2801_v45 = vrot.slane %v2799_v50, 5  ;;  %v2804_v34 = vshrl.u32 %v7586_v30, 16  ;;  %v6115_v57 = vld [vmem:[#allocation3 + $0x1d8] sm:$0xff]  }
 0x254   : > { %5661 = vmatprep.subr.bf16.mxu1 %v6101_v51  ;;  %v7684_v1 = vcombine.low %v2768_v36, %v2778_v6  ;;  %v2813_v8 = vshll.u32 %v7591_v58, 16  ;;  %v2809_v37 = vrot.slane %v2807_v46, 5  ;;  %v2819_v4 = vrot.slane %v2817_v38, 4  ;;  %v6128_v38 = vld [vmem:[#allocation3 + $0x70] sm:$0xff]  }
 0x255   : > { %v2791_v32 = vrot.slane %v2789_v20, 5  ;;  %v2806_v36 = vrot.slane %v2804_v34, 4  ;;  %v7707_v6 = vcombine.low %v7555_v48, %v7563_v26  ;;  %v6123_v34 = vld [vmem:[#allocation3 + $0x68] sm:$0xff]   ;;  %v6120_v26 = vld [vmem:[#allocation3 + $0x1e0] sm:$0xff]   ;;  %v2841_v46 = vshrl.u32 %v7609_v63, 16 }
 0x256   : > { %3400 = vmatprep.mubr.bf16.mxu0 %v7684_v1  ;;  %v2815_v2 = vrot.slane %v2813_v8, 5 }
 0x257   : > { %5662 = vmatpush3.bf16.msra.mxu1 %v6101_v51  ;;  %v2796_v60 = vor.u32 %v2795_v53, %v2791_v32  ;;  %v2787_v51 = vrot.slane %v2786_v15, 4  ;;  %v2828_v53 = vshrl.u32 %v7601_v16, 16 }
 0x258   : > { %5427 = vmatprep.subr.bf16.mxu1 %v6103_v24  ;;  %v2820_v50 = vor.u32 %v2819_v4, %v2815_v2 }
 0x259   : > { %v2797_v49 = vrot.slane %v2796_v60, 4  ;;  %v2792_v24 = vsel %vm6563_vm2, %v2787_v51, %v2791_v32  ;;  %v6121_v32 = vld [vmem:[#allocation3 + $0x20] sm:$0xff]   ;;  %v6125_v51 = vld [vmem:[#allocation3 + $0x28] sm:$0xff]  }
 0x25a   : > { %5664 = vmatmul.mubr.bf16.vlgmr.msra.gmra.mrb[60].mxu1 %v7498_v12  ;;  %3401 = vmatmul.mubr.bf16.gmra.mrb[116].mxu0 %v7688_v39 }
 0x25b   : > { %5428 = vmatpush3.bf16.msra.mxu1 %v6104_v3  ;;  %5667 = vmatprep.mubr.bf16.mxu1 %v7523_v13  ;;  %v2802_v12 = vsel %vm6563_vm2, %v2797_v49, %v2801_v45  ;;  %v2823_v3 = vshll.u32 %v7599_v43, 16  ;;  %v6117_v43 = vld [vmem:[#allocation3 + $0x198] sm:$0xff]   ;;  %v2821_v45 = vrot.slane %v2820_v50, 4  ;;  %v2837_v49 = vshll.u32 %v7609_v63, 16 }
 0x25c   : > { %5429 = vmatprep.subr.bf16.mxu1 %v6107_v9  ;;  %v7703_v20 = vcombine.low %v2792_v24, %v2802_v12  ;;  %v2810_v9 = vor.u32 %v2809_v37, %v2806_v36  ;;  %5356 = vmatpush3.bf16.msra.mxu0 %v6121_v32  ;;  %v2847_v24 = vshll.u32 %v7613_v40, 16  ;;  %v7727_v12 = vcombine.low %v7586_v30, %v7591_v58  ;;  %v6124_v37 = vld [vmem:[#allocation3 + $0x1e8] sm:$0xff]   ;;  %v6132_v30 = vld [vmem:[#allocation3 + $0x78] sm:$0xff]  }
 0x25d   : > { %v2825_v55 = vrot.slane %v2823_v3, 5  ;;  %5357 = vmatprep.subr.bf16.mxu0 %v6123_v34  ;;  %v2839_v3 = vrot.slane %v2837_v49, 5  ;;  %v2636_v40 = vshrl.u32 %v7645_v35, 16  ;;  %v2639_v32 = vshll.u32 %v7645_v35, 16 }
 0x25e   : > { %3408 = vmatprep.mubr.bf16.mxu0 %v7703_v20  ;;  %v2811_v15 = vrot.slane %v2810_v9, 4  ;;  %v6126_v9 = vld [vmem:[#allocation3 + $0x1a8] sm:$0xff]   ;;  %v2849_v50 = vrot.slane %v2847_v24, 5  ;;  %v2655_v49 = vshll.u32 %v7651_v21, 16  ;;  %v6135_v21 = vld [vmem:[#allocation3 + $0x1b8] sm:$0xff]  }
 0x25f   : > { %5430 = vmatpush3.bf16.msra.mxu1 %v6108_v25  ;;  %v2830_v25 = vrot.slane %v2828_v53, 4  ;;  %v2826_v60 = vsel %vm6563_vm2, %v2821_v45, %v2825_v55  ;;  %v6134_v45 = vld [vmem:[#allocation3 + $0x38] sm:$0xff]   ;;  %v2638_v34 = vrot.slane %v2636_v40, 4 }
 0x260   : > { %5431 = vmatprep.subr.bf16.mxu1 %v6111_v56  ;;  %v2816_v48 = vsel %vm6563_vm2, %v2811_v15, %v2815_v2  ;;  %v2831_v56 = vshll.u32 %v7601_v16, 16  ;;  %5358 = vmatpush3.bf16.msra.mxu0 %v6125_v51  ;;  %v2843_v2 = vrot.slane %v2841_v46, 4  ;;  %v2645_v51 = vshll.u32 %v7647_v31, 16 }
 0x261   : > { %v7719_v36 = vcombine.low %v2816_v48, %v2826_v60  ;;  %5359 = vmatprep.subr.bf16.mxu0 %v6128_v38  ;;  %v6131_v60 = vld [vmem:[#allocation3 + $0x1b0] sm:$0xff]   ;;  %v7745_v46 = vcombine.low %v7601_v16, %v7609_v63 }
 0x262   : > { %5668 = vmatmul.mubr.bf16.gmra.mrb[64].mxu1 %v7559_v52  ;;  %3409 = vmatmul.mubr.bf16.gmra.mrb[120].mxu0 %v7707_v6  ;;  %v2833_v8 = vrot.slane %v2831_v56, 5  ;;  %v2844_v55 = vor.u32 %v2843_v2, %v2839_v3  ;;  %v2649_v56 = vshrl.u32 %v7647_v31, 16  ;;  %v2647_v38 = vrot.slane %v2645_v51, 5 }
 0x263   : > { %5432 = vmatpush3.bf16.msra.mxu1 %v6113_v33  ;;  %5671 = vmatprep.mubr.bf16.mxu1 %v7569_v61  ;;  %v6122_v33 = vld [vmem:[#allocation3 + $0x1a0] sm:$0xff]   ;;  %v2657_v2 = vrot.slane %v2655_v49, 5 }
 0x264   : > { %5433 = vmatprep.subr.bf16.mxu1 %v6115_v57  ;;  %3416 = vmatprep.mubr.bf16.mxu0 %v7719_v36  ;;  %v2834_v4 = vor.u32 %v2833_v8, %v2830_v25  ;;  %v6130_v57 = vld [vmem:[#allocation3 + $0x30] sm:$0xff]   ;;  %v2845_v58 = vrot.slane %v2844_v55, 4  ;;  %v6133_v8 = vld [vmem:[#allocation3 + $0x1f8] sm:$0xff]   ;;  %v6138_v55 = vld [vmem:[#allocation3 + $0x208] sm:$0xff]  }
 0x265   : > { %5360 = vmatpush3.bf16.msra.mxu0 %v6130_v57 }
 0x266   : > { %v2835_v53 = vrot.slane %v2834_v4, 4  ;;  %v2850_v48 = vsel %vm6563_vm2, %v2845_v58, %v2849_v50  ;;  %5361 = vmatprep.subr.bf16.mxu0 %v6132_v30  ;;  %v6137_v4 = vld [vmem:[#allocation3 + $0x200] sm:$0xff]   ;;  %v6139_v50 = vld [vmem:[#allocation3 + $0x210] sm:$0xff]  }
 0x267   : > { %5434 = vmatpush3.bf16.msra.mxu1 %v6117_v43  ;;  %v6129_v43 = vld [vmem:[#allocation3 + $0x1f0] sm:$0xff]  }
 0x268   : > { %5435 = vmatprep.subr.bf16.mxu1 %v6120_v26  ;;  %v2840_v15 = vsel %vm6563_vm2, %v2835_v53, %v2839_v3  ;;  %v2641_v26 = vrot.slane %v2639_v32, 5  ;;  %v6140_v32 = vld [vmem:[#allocation3 + $0x218] sm:$0xff]  }
 0x269   : > { %v7738_v25 = vcombine.low %v2840_v15, %v2850_v48  ;;  %5362 = vmatpush3.bf16.msra.mxu0 %v6134_v45  ;;  %v6145_v53 = vld [vmem:[#allocation3 + $0x238] sm:$0xff]  }
 0x26a   : > { %5672 = vmatmul.mubr.bf16.gmra.mrb[68].mxu1 %v7605_v0  ;;  %3417 = vmatmul.mubr.bf16.gmra.mrb[124].mxu0 %v7727_v12  ;;  %v2642_v24 = vor.u32 %v2641_v26, %v2638_v34  ;;  %v2634_v48 = vld [vmem:[#allocation2 + $0x74] sm:$0x1] }
 0x26b   : > { %5436 = vmatpush3.bf16.msra.mxu1 %v6122_v33  ;;  %5675 = vmatprep.mubr.bf16.mxu1 %v7622_v5  ;;  %v2651_v33 = vrot.slane %v2649_v56, 4  ;;  %v2871_v26 = vshll.u32 %v2634_v48, 16 }
 0x26c   : > { %5437 = vmatprep.subr.bf16.mxu1 %v6124_v37  ;;  %3424 = vmatprep.mubr.bf16.mxu0 %v7738_v25  ;;  %v2643_v37 = vrot.slane %v2642_v24, 4 }
 0x26d   : > { %v2652_v3 = vor.u32 %v2651_v33, %v2647_v38  ;;  %v2873_v56 = vrot.slane %v2871_v26, 5 }
 0x26e   : > { %v2648_v16 = vsel %vm6563_vm2, %v2643_v37, %v2647_v38 }
 0x26f   : > { %5438 = vmatpush3.bf16.msra.mxu1 %v6126_v9  ;;  %v2653_v63 = vrot.slane %v2652_v3, 4  ;;  %v4774_v9 = vcombine.low %v7645_v35, %v7647_v31  ;;  %v6141_v35 = vld [vmem:[#allocation3 + $0x220] sm:$0xff]   ;;  %v2633_v31 = vld [vmem:[#allocation2 + $0x70] sm:$0xf] }
 0x270   : > { %5439 = vmatprep.subr.bf16.mxu1 %v6129_v43  ;;  %v2865_v58 = vshrl.u32 %v2633_v31, 16  ;;  %v2970_v54 = vrot.slane %v2633_v31, 5 }
 0x271   : > { %v2658_v57 = vsel %vm6563_vm2, %v2653_v63, %v2657_v2 }
 0x272   : > { %5676 = vmatmul.mubr.bf16.gmra.mrb[72].mxu1 %v7649_v19  ;;  %3425 = vmatmul.mubr.bf16.gmra.mrb[128].mxu0 %v7745_v46  ;;  %v4784_v40 = vcombine.low %v2648_v16, %v2658_v57  ;;  %v2867_v34 = vrot.slane %v2865_v58, 4 }
 0x273   : > { %5440 = vmatpush3.bf16.msra.mxu1 %v6131_v60  ;;  %4093 = vmatprep.mubr.bf16.mxu1 %v7567_v17 }
 0x274   : > { %5441 = vmatprep.subr.bf16.mxu1 %v6133_v8  ;;  %3706 = vmatprep.mubr.bf16.mxu0 %v4784_v40 }
 0x277   : > { %5442 = vmatpush3.bf16.msra.mxu1 %v6135_v21 }
 0x278   : > { %5679 = vmatprep.subr.bf16.mxu1 %v6137_v4 }
 0x27a   : > { %4094 = vmatmul.mubr.bf16.vlgmr.msra.gmra.mrb[76].mxu1 %v7530_v59  ;;  %3707 = vmatmul.mubr.bf16.vlgmr.msra.gmra.mrb[132].mxu0 %v4774_v9 }
 0x27b   : > { %5680 = vmatpush3.bf16.msra.mxu1 %v6137_v4  ;;  %3714 = vmatprep.mubr.bf16.mxu0 %v7517_v41  ;;  %v6142_v41 = vld [vmem:[#allocation3 + $0x228] sm:$0xff]  }
 0x27c   : > { %4101 = vmatprep.mubr.bf16.mxu1 %v7611_v22  ;;  %5681 = vmatprep.subr.bf16.mxu1 %v6138_v55 }
 0x27f   : > { %5682 = vmatpush3.bf16.msra.mxu1 %v6138_v55 }
 0x280   : > { %5683 = vmatprep.subr.bf16.mxu1 %v6139_v50 }
 0x282   : > { %4102 = vmatmul.mubr.bf16.gmra.mrb[80].mxu1 %v7579_v14  ;;  %3715 = vmatmul.mubr.bf16.gmra.mrb[136].mxu0 %v7491_v27  ;;  %v6143_v27 = vld [vmem:[#allocation3 + $0x230] sm:$0xff]  }
 0x283   : > { %4109 = vmatprep.mubr.bf16.mxu1 %v7664_v44  ;;  %3722 = vmatprep.mubr.bf16.mxu0 %v7567_v17  ;;  %v2632_v17 = vld [vmem:[#allocation2 + $0x6c] sm:$0xf] }
 0x284   : > { %5684 = vmatpush3.bf16.msra.mxu1 %v6139_v50  ;;  %v2855_v30 = vshll.u32 %v2632_v17, 16  ;;  %v4783_v24 = vcombine.low %v2632_v17, %v2633_v31 }
 0x285   : > { %5685 = vmatprep.subr.bf16.mxu1 %v6140_v32 }
 0x286   : > { %v2857_v15 = vrot.slane %v2855_v30, 5 }
 0x288   : > { %5686 = vmatpush3.bf16.msra.mxu1 %v6140_v32 }
 0x289   : > { %5687 = vmatprep.subr.bf16.mxu1 %v6141_v35 }
 0x28a   : > { %4110 = vmatmul.mubr.bf16.gmra.mrb[84].mxu1 %v7628_v47  ;;  %3723 = vmatmul.mubr.bf16.gmra.mrb[140].mxu0 %v7530_v59  ;;  %v2852_v59 = vshrl.u32 %v2632_v17, 16 }
 0x28b   : > { %4117 = vmatprep.mubr.bf16.mxu1 %v7684_v1  ;;  %3730 = vmatprep.mubr.bf16.mxu0 %v7611_v22  ;;  %v2861_v22 = vshll.u32 %v2633_v31, 16 }
 0x28c   : > { %5688 = vmatpush3.bf16.msra.mxu1 %v6141_v35  ;;  %v2854_v43 = vrot.slane %v2852_v59, 4 }
 0x28d   : > { %5689 = vmatprep.subr.bf16.mxu1 %v6142_v41  ;;  %v2863_v45 = vrot.slane %v2861_v22, 5 }
 0x290   : > { %5690 = vmatpush3.bf16.msra.mxu1 %v6142_v41 }
 0x291   : > { %5691 = vmatprep.subr.bf16.mxu1 %v6143_v27 }
 0x292   : > { %4118 = vmatmul.mubr.bf16.gmra.mrb[88].mxu1 %v7688_v39  ;;  %3731 = vmatmul.mubr.bf16.gmra.mrb[144].mxu0 %v7579_v14  ;;  %v2858_v14 = vor.u32 %v2857_v15, %v2854_v43 }
 0x293   : > { %4125 = vmatprep.mubr.bf16.mxu1 %v7703_v20  ;;  %3738 = vmatprep.mubr.bf16.mxu0 %v7664_v44  ;;  %v2868_v44 = vor.u32 %v2867_v34, %v2863_v45 }
 0x294   : > { %5692 = vmatpush3.bf16.msra.mxu1 %v6143_v27  ;;  %v2859_v60 = vrot.slane %v2858_v14, 4 }
 0x295   : > { %5693 = vmatprep.subr.bf16.mxu1 %v6145_v53  ;;  %v2869_v51 = vrot.slane %v2868_v44, 4 }
 0x298   : > { %5694 = vmatpush3.bf16.msra.mxu1 %v6145_v53 }
 0x29a   : > { %4126 = vmatmul.mubr.bf16.gmra.mrb[92].mxu1 %v7707_v6  ;;  %3739 = vmatmul.mubr.bf16.gmra.mrb[148].mxu0 %v7628_v47  ;;  %v2864_v47 = vsel %vm6563_vm2, %v2859_v60, %v2863_v45 }
 0x29b   : > { %4133 = vmatprep.mubr.bf16.mxu1 %v7719_v36  ;;  %3746 = vmatprep.mubr.bf16.mxu0 %v7684_v1  ;;  %v2874_v1 = vsel %vm6563_vm2, %v2869_v51, %v2873_v56 }
 0x29c   : > { %v4793_v49 = vcombine.low %v2864_v47, %v2874_v1 }
 0x2a2   : > { %4134 = vmatmul.mubr.bf16.gmra.mrb[96].mxu1 %v7727_v12  ;;  %3747 = vmatmul.mubr.bf16.gmra.mrb[152].mxu0 %v7688_v39  ;;  %v4773_v39 = vrot.slane %v2632_v17, 9 }
 0x2a3   : > { %4141 = vmatprep.mubr.bf16.mxu1 %v7738_v25  ;;  %3754 = vmatprep.mubr.bf16.mxu0 %v7703_v20  ;;  %v2972_v20 = vrot.slane %v2970_v54, 4 }
 0x2aa   : > { %4142 = vmatmul.mubr.bf16.gmra.mrb[100].mxu1 %v7745_v46  ;;  %3755 = vmatmul.mubr.bf16.gmra.mrb[156].mxu0 %v7707_v6  ;;  %v2973_v6 = vrot.slane %v2634_v48, 5 }
 0x2ab   : > { %4149 = vmatprep.mubr.bf16.mxu1 %v4793_v49  ;;  %3762 = vmatprep.mubr.bf16.mxu0 %v7719_v36  ;;  %v2971_v36 = vsel %vm6860_vm5, %v4773_v39, %v2970_v54 }
 0x2b2   : > { %4150 = vmatmul.mubr.bf16.gmra.mrb[104].mxu1 %v4783_v24  ;;  %3763 = vmatmul.mubr.bf16.gmra.mrb[160].mxu0 %v7727_v12 }
 0x2b3   : > { %5695 = vmatprep.mubr.bf16.mxu1 %v7523_v13  ;;  %v2974_v13 = vsel %vm6860_vm5, %v2972_v20, %v2973_v6 }
 0x2ba   : > { %5696 = vmatmul.mubr.bf16.vlgmr.msra.gmra.mrb[60].mxu1 %v7559_v52  ;;  %v4803_v52 = vcombine.low %v2971_v36, %v2974_v13 }
 0x2bb   : > { %5699 = vmatprep.mubr.bf16.mxu1 %v7569_v61 }
 0x2c2   : > { %5700 = vmatmul.mubr.bf16.gmra.mrb[64].mxu1 %v7605_v0 }
 0x2c3   : > { %5703 = vmatprep.mubr.bf16.mxu1 %v7622_v5 }
 0x2ca   : > { %5704 = vmatmul.mubr.bf16.gmra.mrb[68].mxu1 %v7649_v19 }
 0x2cb   : > { %5707 = vmatprep.mubr.bf16.mxu1 %v7661_v10 }
 0x2d2   : > { %5708 = vmatmul.mubr.bf16.gmra.mrb[72].mxu1 %v4803_v52 }
 0x30d   : > { %v5283_v61 = vpop.f32.mrb[100].mxu0 }
 0x30e   : > { %v5284_v0 = vpop.f32.mrb[101].mxu0 }
 0x30f   : > { %v5285_v12 = vadd.f32 %v5284_v0, %v5283_v61  ;;  %v5286_v5 = vpop.f32.mrb[102].mxu0 }
 0x310   : > { %v5287_v25 = vpop.f32.mrb[103].mxu0 }
 0x311   : > { %v5288_v46 = vadd.f32 %v5287_v25, %v5286_v5 }
 0x315   : > { %v5289_v8 = vpop.f32.mrb[104].mxu0 }
 0x316   : > { %v5290_v38 = vpop.f32.mrb[105].mxu0 }
 0x317   : > { %v7799_v33 = vadd.f32 %v5290_v38, %v5289_v8  ;;  %v5292_v19 = vpop.f32.mrb[106].mxu0 }
 0x318   : > { %v5293_v10 = vpop.f32.mrb[107].mxu0 }
 0x319   : > { %v7801_v37 = vadd.f32 %v5293_v10, %v5292_v19 }
 0x31d   : > { %v5295_v3 = vpop.f32.mrb[108].mxu0 }
 0x31e   : > { %v5296_v2 = vpop.f32.mrb[109].mxu0 }
 0x31f   : > { %v7803_v62 = vadd.f32 %v5296_v2, %v5295_v3  ;;  %v5298_v21 = vpop.f32.mrb[110].mxu0 }
 0x320   : > { %v5299_v16 = vpop.f32.mrb[111].mxu0 }
 0x321   : > { %v7805_v63 = vadd.f32 %v5299_v16, %v5298_v21 }
 0x325   : > { %v5301_v4 = vpop.f32.mrb[112].mxu0 }
 0x326   : > { %v5302_v57 = vpop.f32.mrb[113].mxu0 }
 0x327   : > { %v7807_v40 = vadd.f32 %v5302_v57, %v5301_v4  ;;  %v5304_v9 = vpop.f32.mrb[114].mxu0 }
 0x328   : > { %v5305_v55 = vpop.f32.mrb[115].mxu0 }
 0x329   : > { %v7809_v50 = vadd.f32 %v5305_v55, %v5304_v9 }
 0x32d   : > { %v5307_v32 = vpop.f32.mrb[116].mxu0 }
 0x32e   : > { %v5308_v35 = vpop.f32.mrb[117].mxu0 }
 0x32f   : > { %v7811_v41 = vadd.f32 %v5308_v35, %v5307_v32  ;;  %v5310_v27 = vpop.f32.mrb[118].mxu0 }
 0x330   : > { %v5311_v17 = vpop.f32.mrb[119].mxu0 }
 0x331   : > { %v7813_v31 = vadd.f32 %v5311_v17, %v5310_v27 }
 0x335   : > { %v5313_v53 = vpop.f32.mrb[120].mxu0 }
 0x336   : > { %v5314_v59 = vpop.f32.mrb[121].mxu0 }
 0x337   : > { %v7815_v30 = vadd.f32 %v5314_v59, %v5313_v53  ;;  %v5316_v22 = vpop.f32.mrb[122].mxu0 }
 0x338   : > { %v5317_v58 = vpop.f32.mrb[123].mxu0 }
 0x339   : > { %v7817_v43 = vadd.f32 %v5317_v58, %v5316_v22 }
 0x33d   : > { %v5319_v15 = vpop.f32.mrb[124].mxu0 }
 0x33e   : > { %v5320_v45 = vpop.f32.mrb[125].mxu0 }
 0x33f   : > { %v7819_v34 = vadd.f32 %v5320_v45, %v5319_v15  ;;  %v5322_v48 = vpop.f32.mrb[126].mxu0 }
 0x340   : > { %v5323_v14 = vpop.f32.mrb[127].mxu0 }
 0x341   : > { %v7821_v44 = vadd.f32 %v5323_v14, %v5322_v48 }
 0x345   : > { %v5325_v26 = vpop.f32.mrb[128].mxu0 }
 0x346   : > { %v5326_v60 = vpop.f32.mrb[129].mxu0 }
 0x347   : > { %v7823_v51 = vadd.f32 %v5326_v60, %v5325_v26  ;;  %v5328_v56 = vpop.f32.mrb[130].mxu0 }
 0x348   : > { %v5329_v47 = vpop.f32.mrb[131].mxu0 }
 0x349   : > { %v7825_v1 = vadd.f32 %v5329_v47, %v5328_v56 }
 0x34d   : > { %v5443_v49 = vpop.f32.mrb[76].mxu1  ;;  %v5363_v24 = vpop.f32.mrb[132].mxu0 }
 0x34e   : > { %v5444_v54 = vpop.f32.mrb[77].mxu1  ;;  %v5364_v39 = vpop.f32.mrb[133].mxu0 }
 0x34f   : > { %v5445_v20 = vadd.f32 %v5444_v54, %v5443_v49  ;;  %v5446_v6 = vpop.f32.mrb[78].mxu1  ;;  %v5365_v36 = vadd.f32 %v5364_v39, %v5363_v24  ;;  %v5366_v13 = vpop.f32.mrb[134].mxu0 }
 0x350   : > { %v5447_v52 = vpop.f32.mrb[79].mxu1  ;;  %v5367_v61 = vpop.f32.mrb[135].mxu0 }
 0x351   : > { %v5448_v0 = vadd.f32 %v5447_v52, %v5446_v6  ;;  %v5794_v5 = vadd.f32 %v5365_v36, %v5285_v12  ;;  %v5368_v25 = vadd.f32 %v5367_v61, %v5366_v13 }
 0x353   : > { %v5800_v8 = vadd.f32 %v5368_v25, %v5288_v46  ;;  %v7827_v38 = vadd.f32 %v5794_v5, %v5445_v20 }
 0x355   : > { %v5449_v19 = vpop.f32.mrb[80].mxu1  ;;  %v5369_v10 = vpop.f32.mrb[136].mxu0  ;;  %v7829_v2 = vadd.f32 %v5800_v8, %v5448_v0 }
 0x356   : > { %v5450_v3 = vpop.f32.mrb[81].mxu1  ;;  %v5370_v21 = vpop.f32.mrb[137].mxu0 }
 0x357   : > { %v5451_v16 = vadd.f32 %v5450_v3, %v5449_v19  ;;  %v5452_v4 = vpop.f32.mrb[82].mxu1  ;;  %v5371_v57 = vadd.f32 %v5370_v21, %v5369_v10  ;;  %v5372_v9 = vpop.f32.mrb[138].mxu0 }
 0x358   : > { %v5453_v55 = vpop.f32.mrb[83].mxu1  ;;  %v5373_v32 = vpop.f32.mrb[139].mxu0 }
 0x359   : > { %v5454_v35 = vadd.f32 %v5453_v55, %v5452_v4  ;;  %v5791_v27 = vadd.f32 %v5371_v57, %v7799_v33  ;;  %v5374_v12 = vadd.f32 %v5373_v32, %v5372_v9 }
 0x35b   : > { %v5797_v46 = vadd.f32 %v5374_v12, %v7801_v37  ;;  %v7833_v17 = vadd.f32 %v5791_v27, %v5451_v16 }
 0x35d   : > { %v5455_v53 = vpop.f32.mrb[84].mxu1  ;;  %v5375_v59 = vpop.f32.mrb[140].mxu0  ;;  %v7835_v58 = vadd.f32 %v5797_v46, %v5454_v35 }
 0x35e   : > { %v5456_v22 = vpop.f32.mrb[85].mxu1  ;;  %v5376_v15 = vpop.f32.mrb[141].mxu0 }
 0x35f   : > { %v5457_v45 = vadd.f32 %v5456_v22, %v5455_v53  ;;  %v5458_v48 = vpop.f32.mrb[86].mxu1  ;;  %v5377_v14 = vadd.f32 %v5376_v15, %v5375_v59  ;;  %v5378_v26 = vpop.f32.mrb[142].mxu0 }
 0x360   : > { %v5459_v60 = vpop.f32.mrb[87].mxu1  ;;  %v5379_v56 = vpop.f32.mrb[143].mxu0 }
 0x361   : > { %v5460_v47 = vadd.f32 %v5459_v60, %v5458_v48  ;;  %v5806_v33 = vadd.f32 %v5377_v14, %v7803_v62  ;;  %v5380_v49 = vadd.f32 %v5379_v56, %v5378_v26 }
 0x363   : > { %v5812_v37 = vadd.f32 %v5380_v49, %v7805_v63  ;;  %v7839_v24 = vadd.f32 %v5806_v33, %v5457_v45 }
 0x365   : > { %v5461_v54 = vpop.f32.mrb[88].mxu1  ;;  %v5381_v39 = vpop.f32.mrb[144].mxu0  ;;  %v7841_v6 = vadd.f32 %v5812_v37, %v5460_v47 }
 0x366   : > { %v5462_v20 = vpop.f32.mrb[89].mxu1  ;;  %v5382_v36 = vpop.f32.mrb[145].mxu0 }
 0x367   : > { %v5463_v13 = vadd.f32 %v5462_v20, %v5461_v54  ;;  %v5464_v52 = vpop.f32.mrb[90].mxu1  ;;  %v5383_v61 = vadd.f32 %v5382_v36, %v5381_v39  ;;  %v5384_v0 = vpop.f32.mrb[146].mxu0 }
 0x368   : > { %v5465_v5 = vpop.f32.mrb[91].mxu1  ;;  %v5385_v25 = vpop.f32.mrb[147].mxu0 }
 0x369   : > { %v5466_v8 = vadd.f32 %v5465_v5, %v5464_v52  ;;  %v5803_v62 = vadd.f32 %v5383_v61, %v7807_v40  ;;  %v5386_v19 = vadd.f32 %v5385_v25, %v5384_v0 }
 0x36b   : > { %v5809_v63 = vadd.f32 %v5386_v19, %v7809_v50  ;;  %v7845_v10 = vadd.f32 %v5803_v62, %v5463_v13 }
 0x36d   : > { %v5467_v3 = vpop.f32.mrb[92].mxu1  ;;  %v5387_v21 = vpop.f32.mrb[148].mxu0  ;;  %v7847_v4 = vadd.f32 %v5809_v63, %v5466_v8 }
 0x36e   : > { %v5468_v16 = vpop.f32.mrb[93].mxu1  ;;  %v5388_v57 = vpop.f32.mrb[149].mxu0 }
 0x36f   : > { %v5469_v9 = vadd.f32 %v5468_v16, %v5467_v3  ;;  %v5470_v55 = vpop.f32.mrb[94].mxu1  ;;  %v5389_v32 = vadd.f32 %v5388_v57, %v5387_v21  ;;  %v5390_v35 = vpop.f32.mrb[150].mxu0 }
 0x370   : > { %v5471_v27 = vpop.f32.mrb[95].mxu1  ;;  %v5391_v12 = vpop.f32.mrb[151].mxu0 }
 0x371   : > { %v5472_v46 = vadd.f32 %v5471_v27, %v5470_v55  ;;  %v5818_v40 = vadd.f32 %v5389_v32, %v7811_v41  ;;  %v5392_v53 = vadd.f32 %v5391_v12, %v5390_v35 }
 0x373   : > { %v5824_v50 = vadd.f32 %v5392_v53, %v7813_v31  ;;  %v7851_v59 = vadd.f32 %v5818_v40, %v5469_v9 }
 0x375   : > { %v5473_v22 = vpop.f32.mrb[96].mxu1  ;;  %v5393_v15 = vpop.f32.mrb[152].mxu0  ;;  %v7853_v48 = vadd.f32 %v5824_v50, %v5472_v46 }
 0x376   : > { %v5474_v45 = vpop.f32.mrb[97].mxu1  ;;  %v5394_v14 = vpop.f32.mrb[153].mxu0 }
 0x377   : > { %v5475_v26 = vadd.f32 %v5474_v45, %v5473_v22  ;;  %v5476_v60 = vpop.f32.mrb[98].mxu1  ;;  %v5395_v56 = vadd.f32 %v5394_v14, %v5393_v15  ;;  %v5396_v47 = vpop.f32.mrb[154].mxu0  ;;  %v7874_v14 = vld [vmem:[%s8018_s4] ss:$0 sm:$0xff] }
 0x378   : > { %v5477_v33 = vpop.f32.mrb[99].mxu1  ;;  %v5397_v49 = vpop.f32.mrb[155].mxu0 }
 0x379   : > { %v5478_v37 = vadd.f32 %v5477_v33, %v5476_v60  ;;  %v5815_v41 = vadd.f32 %v5395_v56, %v7815_v30  ;;  %v5398_v54 = vadd.f32 %v5397_v49, %v5396_v47 }
 0x37b   : > { %v5821_v31 = vadd.f32 %v5398_v54, %v7817_v43  ;;  %v7857_v39 = vadd.f32 %v5815_v41, %v5475_v26  ;;  %v8055_v54 = vunpack.c.l.bf16 %v6673_v29 }
 0x37d   : > { %v5479_v20 = vpop.f32.mrb[100].mxu1  ;;  %v5399_v36 = vpop.f32.mrb[156].mxu0  ;;  %v7859_v52 = vadd.f32 %v5821_v31, %v5478_v37 }
 0x37e   : > { %v5480_v13 = vpop.f32.mrb[101].mxu1  ;;  %v5400_v61 = vpop.f32.mrb[157].mxu0 }
 0x37f   : > { %v5481_v0 = vadd.f32 %v5480_v13, %v5479_v20  ;;  %v5482_v5 = vpop.f32.mrb[102].mxu1  ;;  %v5401_v25 = vadd.f32 %v5400_v61, %v5399_v36  ;;  %v5402_v8 = vpop.f32.mrb[158].mxu0  ;;  %v8056_v20 = vunpack.c.l.bf16 %v6648_v7  ;;  %v8057_v13 = vunpack.c.h.bf16 %v6673_v29 }
 0x380   : > { %v5483_v62 = vpop.f32.mrb[103].mxu1  ;;  %v5403_v19 = vpop.f32.mrb[159].mxu0 }
 0x381   : > { %v5484_v63 = vadd.f32 %v5483_v62, %v5482_v5  ;;  %v5830_v30 = vadd.f32 %v5401_v25, %v7819_v34  ;;  %v5404_v3 = vadd.f32 %v5403_v19, %v5402_v8 }
 0x383   : > { %v5836_v43 = vadd.f32 %v5404_v3, %v7821_v44  ;;  %v7863_v21 = vadd.f32 %v5830_v30, %v5481_v0 }
 0x385   : > { %v5485_v16 = vpop.f32.mrb[104].mxu1  ;;  %v5405_v57 = vpop.f32.mrb[160].mxu0  ;;  %v7865_v55 = vadd.f32 %v5836_v43, %v5484_v63 }
 0x386   : > { %v5486_v9 = vpop.f32.mrb[105].mxu1  ;;  %v5406_v32 = vpop.f32.mrb[161].mxu0 }
 0x387   : > { %v5487_v35 = vadd.f32 %v5486_v9, %v5485_v16  ;;  %v5488_v27 = vpop.f32.mrb[106].mxu1  ;;  %v5407_v12 = vadd.f32 %v5406_v32, %v5405_v57  ;;  %v5408_v46 = vpop.f32.mrb[162].mxu0 }
 0x388   : > { %v5489_v40 = vpop.f32.mrb[107].mxu1  ;;  %v5409_v53 = vpop.f32.mrb[163].mxu0 }
 0x389   : > { %v5490_v50 = vadd.f32 %v5489_v40, %v5488_v27  ;;  %v5827_v34 = vadd.f32 %v5407_v12, %v7823_v51  ;;  %v5410_v22 = vadd.f32 %v5409_v53, %v5408_v46 }
 0x38b   : > { %v5833_v44 = vadd.f32 %v5410_v22, %v7825_v1  ;;  %v7869_v15 = vadd.f32 %v5827_v34, %v5487_v35 }
 0x38d   : > { %v5697_v45 = vpop.f32.mrb[60].mxu1  ;;  %v7877_v56 = vadd.f32 %v5833_v44, %v5490_v50 }
 0x38e   : > { %v5793_v26 = vadd.f32 %v7833_v17, %v5697_v45  ;;  %v4192_v60 = vpop.f32.mrb[61].mxu1 }
 0x38f   : > { %v5796_v47 = vadd.f32 %v7827_v38, %v4192_v60  ;;  %v5698_v33 = vpop.f32.mrb[62].mxu1 }
 0x390   : > { %v4280_v51 = vadd.f32 %v5793_v26, %v7874_v14  ;;  %v5799_v1 = vadd.f32 %v7835_v58, %v5698_v33  ;;  %v4195_v49 = vpop.f32.mrb[63].mxu1  ;;  %v8058_v58 = vunpack.c.h.bf16 %v6648_v7 }
 0x391   : > { %v4278_v37 = vadd.f32 %v5796_v47, %v7874_v14  ;;  %v5802_v41 = vadd.f32 %v7829_v2, %v4195_v49 }
 0x392   : > { %v4296_v31 = vadd.f32 %v4280_v51, %v8055_v54  ;;  %v4281_v17 = vadd.f32 %v5799_v1, %v7874_v14 }
 0x393   : > { %v4294_v36 = vadd.f32 %v4278_v37, %v8056_v20  ;;  %v4279_v38 = vadd.f32 %v5802_v41, %v7874_v14 }
 0x394   : > { %v4297_v61 = vadd.f32 %v4281_v17, %v8057_v13  ;;  %v4312_v25 = vmax.f32 %v4296_v31, 0.0 }
 0x395   : > { %v4295_v0 = vadd.f32 %v4279_v38, %v8058_v58  ;;  %v5701_v5 = vpop.f32.mrb[64].mxu1  ;;  %v4310_v19 = vmax.f32 %v4294_v36, 0.0  ;;  %v8066_v38 = vunpack.c.h.bf16 %v6815_v11 }
 0x396   : > { %v4313_v2 = vmax.f32 %v4297_v61, 0.0  ;;  %v5805_v8 = vadd.f32 %v7845_v10, %v5701_v5  ;;  %v4208_v62 = vpop.f32.mrb[65].mxu1  ;;  %v8059_v10 = vunpack.c.l.bf16 %v6745_v28  ;;  %v8067_v61 = vunpack.c.h.bf16 %v6771_v42 }
 0x397   : > { %v4311_v63 = vmax.f32 %v4295_v0, 0.0  ;;  %v5808_v30 = vadd.f32 %v7839_v24, %v4208_v62  ;;  %v5702_v3 = vpop.f32.mrb[66].mxu1  ;;  %v8060_v24 = vld [vmem:[#allocation11_spill] sm:$0xff] }
 0x398   : > { %v4946_v43 = vpack.c.bf16 %v4313_v2, %v4312_v25  ;;  %v4284_v29 = vadd.f32 %v5805_v8, %v7874_v14  ;;  %v5811_v16 = vadd.f32 %v7847_v4, %v5702_v3  ;;  %v4211_v7 = vpop.f32.mrb[67].mxu1  ;;  %v8061_v12 = vunpack.c.l.bf16 %v8060_v24 }
 0x399   : > { %v4941_v57 = vpack.c.bf16 %v4311_v63, %v4310_v19  ;;  %v4282_v9 = vadd.f32 %v5808_v30, %v7874_v14  ;;  %v5814_v32 = vadd.f32 %v7841_v6, %v4211_v7  ;;  %v8062_v4 = vunpack.c.h.bf16 %v6745_v28 }
 0x39a   : > { %4978 = vst [vmem:[%s7483_s11 + $0x8] sm:$0xff] %v4946_v43   ;;  %v4300_v35 = vadd.f32 %v4284_v29, %v8059_v10  ;;  %v4285_v27 = vadd.f32 %v5811_v16, %v7874_v14  ;;  %v8063_v50 = vunpack.c.h.bf16 %v8060_v24  ;;  %v8068_v16 = vunpack.c.l.bf16 %v6872_v23 }
 0x39b   : > { %4942 = vst [vmem:[%s7483_s11] sm:$0xff] %v4941_v57   ;;  %v4298_v46 = vadd.f32 %v4282_v9, %v8061_v12  ;;  %v4283_v40 = vadd.f32 %v5814_v32, %v7874_v14  ;;  %v8069_v57 = vunpack.c.l.bf16 %v6832_v18  ;;  %v8070_v32 = vunpack.c.h.bf16 %v6872_v23 }
 0x39c   : > { %v4301_v53 = vadd.f32 %v4285_v27, %v8062_v4  ;;  %v4316_v6 = vmax.f32 %v4300_v35, 0.0 }
 0x39d   : > { %v4299_v34 = vadd.f32 %v4283_v40, %v8063_v50  ;;  %v5705_v22 = vpop.f32.mrb[68].mxu1  ;;  %v4314_v60 = vmax.f32 %v4298_v46, 0.0 }
 0x39e   : > { %v4317_v44 = vmax.f32 %v4301_v53, 0.0  ;;  %v5817_v45 = vadd.f32 %v7857_v39, %v5705_v22  ;;  %v4224_v26 = vpop.f32.mrb[69].mxu1  ;;  %v8064_v39 = vunpack.c.l.bf16 %v6815_v11 }
 0x39f   : > { %v4315_v47 = vmax.f32 %v4299_v34, 0.0  ;;  %v5820_v33 = vadd.f32 %v7851_v59, %v4224_v26  ;;  %v5706_v51 = vpop.f32.mrb[70].mxu1  ;;  %v8065_v59 = vunpack.c.l.bf16 %v6771_v42 }
 0x3a0   : > { %v4956_v1 = vpack.c.bf16 %v4317_v44, %v4316_v6  ;;  %v4288_v28 = vadd.f32 %v5817_v45, %v7874_v14  ;;  %v5823_v49 = vadd.f32 %v7859_v52, %v5706_v51  ;;  %v4227_v37 = vpop.f32.mrb[71].mxu1 }
 0x3a1   : > { %v4951_v41 = vpack.c.bf16 %v4315_v47, %v4314_v60  ;;  %v4286_v54 = vadd.f32 %v5820_v33, %v7874_v14  ;;  %v5826_v31 = vadd.f32 %v7853_v48, %v4227_v37 }
 0x3a2   : > { %4980 = vst [vmem:[%s7483_s11 + $0x18] sm:$0xff] %v4956_v1   ;;  %v4304_v17 = vadd.f32 %v4288_v28, %v8064_v39  ;;  %v4289_v20 = vadd.f32 %v5823_v49, %v7874_v14 }
 0x3a3   : > { %4979 = vst [vmem:[%s7483_s11 + $0x10] sm:$0xff] %v4951_v41   ;;  %v4302_v36 = vadd.f32 %v4286_v54, %v8065_v59  ;;  %v4287_v52 = vadd.f32 %v5826_v31, %v7874_v14 }
 0x3a4   : > { %v4305_v13 = vadd.f32 %v4289_v20, %v8066_v38  ;;  %v4320_v0 = vmax.f32 %v4304_v17, 0.0 }
 0x3a5   : > { %v4303_v48 = vadd.f32 %v4287_v52, %v8067_v61  ;;  %v5709_v58 = vpop.f32.mrb[72].mxu1  ;;  %v4318_v8 = vmax.f32 %v4302_v36, 0.0 }
 0x3a6   : > { %v4321_v5 = vmax.f32 %v4305_v13, 0.0  ;;  %v5829_v25 = vadd.f32 %v7869_v15, %v5709_v58  ;;  %v4240_v2 = vpop.f32.mrb[73].mxu1 }
 0x3a7   : > { %v4319_v62 = vmax.f32 %v4303_v48, 0.0  ;;  %v5832_v19 = vadd.f32 %v7863_v21, %v4240_v2  ;;  %v5710_v63 = vpop.f32.mrb[74].mxu1 }
 0x3a8   : > { %v4966_v11 = vpack.c.bf16 %v4321_v5, %v4320_v0  ;;  %v4292_v30 = vadd.f32 %v5829_v25, %v7874_v14  ;;  %v5835_v42 = vadd.f32 %v7877_v56, %v5710_v63  ;;  %v4243_v3 = vpop.f32.mrb[75].mxu1 }
 0x3a9   : > { %v4961_v43 = vpack.c.bf16 %v4319_v62, %v4318_v8  ;;  %v4290_v29 = vadd.f32 %v5832_v19, %v7874_v14  ;;  %v5838_v15 = vadd.f32 %v7865_v55, %v4243_v3  ;;  %v8071_v55 = vunpack.c.h.bf16 %v6832_v18 }
 0x3aa   : > { %4982 = vst [vmem:[%s7483_s11 + $0x28] sm:$0xff] %v4966_v11   ;;  %v4308_v7 = vadd.f32 %v4292_v30, %v8068_v16  ;;  %v4293_v21 = vadd.f32 %v5835_v42, %v7874_v14 }
 0x3ab   : > { %4981 = vst [vmem:[%s7483_s11 + $0x20] sm:$0xff] %v4961_v43   ;;  %v4306_v9 = vadd.f32 %v4290_v29, %v8069_v57  ;;  %v4291_v56 = vadd.f32 %v5838_v15, %v7874_v14 }
 0x3ac   : > { %v4309_v10 = vadd.f32 %v4293_v21, %v8070_v32  ;;  %v4324_v27 = vmax.f32 %v4308_v7, 0.0 }
 0x3ad   : > { %v4307_v35 = vadd.f32 %v4291_v56, %v8071_v55  ;;  %v4322_v12 = vmax.f32 %v4306_v9, 0.0 }
 0x3ae   : > { %v4325_v24 = vmax.f32 %v4309_v10, 0.0 }
 0x3af   : > { %v4323_v46 = vmax.f32 %v4307_v35, 0.0 }
 0x3b0   : > { %v4976_v40 = vpack.c.bf16 %v4325_v24, %v4324_v27 }
 0x3b1   : > { %v4971_v18 = vpack.c.bf16 %v4323_v46, %v4322_v12 }
 0x3b2   : > { %4984 = vst [vmem:[%s7483_s11 + $0x38] sm:$0xff] %v4976_v40  }
 0x3b3   : > { %4983 = vst [vmem:[%s7483_s11 + $0x30] sm:$0xff] %v4971_v18  }
 0x3b4   : > { %6187 = shalt.err (!%p6184_p11)
}
 0x3b5   : > { %s6188_s11 = scalar_lea.hbm %s7954_s16, 1024  ;;  %s6192_s26 = scalar_lea.hbm %s8019_s5, 4096 }
 0x3b6   : > { %p6189_p13 = scmp.ne.s32.totalorder %s7954_s16, %s6188_s11  ;;  %p6193_p3 = scmp.lt.u32.totalorder %s7954_s16, %s8019_s5 }
 0x3b7   : > { %p6194_p8 = scmp.lt.u32.totalorder %s6192_s26, %s6188_s11  ;;  %p6196_p12 = scmp.lt.u32.totalorder %s6188_s11, %s7954_s16 }
 0x3b8   : > { %p6190_p1 = pnand %p6189_p13, %p8073_p0 }
 0x3b9   : > { %p6195_p10 = por %p6194_p8, %p6193_p3 }
 0x3ba   : > { %p6191_p4 = pneg %p6190_p1 }
 0x3bb   : > { %p6197_p2 = por %p6196_p12, %p6195_p10 }
 0x3bd   : > { %p6198_p5 = pnand %p6197_p2, %p6191_p4 }
 0x3bf   : > { %6201 = shalt.err (!%p6198_p5)
}
 0x3c0   : > { %s6280_s6 = smov 64   ;;  %s6281_s9 = smov 4  }
 0x3c1   : > { %5896 = dma.vmem_to_hbm [thread:$0]  (%p8073_p0), %s7956_s27, 1024, %s7954_s16, %s7962_s2, %s6280_s6, %s6280_s6, %s6281_s9  }
 0x3c2 PF: > { %p5908_p6 = scmp.ge.s32.totalorder %s6272_s25, 2  ;;  %s4438_s10 = sand.u32 1, %s6244_s18  }
 0x3c3   : > { %p8074_p7 = scmp.ne.s32.totalorder %s8032_s8, 0  ;;  %s4439_s29 = scalar_lea.sflag [#allocation5], %s4438_s10 }
 0x3c5   : > { %p5903_p9 = pnand %p5908_p6, %p8074_p7 }
 0x3c7   : > { %6239 = dma.done.wait (!%p5903_p9), %s4439_s29, 1024  }
 0x3c8   : > { %6241 = vsyncadd (!%p5903_p9), %s4439_s29, 4294966272  ;;  %s19_s25 = sadd.s32 1, %s6272_s25   ;;  %s8075_s7 = sld [smem:[#allocation9_spill]] }
 0x3c9   : > { %p16_p11 = scmp.ge.s32.totalorder %s19_s25, 6   ;;  %s8076_s18 = smov %s6248_s19 }
 0x3ca   : > { %s8077_s19 = smov %s6252_s20  ;;  %s8078_s20 = smov %s6391_s13 }
 0x3cb   : > { %s8079_s21 = smov %s6264_s23  ;;  %s8080_s22 = smov %s6268_s24 }
 0x3cc   : > { %s8081_s23 = smov %s8084_s28  ;;  %18 = sbr.rel (!%p16_p11) target bundleno = 8 (0x8), region = 94 }
 0x3ce   : > { %s8082_s24 = smov %s8075_s7 }
 0x3d3   :  { %4444 = vsyncpa [#allocation4], 1 }
 0x3d4   :  { %4446 = vsyncpa [#allocation4 + $0x1], 1 }
 0x3d5   :  { %4447 = vsyncpa [#allocation5], 1 }
 0x3d6   :  { %4449 = vsyncpa [#allocation5 + $0x1], 1 }

</bundles_post_ra>
